<compile_context>
chip_gen: v7x
topology: tpu7x:2x2x1
jax: 0.10.0
libtpu: 0.0.40
codegen_flags: <defaults>
</compile_context>

<pallas_src>
import numpy as np
import jax
import jax.numpy as jnp
from jax import lax
from jax.experimental import pallas as pl
from jax.experimental.pallas import tpu as pltpu

# ----------------------------- configuration --------------------------------
VOCAB_A = 32          # article vocab
VOCAB_S = 32          # summary vocab
EMB = 8               # embedding dim
HID = 16              # decoder_hidden_dim (== encoder hidden, seeds the decoders)
OUT_DIM = 6           # decoder_LSTM_f.output_dim
TARGET = OUT_DIM + 2  # target_size = 8
START_IDX = TARGET - 2
STOP_IDX = TARGET - 1
PAD_IDX = 0
TA = 10               # article length
LS = 8                # summary length
BATCH = 2

CONSTRAINTS = [[1, 0, 0, 0, 0, 0, 0, 1],
               [0, 1, 1, 1, 1, 1, 1, 0],
               [0, 1, 1, 1, 1, 1, 1, 0],
               [0, 1, 1, 1, 1, 1, 1, 0],
               [0, 0, 1, 0, 1, 0, 0, 0],
               [0, 0, 0, 1, 0, 1, 0, 0],
               [0, 0, 0, 0, 0, 0, 0, 0],
               [0, 1, 1, 1, 1, 1, 0, 0]]


# =============================================================================
# Fused kernel: embeddings + encoder + bidi decoders + head + CRF + Viterbi
# =============================================================================
def _fused_kernel(art_ref, sumf_ref, sumb_ref, sum_ref, tags_ref, qlab_ref,
                  emb_a_ref, emb_s_ref,
                  enc_wih_ref, enc_whh_ref, enc_b_ref,
                  dec_wx_ref, dec_wc_ref, dec_b_ref, dec_whh_ref,
                  h2_w_ref, h2_wq_ref, h2_b_ref,
                  trans_ref, cmask_ref,
                  loss_ref, binary_ref, bps_ref, final_ref,
                  hcat_ref):
    B, H, Ta, L, C = BATCH, HID, TA, LS, TARGET
    H2 = 2 * H

    # -------- in-kernel embedding "gathers" via one-hot matmuls --------
    art_oh = (lax.broadcasted_iota(jnp.int32, (Ta * B, VOCAB_A), 1)
              == art_ref[...]).astype(jnp.float32)                         # (Ta*B, Va)
    emb_art = jnp.dot(art_oh, emb_a_ref[...],
                      preferred_element_type=jnp.float32)                  # (Ta*B, E)

    tok_iota = lax.broadcasted_iota(jnp.int32, (L * B, VOCAB_S), 1)
    ohf = (tok_iota == sumf_ref[...]).astype(jnp.float32)                  # (L*B, Vs)
    ohb = (tok_iota == sumb_ref[...]).astype(jnp.float32)
    emb_fb = jnp.dot(jnp.concatenate([ohf, ohb], axis=0), emb_s_ref[...],
                     preferred_element_type=jnp.float32)                   # (2*L*B, E)
    emb_cat = jnp.concatenate([emb_fb[:L * B, :], emb_fb[L * B:, :]],
                              axis=-1)                                     # (L*B, 2E)

    # -------- encoder LSTM (input projection hoisted; gate order i,f,o,g) ----
    enc_gx = jnp.dot(emb_art, enc_wih_ref[...],
                     preferred_element_type=jnp.float32) + enc_b_ref[...]  # (Ta*B, 4H)
    enc_whh = enc_whh_ref[...]
    h = jnp.zeros((B, H), jnp.float32)
    c = jnp.zeros((B, H), jnp.float32)
    hsum = jnp.zeros((B, H), jnp.float32)
    for t in range(Ta):                      # fully unrolled; h/c loop-carried
        gates = enc_gx[t * B:(t + 1) * B, :] + jnp.dot(
            h, enc_whh, preferred_element_type=jnp.float32)
        s = jax.nn.sigmoid(gates[:, :3 * H])             # one EUP group: i|f|o
        g = jnp.tanh(gates[:, 3 * H:])
        c = s[:, H:2 * H] * c + s[:, :H] * g
        h = s[:, 2 * H:3 * H] * jnp.tanh(c)
        hsum = hsum + h
    context = hsum * (1.0 / Ta)              # mean-pooled encoder context (B, H)

    # -------- fused fwd/bwd decoders: one block-diagonal recurrence per step --
    gx = jnp.dot(emb_cat, dec_wx_ref[...],
                 preferred_element_type=jnp.float32)                       # (L*B, 8H)
    gc = jnp.dot(context, dec_wc_ref[...],
                 preferred_element_type=jnp.float32) + dec_b_ref[...]      # (B, 8H)
    gx = gx + jnp.concatenate([gc] * L, axis=0)   # context+bias hoisted off the chain
    dec_whh = dec_whh_ref[...]                                             # (2H, 8H)

    h_cat = jnp.concatenate([h, h], axis=-1)      # [hf | hb], seeded from encoder
    c_cat = jnp.concatenate([c, c], axis=-1)
    for t in range(L):                            # fully unrolled
        gates = gx[t * B:(t + 1) * B, :] + jnp.dot(
            h_cat, dec_whh, preferred_element_type=jnp.float32)            # (B, 8H)
        s = jax.nn.sigmoid(gates[:, :3 * H2])     # [i_f i_b|f_f f_b|o_f o_b]
        g = jnp.tanh(gates[:, 3 * H2:])           # [g_f g_b]
        c_cat = s[:, H2:2 * H2] * c_cat + s[:, :H2] * g
        h_cat = s[:, 2 * H2:3 * H2] * jnp.tanh(c_cat)
        # output_forward[t] and output_backward[L-1-t] into the head scratch
        hcat_ref[t * B:(t + 1) * B, 0:H] = h_cat[:, :H]
        hcat_ref[(L - 1 - t) * B:(L - t) * B, H:2 * H] = h_cat[:, H:]

    # -------- batched hidden2tag + hidden2binary head (single matmul) --------
    head = (jnp.dot(hcat_ref[...], h2_w_ref[...],
                    preferred_element_type=jnp.float32)
            + qlab_ref[...] * h2_wq_ref[...] + h2_b_ref[...])              # (L*B, C+1)
    feats = head[:, :C]                                                    # (L*B, C)
    bin_col = head[:, C:]                                                  # (L*B, 1)
    bsum = jnp.zeros((B, 1), jnp.float32)
    for t in range(L):
        bsum = bsum + bin_col[t * B:(t + 1) * B, :]
    binary_ref[...] = bsum * (1.0 / L)      # mean over time (unmasked, as reference)

    # -------- masks / constrained transitions (computed in-kernel) -----------
    valid = sum_ref[...] != PAD_IDX                    # (L*B, 1) bool
    maskf = valid.astype(jnp.float32)
    maski = valid.astype(jnp.int32)
    trans = trans_ref[...]
    cmask = cmask_ref[...]
    ctrans = trans * cmask - 1000000.0 * (1.0 - cmask)

    # -------- CRF forward (log-sum-exp) + constrained Viterbi in one pass ----
    col2 = lax.broadcasted_iota(jnp.int32, (B, C), 1)
    init = jnp.where(col2 == START_IDX, 0.0, -10000.0).astype(jnp.float32)
    idx3 = lax.broadcasted_iota(jnp.int32, (B, C, C), 2)     # hoisted out of loop

    scores = init                                  # partition-function scores
    ms = init                                      # Viterbi max scores
    bp_list = []
    for t in range(L):                             # fully unrolled over time
        keep = valid[t * B:(t + 1) * B, :]         # (B, 1) bool
        emit_t = feats[t * B:(t + 1) * B, :]       # (B, C)

        score_t = scores[:, None, :] + emit_t[:, :, None] + trans[None, :, :]
        m = jnp.max(score_t, axis=-1)
        lse = m + jnp.log(jnp.sum(jnp.exp(score_t - m[..., None]), axis=-1))
        scores = jnp.where(keep, lse, scores)

        acc = ms[:, None, :] + ctrans[None, :, :]                  # (B, C, C)
        amax = jnp.max(acc, axis=-1)
        cand = jnp.where(acc == amax[..., None], idx3, C)
        bp_list.append(jnp.min(cand, axis=-1).astype(jnp.int32))   # first-max argmax
        ms = jnp.where(keep, amax + emit_t, ms)

    z = scores + trans[STOP_IDX:STOP_IDX + 1, :]
    m2 = jnp.max(z, axis=-1, keepdims=True)
    fwd = m2 + jnp.log(jnp.sum(jnp.exp(z - m2), axis=-1, keepdims=True))    # (B, 1)

    final_ref[...] = ms + ctrans[STOP_IDX:STOP_IDX + 1, :]
    bps_ref[...] = jnp.concatenate(bp_list, axis=-1)          # lane-dense (B, L*C)

    # -------- gold-path score (one-hot formulation, MXU trans-pair) ----------
    cidx = lax.broadcasted_iota(jnp.int32, (L * B, C), 1)
    oh_curr = (cidx == tags_ref[...]).astype(jnp.float32)                  # (L*B, C)
    start_oh = (col2 == START_IDX).astype(jnp.float32)                     # (B, C)
    oh_prev = jnp.concatenate([start_oh, oh_curr[:(L - 1) * B, :]], axis=0)

    emit_g = jnp.sum(feats * oh_curr, axis=-1, keepdims=True)              # (L*B, 1)
    tp = jnp.sum(oh_prev * jnp.dot(oh_curr, trans,
                                   preferred_element_type=jnp.float32),
                 axis=-1, keepdims=True)                                   # (L*B, 1)
    step_sc = (emit_g + tp) * maskf

    gold = jnp.zeros((B, 1), jnp.float32)
    n = jnp.zeros((B, 1), jnp.int32)
    for t in range(L):
        gold = gold + step_sc[t * B:(t + 1) * B, :]
        n = n + maski[t * B:(t + 1) * B, :]

    lt_oh = jnp.where(n == 0, start_oh, 0.0)                   # last-tag one-hot
    for t in range(L):
        lt_oh = lt_oh + jnp.where(n == t + 1, oh_curr[t * B:(t + 1) * B, :], 0.0)
    last_sc = jnp.sum(lt_oh * trans[STOP_IDX:STOP_IDX + 1, :],
                      axis=-1, keepdims=True)                              # (B, 1)
    gold = gold + last_sc

    diff = fwd - gold                                                      # (B, 1)
    loss_ref[...] = jnp.sum(diff, axis=0, keepdims=True) * (1.0 / B)


# ----------------------------- parameters ------------------------------------
def init_params(key):
    ks = jax.random.split(key, 16)
    H = HID

    def nrm(k, shape, scale=0.1):
        return (scale * jax.random.normal(k, shape)).astype(jnp.float32)

    # Per-decoder weights, gate order [i, f, o, g] (our convention; all random).
    decf_wx, decb_wx = nrm(ks[5], (EMB, 4 * H)), nrm(ks[9], (EMB, 4 * H))
    decf_wc, decb_wc = nrm(ks[6], (H, 4 * H)), nrm(ks[10], (H, 4 * H))
    decf_whh, decb_whh = nrm(ks[7], (H, 4 * H)), nrm(ks[11], (H, 4 * H))
    decf_b, decb_b = nrm(ks[8], (1, 4 * H)), nrm(ks[12], (1, 4 * H))

    def fuse(mf, mb):
        # fused gate column order: [i_f i_b | f_f f_b | o_f o_b | g_f g_b]
        return jnp.concatenate(
            [mf[:, 0:H], mb[:, 0:H], mf[:, H:2 * H], mb[:, H:2 * H],
             mf[:, 2 * H:3 * H], mb[:, 2 * H:3 * H],
             mf[:, 3 * H:], mb[:, 3 * H:]], axis=-1)

    zx = jnp.zeros_like(decf_wx)
    zh = jnp.zeros_like(decf_whh)
    dec_wx = jnp.concatenate([fuse(decf_wx, zx), fuse(zx, decb_wx)], axis=0)   # (2E, 8H)
    dec_whh = jnp.concatenate([fuse(decf_whh, zh), fuse(zh, decb_whh)], axis=0)  # (2H, 8H)
    dec_wc = fuse(decf_wc, decb_wc)                                            # (H, 8H)
    dec_b = fuse(decf_b, decb_b)                                               # (1, 8H)

    # fused hidden2tag (cols 0..TARGET-1) + hidden2binary (last col); the
    # quantity_label row of the weight is split off so no 33-wide concat is needed.
    h2_full = nrm(ks[13], (2 * H + 1, TARGET + 1))
    xavier_std = float(np.sqrt(2.0 / (TARGET + TARGET)))
    return dict(
        emb_article=nrm(ks[0], (VOCAB_A, EMB)),
        emb_summary=nrm(ks[1], (VOCAB_S, EMB)),
        enc_wih=nrm(ks[2], (EMB, 4 * H)),
        enc_whh=nrm(ks[3], (H, 4 * H)),
        enc_b=nrm(ks[4], (1, 4 * H)),
        dec_wx=dec_wx, dec_wc=dec_wc, dec_b=dec_b, dec_whh=dec_whh,
        h2_w=h2_full[:2 * H, :], h2_wq=h2_full[2 * H:2 * H + 1, :],
        h2_b=nrm(ks[14], (1, TARGET + 1)),
        transitions=(xavier_std * jax.random.normal(ks[15], (TARGET, TARGET))
                     ).astype(jnp.float32),
        constraint_mask=jnp.array(CONSTRAINTS, jnp.float32),
    )


# ----------------------------- forward wrapper --------------------------------
def model_forward(params, article, article_lengths, summary, summary_lengths,
                  tags, quantity_label):
    # TODO(synk): article_lengths / summary_lengths unused by the synthesized
    # encoder/decoders (no packed sequences); masking comes from PAD tokens.
    del article_lengths, summary_lengths
    Ta, B = article.shape
    L = summary.shape[0]

    # Reference token-feeding quirk:
    #   forward inputs:  [s[0], s[0], s[1], ..., s[L-2]]
    #   backward inputs: [s[L-1], s[L-1], s[L-2], ..., s[1]]
    idx_f = jnp.concatenate([jnp.zeros((1,), jnp.int32),
                             jnp.arange(0, L - 1, dtype=jnp.int32)])
    idx_b = jnp.concatenate([jnp.full((1,), L - 1, jnp.int32),
                             jnp.arange(L - 1, 0, -1, dtype=jnp.int32)])
    art_flat = article.reshape(Ta * B, 1)
    sumf_flat = summary[idx_f].reshape(L * B, 1)
    sumb_flat = summary[idx_b].reshape(L * B, 1)
    sum_flat = summary.reshape(L * B, 1)
    tags_flat = tags.reshape(L * B, 1)
    qlab_flat = quantity_label.reshape(L * B, 1)

    loss, out_binary, bps, final = pl.pallas_call(
        _fused_kernel,
        out_shape=(jax.ShapeDtypeStruct((1, 1), jnp.float32),          # loss (mean)
                   jax.ShapeDtypeStruct((B, 1), jnp.float32),          # output_binary
                   jax.ShapeDtypeStruct((B, L * TARGET), jnp.int32),   # backpointers
                   jax.ShapeDtypeStruct((B, TARGET), jnp.float32)),    # final viterbi
        scratch_shapes=[pltpu.VMEM((L * B, 2 * HID), jnp.float32)],
    )(art_flat, sumf_flat, sumb_flat, sum_flat, tags_flat, qlab_flat,
      params['emb_article'], params['emb_summary'],
      params['enc_wih'], params['enc_whh'], params['enc_b'],
      params['dec_wx'], params['dec_wc'], params['dec_b'], params['dec_whh'],
      params['h2_w'], params['h2_wq'], params['h2_b'],
      params['transitions'], params['constraint_mask'])
    return loss, out_binary, bps, final


# ----------------------------- main -------------------------------------------
if __name__ == "__main__":
    key = jax.random.PRNGKey(0)
    pkey, k1, k2, k3, k4 = jax.random.split(key, 5)
    params = init_params(pkey)

    article = jax.random.randint(k1, (TA, BATCH), 1, VOCAB_A, dtype=jnp.int32)
    summary = jax.random.randint(k2, (LS, BATCH), 1, VOCAB_S, dtype=jnp.int32)
    summary = summary.at[LS - 2:, 1].set(PAD_IDX)   # pad the tail of batch element 1
    tags = jax.random.randint(k3, (LS, BATCH), 0, OUT_DIM, dtype=jnp.int32)
    quantity_label = jax.random.normal(k4, (LS, BATCH), jnp.float32)
    article_lengths = jnp.full((BATCH,), TA, jnp.int32)
    summary_lengths = jnp.sum((summary != PAD_IDX).astype(jnp.int32), axis=0)

    fwd = jax.jit(model_forward)
    loss, out_binary, bps, final = fwd(params, article, article_lengths,
                                       summary, summary_lengths, tags,
                                       quantity_label)
    jax.block_until_ready((loss, out_binary, bps, final))

    # Host-side Viterbi backtracking (mirrors the reference's Python list loop).
    final_np = np.asarray(final)                               # (B, C)
    bps_np = np.asarray(bps).reshape(BATCH, LS, TARGET)        # (B, L, C)
    lens_np = np.asarray(summary_lengths)
    tag_seq = []
    for b in range(BATCH):
        best_tag_b = int(final_np[b].argmax())
        seq_len = int(lens_np[b])
        best_path = [best_tag_b] + [int(bps_np[b, t, best_tag_b])
                                    for t in reversed(range(seq_len))]
        tag_seq.append(best_path[-2::-1])

    assert np.isfinite(float(np.asarray(loss)[0, 0]))
    assert np.all(np.isfinite(np.asarray(out_binary))) and out_binary.shape == (BATCH, 1)
    assert len(tag_seq) == BATCH
    print("KERNEL_OK")
</pallas_src>

<mosaic_0001>
module attributes {stable_mosaic.version = 11 : i64} {
  func.func @_fused_kernel(%arg0: memref<20x1xi32, #tpu.memory_space<vmem>>, %arg1: memref<16x1xi32, #tpu.memory_space<vmem>>, %arg2: memref<16x1xi32, #tpu.memory_space<vmem>>, %arg3: memref<16x1xi32, #tpu.memory_space<vmem>>, %arg4: memref<16x1xi32, #tpu.memory_space<vmem>>, %arg5: memref<16x1xf32, #tpu.memory_space<vmem>>, %arg6: memref<32x8xf32, #tpu.memory_space<vmem>>, %arg7: memref<32x8xf32, #tpu.memory_space<vmem>>, %arg8: memref<8x64xf32, #tpu.memory_space<vmem>>, %arg9: memref<16x64xf32, #tpu.memory_space<vmem>>, %arg10: memref<1x64xf32, #tpu.memory_space<vmem>>, %arg11: memref<16x128xf32, #tpu.memory_space<vmem>>, %arg12: memref<16x128xf32, #tpu.memory_space<vmem>>, %arg13: memref<1x128xf32, #tpu.memory_space<vmem>>, %arg14: memref<32x128xf32, #tpu.memory_space<vmem>>, %arg15: memref<32x9xf32, #tpu.memory_space<vmem>>, %arg16: memref<1x9xf32, #tpu.memory_space<vmem>>, %arg17: memref<1x9xf32, #tpu.memory_space<vmem>>, %arg18: memref<8x8xf32, #tpu.memory_space<vmem>>, %arg19: memref<8x8xf32, #tpu.memory_space<vmem>>, %arg20: memref<1x1xf32, #tpu.memory_space<vmem>>, %arg21: memref<2x1xf32, #tpu.memory_space<vmem>>, %arg22: memref<2x64xi32, #tpu.memory_space<vmem>>, %arg23: memref<2x8xf32, #tpu.memory_space<vmem>>, %arg24: memref<16x32xf32, #tpu.memory_space<vmem>>) attributes {dimension_semantics = [], scalar_prefetch = 0 : i64, scratch_operands = 1 : i64, tpu.core_type = #tpu.core_type<tc>} {
    %0 = tpu.iota {dimensions = array<i32: 1>} : vector<20x32xi32>
    %c0 = arith.constant 0 : index
    %c0_0 = arith.constant 0 : index
    %1 = vector.load %arg0[%c0, %c0_0] : memref<20x1xi32, #tpu.memory_space<vmem>>, vector<20x1xi32>
    %2 = vector.broadcast %1 : vector<20x1xi32> to vector<20x32xi32>
    %3 = arith.cmpi eq, %0, %2 : vector<20x32xi32>
    %4 = arith.extui %3 : vector<20x32xi1> to vector<20x32xi32>
    %5 = arith.sitofp %4 : vector<20x32xi32> to vector<20x32xf32>
    %c0_1 = arith.constant 0 : index
    %c0_2 = arith.constant 0 : index
    %6 = vector.load %arg6[%c0_1, %c0_2] : memref<32x8xf32, #tpu.memory_space<vmem>>, vector<32x8xf32>
    %cst = arith.constant dense<0.000000e+00> : vector<20x8xf32>
    %7 = tpu.matmul %5, %6, %cst {dimension_numbers = #tpu.dot_dimension_numbers<[1], [0], [0], [1], [0, 0, 1, 1], [], []>} : vector<20x32xf32>, vector<32x8xf32>, vector<20x8xf32> -> vector<20x8xf32>
    %8 = tpu.iota {dimensions = array<i32: 1>} : vector<16x32xi32>
    %c0_3 = arith.constant 0 : index
    %c0_4 = arith.constant 0 : index
    %9 = vector.load %arg1[%c0_3, %c0_4] : memref<16x1xi32, #tpu.memory_space<vmem>>, vector<16x1xi32>
    %10 = vector.broadcast %9 : vector<16x1xi32> to vector<16x32xi32>
    %11 = arith.cmpi eq, %8, %10 : vector<16x32xi32>
    %12 = arith.extui %11 : vector<16x32xi1> to vector<16x32xi32>
    %13 = arith.sitofp %12 : vector<16x32xi32> to vector<16x32xf32>
    %c0_5 = arith.constant 0 : index
    %c0_6 = arith.constant 0 : index
    %14 = vector.load %arg2[%c0_5, %c0_6] : memref<16x1xi32, #tpu.memory_space<vmem>>, vector<16x1xi32>
    %15 = vector.broadcast %14 : vector<16x1xi32> to vector<16x32xi32>
    %16 = arith.cmpi eq, %8, %15 : vector<16x32xi32>
    %17 = arith.extui %16 : vector<16x32xi1> to vector<16x32xi32>
    %18 = arith.sitofp %17 : vector<16x32xi32> to vector<16x32xf32>
    %19 = tpu.concatenate %13, %18 in 0 : vector<16x32xf32>, vector<16x32xf32> -> vector<32x32xf32>
    %c0_7 = arith.constant 0 : index
    %c0_8 = arith.constant 0 : index
    %20 = vector.load %arg7[%c0_7, %c0_8] : memref<32x8xf32, #tpu.memory_space<vmem>>, vector<32x8xf32>
    %cst_9 = arith.constant dense<0.000000e+00> : vector<32x8xf32>
    %21 = tpu.matmul %19, %20, %cst_9 {dimension_numbers = #tpu.dot_dimension_numbers<[1], [0], [0], [1], [0, 0, 1, 1], [], []>} : vector<32x32xf32>, vector<32x8xf32>, vector<32x8xf32> -> vector<32x8xf32>
    %22 = vector.extract_strided_slice %21 {offsets = [0, 0], sizes = [16, 8], strides = [1, 1]} : vector<32x8xf32> to vector<16x8xf32>
    %23 = vector.extract_strided_slice %21 {offsets = [16, 0], sizes = [16, 8], strides = [1, 1]} : vector<32x8xf32> to vector<16x8xf32>
    %24 = tpu.concatenate %22, %23 in 1 : vector<16x8xf32>, vector<16x8xf32> -> vector<16x16xf32>
    %c0_10 = arith.constant 0 : index
    %c0_11 = arith.constant 0 : index
    %25 = vector.load %arg8[%c0_10, %c0_11] : memref<8x64xf32, #tpu.memory_space<vmem>>, vector<8x64xf32>
    %cst_12 = arith.constant dense<0.000000e+00> : vector<20x64xf32>
    %26 = tpu.matmul %7, %25, %cst_12 {dimension_numbers = #tpu.dot_dimension_numbers<[1], [0], [0], [1], [0, 0, 1, 1], [], []>} : vector<20x8xf32>, vector<8x64xf32>, vector<20x64xf32> -> vector<20x64xf32>
    %c0_13 = arith.constant 0 : index
    %c0_14 = arith.constant 0 : index
    %27 = vector.load %arg10[%c0_13, %c0_14] : memref<1x64xf32, #tpu.memory_space<vmem>>, vector<1x64xf32>
    %28 = vector.broadcast %27 : vector<1x64xf32> to vector<20x64xf32>
    %29 = arith.addf %26, %28 : vector<20x64xf32>
    %c0_15 = arith.constant 0 : index
    %c0_16 = arith.constant 0 : index
    %30 = vector.load %arg9[%c0_15, %c0_16] : memref<16x64xf32, #tpu.memory_space<vmem>>, vector<16x64xf32>
    %cst_17 = arith.constant 0.000000e+00 : f32
    %31 = vector.broadcast %cst_17 : f32 to vector<2x16xf32>
    %cst_18 = arith.constant 0.000000e+00 : f32
    %32 = vector.broadcast %cst_18 : f32 to vector<2x16xf32>
    %cst_19 = arith.constant 0.000000e+00 : f32
    %33 = vector.broadcast %cst_19 : f32 to vector<2x16xf32>
    %34 = vector.extract_strided_slice %29 {offsets = [0, 0], sizes = [2, 64], strides = [1, 1]} : vector<20x64xf32> to vector<2x64xf32>
    %cst_20 = arith.constant dense<0.000000e+00> : vector<2x64xf32>
    %35 = tpu.matmul %31, %30, %cst_20 {dimension_numbers = #tpu.dot_dimension_numbers<[1], [0], [0], [1], [0, 0, 1, 1], [], []>} : vector<2x16xf32>, vector<16x64xf32>, vector<2x64xf32> -> vector<2x64xf32>
    %36 = arith.addf %34, %35 : vector<2x64xf32>
    %37 = vector.extract_strided_slice %36 {offsets = [0, 0], sizes = [2, 48], strides = [1, 1]} : vector<2x64xf32> to vector<2x48xf32>
    %38 = arith.negf %37 : vector<2x48xf32>
    %39 = math.exp %38 : vector<2x48xf32>
    %cst_21 = arith.constant 1.000000e+00 : f32
    %40 = vector.broadcast %cst_21 : f32 to vector<2x48xf32>
    %41 = arith.addf %40, %39 : vector<2x48xf32>
    %42 = arith.divf %40, %41 : vector<2x48xf32>
    %43 = vector.extract_strided_slice %36 {offsets = [0, 48], sizes = [2, 16], strides = [1, 1]} : vector<2x64xf32> to vector<2x16xf32>
    %44 = math.tanh %43 : vector<2x16xf32>
    %45 = vector.extract_strided_slice %42 {offsets = [0, 16], sizes = [2, 16], strides = [1, 1]} : vector<2x48xf32> to vector<2x16xf32>
    %46 = arith.mulf %45, %32 : vector<2x16xf32>
    %47 = vector.extract_strided_slice %42 {offsets = [0, 0], sizes = [2, 16], strides = [1, 1]} : vector<2x48xf32> to vector<2x16xf32>
    %48 = arith.mulf %47, %44 : vector<2x16xf32>
    %49 = arith.addf %46, %48 : vector<2x16xf32>
    %50 = vector.extract_strided_slice %42 {offsets = [0, 32], sizes = [2, 16], strides = [1, 1]} : vector<2x48xf32> to vector<2x16xf32>
    %51 = math.tanh %49 : vector<2x16xf32>
    %52 = arith.mulf %50, %51 : vector<2x16xf32>
    %53 = arith.addf %33, %52 : vector<2x16xf32>
    %54 = vector.extract_strided_slice %29 {offsets = [2, 0], sizes = [2, 64], strides = [1, 1]} : vector<20x64xf32> to vector<2x64xf32>
    %cst_22 = arith.constant dense<0.000000e+00> : vector<2x64xf32>
    %55 = tpu.matmul %52, %30, %cst_22 {dimension_numbers = #tpu.dot_dimension_numbers<[1], [0], [0], [1], [0, 0, 1, 1], [], []>} : vector<2x16xf32>, vector<16x64xf32>, vector<2x64xf32> -> vector<2x64xf32>
    %56 = arith.addf %54, %55 : vector<2x64xf32>
    %57 = vector.extract_strided_slice %56 {offsets = [0, 0], sizes = [2, 48], strides = [1, 1]} : vector<2x64xf32> to vector<2x48xf32>
    %58 = arith.negf %57 : vector<2x48xf32>
    %59 = math.exp %58 : vector<2x48xf32>
    %cst_23 = arith.constant 1.000000e+00 : f32
    %60 = vector.broadcast %cst_23 : f32 to vector<2x48xf32>
    %61 = arith.addf %60, %59 : vector<2x48xf32>
    %62 = arith.divf %60, %61 : vector<2x48xf32>
    %63 = vector.extract_strided_slice %56 {offsets = [0, 48], sizes = [2, 16], strides = [1, 1]} : vector<2x64xf32> to vector<2x16xf32>
    %64 = math.tanh %63 : vector<2x16xf32>
    %65 = vector.extract_strided_slice %62 {offsets = [0, 16], sizes = [2, 16], strides = [1, 1]} : vector<2x48xf32> to vector<2x16xf32>
    %66 = arith.mulf %65, %49 : vector<2x16xf32>
    %67 = vector.extract_strided_slice %62 {offsets = [0, 0], sizes = [2, 16], strides = [1, 1]} : vector<2x48xf32> to vector<2x16xf32>
    %68 = arith.mulf %67, %64 : vector<2x16xf32>
    %69 = arith.addf %66, %68 : vector<2x16xf32>
    %70 = vector.extract_strided_slice %62 {offsets = [0, 32], sizes = [2, 16], strides = [1, 1]} : vector<2x48xf32> to vector<2x16xf32>
    %71 = math.tanh %69 : vector<2x16xf32>
    %72 = arith.mulf %70, %71 : vector<2x16xf32>
    %73 = arith.addf %53, %72 : vector<2x16xf32>
    %74 = vector.extract_strided_slice %29 {offsets = [4, 0], sizes = [2, 64], strides = [1, 1]} : vector<20x64xf32> to vector<2x64xf32>
    %cst_24 = arith.constant dense<0.000000e+00> : vector<2x64xf32>
    %75 = tpu.matmul %72, %30, %cst_24 {dimension_numbers = #tpu.dot_dimension_numbers<[1], [0], [0], [1], [0, 0, 1, 1], [], []>} : vector<2x16xf32>, vector<16x64xf32>, vector<2x64xf32> -> vector<2x64xf32>
    %76 = arith.addf %74, %75 : vector<2x64xf32>
    %77 = vector.extract_strided_slice %76 {offsets = [0, 0], sizes = [2, 48], strides = [1, 1]} : vector<2x64xf32> to vector<2x48xf32>
    %78 = arith.negf %77 : vector<2x48xf32>
    %79 = math.exp %78 : vector<2x48xf32>
    %cst_25 = arith.constant 1.000000e+00 : f32
    %80 = vector.broadcast %cst_25 : f32 to vector<2x48xf32>
    %81 = arith.addf %80, %79 : vector<2x48xf32>
    %82 = arith.divf %80, %81 : vector<2x48xf32>
    %83 = vector.extract_strided_slice %76 {offsets = [0, 48], sizes = [2, 16], strides = [1, 1]} : vector<2x64xf32> to vector<2x16xf32>
    %84 = math.tanh %83 : vector<2x16xf32>
    %85 = vector.extract_strided_slice %82 {offsets = [0, 16], sizes = [2, 16], strides = [1, 1]} : vector<2x48xf32> to vector<2x16xf32>
    %86 = arith.mulf %85, %69 : vector<2x16xf32>
    %87 = vector.extract_strided_slice %82 {offsets = [0, 0], sizes = [2, 16], strides = [1, 1]} : vector<2x48xf32> to vector<2x16xf32>
    %88 = arith.mulf %87, %84 : vector<2x16xf32>
    %89 = arith.addf %86, %88 : vector<2x16xf32>
    %90 = vector.extract_strided_slice %82 {offsets = [0, 32], sizes = [2, 16], strides = [1, 1]} : vector<2x48xf32> to vector<2x16xf32>
    %91 = math.tanh %89 : vector<2x16xf32>
    %92 = arith.mulf %90, %91 : vector<2x16xf32>
    %93 = arith.addf %73, %92 : vector<2x16xf32>
    %94 = vector.extract_strided_slice %29 {offsets = [6, 0], sizes = [2, 64], strides = [1, 1]} : vector<20x64xf32> to vector<2x64xf32>
    %cst_26 = arith.constant dense<0.000000e+00> : vector<2x64xf32>
    %95 = tpu.matmul %92, %30, %cst_26 {dimension_numbers = #tpu.dot_dimension_numbers<[1], [0], [0], [1], [0, 0, 1, 1], [], []>} : vector<2x16xf32>, vector<16x64xf32>, vector<2x64xf32> -> vector<2x64xf32>
    %96 = arith.addf %94, %95 : vector<2x64xf32>
    %97 = vector.extract_strided_slice %96 {offsets = [0, 0], sizes = [2, 48], strides = [1, 1]} : vector<2x64xf32> to vector<2x48xf32>
    %98 = arith.negf %97 : vector<2x48xf32>
    %99 = math.exp %98 : vector<2x48xf32>
    %cst_27 = arith.constant 1.000000e+00 : f32
    %100 = vector.broadcast %cst_27 : f32 to vector<2x48xf32>
    %101 = arith.addf %100, %99 : vector<2x48xf32>
    %102 = arith.divf %100, %101 : vector<2x48xf32>
    %103 = vector.extract_strided_slice %96 {offsets = [0, 48], sizes = [2, 16], strides = [1, 1]} : vector<2x64xf32> to vector<2x16xf32>
    %104 = math.tanh %103 : vector<2x16xf32>
    %105 = vector.extract_strided_slice %102 {offsets = [0, 16], sizes = [2, 16], strides = [1, 1]} : vector<2x48xf32> to vector<2x16xf32>
    %106 = arith.mulf %105, %89 : vector<2x16xf32>
    %107 = vector.extract_strided_slice %102 {offsets = [0, 0], sizes = [2, 16], strides = [1, 1]} : vector<2x48xf32> to vector<2x16xf32>
    %108 = arith.mulf %107, %104 : vector<2x16xf32>
    %109 = arith.addf %106, %108 : vector<2x16xf32>
    %110 = vector.extract_strided_slice %102 {offsets = [0, 32], sizes = [2, 16], strides = [1, 1]} : vector<2x48xf32> to vector<2x16xf32>
    %111 = math.tanh %109 : vector<2x16xf32>
    %112 = arith.mulf %110, %111 : vector<2x16xf32>
    %113 = arith.addf %93, %112 : vector<2x16xf32>
    %114 = vector.extract_strided_slice %29 {offsets = [8, 0], sizes = [2, 64], strides = [1, 1]} : vector<20x64xf32> to vector<2x64xf32>
    %cst_28 = arith.constant dense<0.000000e+00> : vector<2x64xf32>
    %115 = tpu.matmul %112, %30, %cst_28 {dimension_numbers = #tpu.dot_dimension_numbers<[1], [0], [0], [1], [0, 0, 1, 1], [], []>} : vector<2x16xf32>, vector<16x64xf32>, vector<2x64xf32> -> vector<2x64xf32>
    %116 = arith.addf %114, %115 : vector<2x64xf32>
    %117 = vector.extract_strided_slice %116 {offsets = [0, 0], sizes = [2, 48], strides = [1, 1]} : vector<2x64xf32> to vector<2x48xf32>
    %118 = arith.negf %117 : vector<2x48xf32>
    %119 = math.exp %118 : vector<2x48xf32>
    %cst_29 = arith.constant 1.000000e+00 : f32
    %120 = vector.broadcast %cst_29 : f32 to vector<2x48xf32>
    %121 = arith.addf %120, %119 : vector<2x48xf32>
    %122 = arith.divf %120, %121 : vector<2x48xf32>
    %123 = vector.extract_strided_slice %116 {offsets = [0, 48], sizes = [2, 16], strides = [1, 1]} : vector<2x64xf32> to vector<2x16xf32>
    %124 = math.tanh %123 : vector<2x16xf32>
    %125 = vector.extract_strided_slice %122 {offsets = [0, 16], sizes = [2, 16], strides = [1, 1]} : vector<2x48xf32> to vector<2x16xf32>
    %126 = arith.mulf %125, %109 : vector<2x16xf32>
    %127 = vector.extract_strided_slice %122 {offsets = [0, 0], sizes = [2, 16], strides = [1, 1]} : vector<2x48xf32> to vector<2x16xf32>
    %128 = arith.mulf %127, %124 : vector<2x16xf32>
    %129 = arith.addf %126, %128 : vector<2x16xf32>
    %130 = vector.extract_strided_slice %122 {offsets = [0, 32], sizes = [2, 16], strides = [1, 1]} : vector<2x48xf32> to vector<2x16xf32>
    %131 = math.tanh %129 : vector<2x16xf32>
    %132 = arith.mulf %130, %131 : vector<2x16xf32>
    %133 = arith.addf %113, %132 : vector<2x16xf32>
    %134 = vector.extract_strided_slice %29 {offsets = [10, 0], sizes = [2, 64], strides = [1, 1]} : vector<20x64xf32> to vector<2x64xf32>
    %cst_30 = arith.constant dense<0.000000e+00> : vector<2x64xf32>
    %135 = tpu.matmul %132, %30, %cst_30 {dimension_numbers = #tpu.dot_dimension_numbers<[1], [0], [0], [1], [0, 0, 1, 1], [], []>} : vector<2x16xf32>, vector<16x64xf32>, vector<2x64xf32> -> vector<2x64xf32>
    %136 = arith.addf %134, %135 : vector<2x64xf32>
    %137 = vector.extract_strided_slice %136 {offsets = [0, 0], sizes = [2, 48], strides = [1, 1]} : vector<2x64xf32> to vector<2x48xf32>
    %138 = arith.negf %137 : vector<2x48xf32>
    %139 = math.exp %138 : vector<2x48xf32>
    %cst_31 = arith.constant 1.000000e+00 : f32
    %140 = vector.broadcast %cst_31 : f32 to vector<2x48xf32>
    %141 = arith.addf %140, %139 : vector<2x48xf32>
    %142 = arith.divf %140, %141 : vector<2x48xf32>
    %143 = vector.extract_strided_slice %136 {offsets = [0, 48], sizes = [2, 16], strides = [1, 1]} : vector<2x64xf32> to vector<2x16xf32>
    %144 = math.tanh %143 : vector<2x16xf32>
    %145 = vector.extract_strided_slice %142 {offsets = [0, 16], sizes = [2, 16], strides = [1, 1]} : vector<2x48xf32> to vector<2x16xf32>
    %146 = arith.mulf %145, %129 : vector<2x16xf32>
    %147 = vector.extract_strided_slice %142 {offsets = [0, 0], sizes = [2, 16], strides = [1, 1]} : vector<2x48xf32> to vector<2x16xf32>
    %148 = arith.mulf %147, %144 : vector<2x16xf32>
    %149 = arith.addf %146, %148 : vector<2x16xf32>
    %150 = vector.extract_strided_slice %142 {offsets = [0, 32], sizes = [2, 16], strides = [1, 1]} : vector<2x48xf32> to vector<2x16xf32>
    %151 = math.tanh %149 : vector<2x16xf32>
    %152 = arith.mulf %150, %151 : vector<2x16xf32>
    %153 = arith.addf %133, %152 : vector<2x16xf32>
    %154 = vector.extract_strided_slice %29 {offsets = [12, 0], sizes = [2, 64], strides = [1, 1]} : vector<20x64xf32> to vector<2x64xf32>
    %cst_32 = arith.constant dense<0.000000e+00> : vector<2x64xf32>
    %155 = tpu.matmul %152, %30, %cst_32 {dimension_numbers = #tpu.dot_dimension_numbers<[1], [0], [0], [1], [0, 0, 1, 1], [], []>} : vector<2x16xf32>, vector<16x64xf32>, vector<2x64xf32> -> vector<2x64xf32>
    %156 = arith.addf %154, %155 : vector<2x64xf32>
    %157 = vector.extract_strided_slice %156 {offsets = [0, 0], sizes = [2, 48], strides = [1, 1]} : vector<2x64xf32> to vector<2x48xf32>
    %158 = arith.negf %157 : vector<2x48xf32>
    %159 = math.exp %158 : vector<2x48xf32>
    %cst_33 = arith.constant 1.000000e+00 : f32
    %160 = vector.broadcast %cst_33 : f32 to vector<2x48xf32>
    %161 = arith.addf %160, %159 : vector<2x48xf32>
    %162 = arith.divf %160, %161 : vector<2x48xf32>
    %163 = vector.extract_strided_slice %156 {offsets = [0, 48], sizes = [2, 16], strides = [1, 1]} : vector<2x64xf32> to vector<2x16xf32>
    %164 = math.tanh %163 : vector<2x16xf32>
    %165 = vector.extract_strided_slice %162 {offsets = [0, 16], sizes = [2, 16], strides = [1, 1]} : vector<2x48xf32> to vector<2x16xf32>
    %166 = arith.mulf %165, %149 : vector<2x16xf32>
    %167 = vector.extract_strided_slice %162 {offsets = [0, 0], sizes = [2, 16], strides = [1, 1]} : vector<2x48xf32> to vector<2x16xf32>
    %168 = arith.mulf %167, %164 : vector<2x16xf32>
    %169 = arith.addf %166, %168 : vector<2x16xf32>
    %170 = vector.extract_strided_slice %162 {offsets = [0, 32], sizes = [2, 16], strides = [1, 1]} : vector<2x48xf32> to vector<2x16xf32>
    %171 = math.tanh %169 : vector<2x16xf32>
    %172 = arith.mulf %170, %171 : vector<2x16xf32>
    %173 = arith.addf %153, %172 : vector<2x16xf32>
    %174 = vector.extract_strided_slice %29 {offsets = [14, 0], sizes = [2, 64], strides = [1, 1]} : vector<20x64xf32> to vector<2x64xf32>
    %cst_34 = arith.constant dense<0.000000e+00> : vector<2x64xf32>
    %175 = tpu.matmul %172, %30, %cst_34 {dimension_numbers = #tpu.dot_dimension_numbers<[1], [0], [0], [1], [0, 0, 1, 1], [], []>} : vector<2x16xf32>, vector<16x64xf32>, vector<2x64xf32> -> vector<2x64xf32>
    %176 = arith.addf %174, %175 : vector<2x64xf32>
    %177 = vector.extract_strided_slice %176 {offsets = [0, 0], sizes = [2, 48], strides = [1, 1]} : vector<2x64xf32> to vector<2x48xf32>
    %178 = arith.negf %177 : vector<2x48xf32>
    %179 = math.exp %178 : vector<2x48xf32>
    %cst_35 = arith.constant 1.000000e+00 : f32
    %180 = vector.broadcast %cst_35 : f32 to vector<2x48xf32>
    %181 = arith.addf %180, %179 : vector<2x48xf32>
    %182 = arith.divf %180, %181 : vector<2x48xf32>
    %183 = vector.extract_strided_slice %176 {offsets = [0, 48], sizes = [2, 16], strides = [1, 1]} : vector<2x64xf32> to vector<2x16xf32>
    %184 = math.tanh %183 : vector<2x16xf32>
    %185 = vector.extract_strided_slice %182 {offsets = [0, 16], sizes = [2, 16], strides = [1, 1]} : vector<2x48xf32> to vector<2x16xf32>
    %186 = arith.mulf %185, %169 : vector<2x16xf32>
    %187 = vector.extract_strided_slice %182 {offsets = [0, 0], sizes = [2, 16], strides = [1, 1]} : vector<2x48xf32> to vector<2x16xf32>
    %188 = arith.mulf %187, %184 : vector<2x16xf32>
    %189 = arith.addf %186, %188 : vector<2x16xf32>
    %190 = vector.extract_strided_slice %182 {offsets = [0, 32], sizes = [2, 16], strides = [1, 1]} : vector<2x48xf32> to vector<2x16xf32>
    %191 = math.tanh %189 : vector<2x16xf32>
    %192 = arith.mulf %190, %191 : vector<2x16xf32>
    %193 = arith.addf %173, %192 : vector<2x16xf32>
    %194 = vector.extract_strided_slice %29 {offsets = [16, 0], sizes = [2, 64], strides = [1, 1]} : vector<20x64xf32> to vector<2x64xf32>
    %cst_36 = arith.constant dense<0.000000e+00> : vector<2x64xf32>
    %195 = tpu.matmul %192, %30, %cst_36 {dimension_numbers = #tpu.dot_dimension_numbers<[1], [0], [0], [1], [0, 0, 1, 1], [], []>} : vector<2x16xf32>, vector<16x64xf32>, vector<2x64xf32> -> vector<2x64xf32>
    %196 = arith.addf %194, %195 : vector<2x64xf32>
    %197 = vector.extract_strided_slice %196 {offsets = [0, 0], sizes = [2, 48], strides = [1, 1]} : vector<2x64xf32> to vector<2x48xf32>
    %198 = arith.negf %197 : vector<2x48xf32>
    %199 = math.exp %198 : vector<2x48xf32>
    %cst_37 = arith.constant 1.000000e+00 : f32
    %200 = vector.broadcast %cst_37 : f32 to vector<2x48xf32>
    %201 = arith.addf %200, %199 : vector<2x48xf32>
    %202 = arith.divf %200, %201 : vector<2x48xf32>
    %203 = vector.extract_strided_slice %196 {offsets = [0, 48], sizes = [2, 16], strides = [1, 1]} : vector<2x64xf32> to vector<2x16xf32>
    %204 = math.tanh %203 : vector<2x16xf32>
    %205 = vector.extract_strided_slice %202 {offsets = [0, 16], sizes = [2, 16], strides = [1, 1]} : vector<2x48xf32> to vector<2x16xf32>
    %206 = arith.mulf %205, %189 : vector<2x16xf32>
    %207 = vector.extract_strided_slice %202 {offsets = [0, 0], sizes = [2, 16], strides = [1, 1]} : vector<2x48xf32> to vector<2x16xf32>
    %208 = arith.mulf %207, %204 : vector<2x16xf32>
    %209 = arith.addf %206, %208 : vector<2x16xf32>
    %210 = vector.extract_strided_slice %202 {offsets = [0, 32], sizes = [2, 16], strides = [1, 1]} : vector<2x48xf32> to vector<2x16xf32>
    %211 = math.tanh %209 : vector<2x16xf32>
    %212 = arith.mulf %210, %211 : vector<2x16xf32>
    %213 = arith.addf %193, %212 : vector<2x16xf32>
    %214 = vector.extract_strided_slice %29 {offsets = [18, 0], sizes = [2, 64], strides = [1, 1]} : vector<20x64xf32> to vector<2x64xf32>
    %cst_38 = arith.constant dense<0.000000e+00> : vector<2x64xf32>
    %215 = tpu.matmul %212, %30, %cst_38 {dimension_numbers = #tpu.dot_dimension_numbers<[1], [0], [0], [1], [0, 0, 1, 1], [], []>} : vector<2x16xf32>, vector<16x64xf32>, vector<2x64xf32> -> vector<2x64xf32>
    %216 = arith.addf %214, %215 : vector<2x64xf32>
    %217 = vector.extract_strided_slice %216 {offsets = [0, 0], sizes = [2, 48], strides = [1, 1]} : vector<2x64xf32> to vector<2x48xf32>
    %218 = arith.negf %217 : vector<2x48xf32>
    %219 = math.exp %218 : vector<2x48xf32>
    %cst_39 = arith.constant 1.000000e+00 : f32
    %220 = vector.broadcast %cst_39 : f32 to vector<2x48xf32>
    %221 = arith.addf %220, %219 : vector<2x48xf32>
    %222 = arith.divf %220, %221 : vector<2x48xf32>
    %223 = vector.extract_strided_slice %216 {offsets = [0, 48], sizes = [2, 16], strides = [1, 1]} : vector<2x64xf32> to vector<2x16xf32>
    %224 = math.tanh %223 : vector<2x16xf32>
    %225 = vector.extract_strided_slice %222 {offsets = [0, 16], sizes = [2, 16], strides = [1, 1]} : vector<2x48xf32> to vector<2x16xf32>
    %226 = arith.mulf %225, %209 : vector<2x16xf32>
    %227 = vector.extract_strided_slice %222 {offsets = [0, 0], sizes = [2, 16], strides = [1, 1]} : vector<2x48xf32> to vector<2x16xf32>
    %228 = arith.mulf %227, %224 : vector<2x16xf32>
    %229 = arith.addf %226, %228 : vector<2x16xf32>
    %230 = vector.extract_strided_slice %222 {offsets = [0, 32], sizes = [2, 16], strides = [1, 1]} : vector<2x48xf32> to vector<2x16xf32>
    %231 = math.tanh %229 : vector<2x16xf32>
    %232 = arith.mulf %230, %231 : vector<2x16xf32>
    %233 = arith.addf %213, %232 : vector<2x16xf32>
    %cst_40 = arith.constant 1.000000e-01 : f32
    %234 = vector.broadcast %cst_40 : f32 to vector<2x16xf32>
    %235 = arith.mulf %233, %234 : vector<2x16xf32>
    %c0_41 = arith.constant 0 : index
    %c0_42 = arith.constant 0 : index
    %236 = vector.load %arg11[%c0_41, %c0_42] : memref<16x128xf32, #tpu.memory_space<vmem>>, vector<16x128xf32>
    %cst_43 = arith.constant dense<0.000000e+00> : vector<16x128xf32>
    %237 = tpu.matmul %24, %236, %cst_43 {dimension_numbers = #tpu.dot_dimension_numbers<[1], [0], [0], [1], [0, 0, 1, 1], [], []>} : vector<16x16xf32>, vector<16x128xf32>, vector<16x128xf32> -> vector<16x128xf32>
    %c0_44 = arith.constant 0 : index
    %c0_45 = arith.constant 0 : index
    %238 = vector.load %arg12[%c0_44, %c0_45] : memref<16x128xf32, #tpu.memory_space<vmem>>, vector<16x128xf32>
    %cst_46 = arith.constant dense<0.000000e+00> : vector<2x128xf32>
    %239 = tpu.matmul %235, %238, %cst_46 {dimension_numbers = #tpu.dot_dimension_numbers<[1], [0], [0], [1], [0, 0, 1, 1], [], []>} : vector<2x16xf32>, vector<16x128xf32>, vector<2x128xf32> -> vector<2x128xf32>
    %c0_47 = arith.constant 0 : index
    %c0_48 = arith.constant 0 : index
    %240 = vector.load %arg13[%c0_47, %c0_48] : memref<1x128xf32, #tpu.memory_space<vmem>>, vector<1x128xf32>
    %241 = vector.broadcast %240 : vector<1x128xf32> to vector<2x128xf32>
    %242 = arith.addf %239, %241 : vector<2x128xf32>
    %243 = tpu.concatenate %242, %242, %242, %242, %242, %242, %242, %242 in 0 : vector<2x128xf32>, vector<2x128xf32>, vector<2x128xf32>, vector<2x128xf32>, vector<2x128xf32>, vector<2x128xf32>, vector<2x128xf32>, vector<2x128xf32> -> vector<16x128xf32>
    %244 = arith.addf %237, %243 : vector<16x128xf32>
    %c0_49 = arith.constant 0 : index
    %c0_50 = arith.constant 0 : index
    %245 = vector.load %arg14[%c0_49, %c0_50] : memref<32x128xf32, #tpu.memory_space<vmem>>, vector<32x128xf32>
    %246 = tpu.concatenate %232, %232 in 1 : vector<2x16xf32>, vector<2x16xf32> -> vector<2x32xf32>
    %247 = tpu.concatenate %229, %229 in 1 : vector<2x16xf32>, vector<2x16xf32> -> vector<2x32xf32>
    %248 = vector.extract_strided_slice %244 {offsets = [0, 0], sizes = [2, 128], strides = [1, 1]} : vector<16x128xf32> to vector<2x128xf32>
    %cst_51 = arith.constant dense<0.000000e+00> : vector<2x128xf32>
    %249 = tpu.matmul %246, %245, %cst_51 {dimension_numbers = #tpu.dot_dimension_numbers<[1], [0], [0], [1], [0, 0, 1, 1], [], []>} : vector<2x32xf32>, vector<32x128xf32>, vector<2x128xf32> -> vector<2x128xf32>
    %250 = arith.addf %248, %249 : vector<2x128xf32>
    %251 = vector.extract_strided_slice %250 {offsets = [0, 0], sizes = [2, 96], strides = [1, 1]} : vector<2x128xf32> to vector<2x96xf32>
    %252 = arith.negf %251 : vector<2x96xf32>
    %253 = math.exp %252 : vector<2x96xf32>
    %cst_52 = arith.constant 1.000000e+00 : f32
    %254 = vector.broadcast %cst_52 : f32 to vector<2x96xf32>
    %255 = arith.addf %254, %253 : vector<2x96xf32>
    %256 = arith.divf %254, %255 : vector<2x96xf32>
    %257 = vector.extract_strided_slice %250 {offsets = [0, 96], sizes = [2, 32], strides = [1, 1]} : vector<2x128xf32> to vector<2x32xf32>
    %258 = math.tanh %257 : vector<2x32xf32>
    %259 = vector.extract_strided_slice %256 {offsets = [0, 32], sizes = [2, 32], strides = [1, 1]} : vector<2x96xf32> to vector<2x32xf32>
    %260 = arith.mulf %259, %247 : vector<2x32xf32>
    %261 = vector.extract_strided_slice %256 {offsets = [0, 0], sizes = [2, 32], strides = [1, 1]} : vector<2x96xf32> to vector<2x32xf32>
    %262 = arith.mulf %261, %258 : vector<2x32xf32>
    %263 = arith.addf %260, %262 : vector<2x32xf32>
    %264 = vector.extract_strided_slice %256 {offsets = [0, 64], sizes = [2, 32], strides = [1, 1]} : vector<2x96xf32> to vector<2x32xf32>
    %265 = math.tanh %263 : vector<2x32xf32>
    %266 = arith.mulf %264, %265 : vector<2x32xf32>
    %267 = vector.extract_strided_slice %266 {offsets = [0, 0], sizes = [2, 16], strides = [1, 1]} : vector<2x32xf32> to vector<2x16xf32>
    %c0_53 = arith.constant 0 : index
    %c0_54 = arith.constant 0 : index
    %268 = vector.load %arg24[%c0_53, %c0_54] : memref<16x32xf32, #tpu.memory_space<vmem>>, vector<2x16xf32>
    tpu.vector_store %arg24[%c0_53, %c0_54], %267 {strides = array<i32>} : memref<16x32xf32, #tpu.memory_space<vmem>>, vector<2x16xf32>,
    %269 = vector.extract_strided_slice %266 {offsets = [0, 16], sizes = [2, 16], strides = [1, 1]} : vector<2x32xf32> to vector<2x16xf32>
    %c14 = arith.constant 14 : index
    %c16 = arith.constant 16 : index
    %270 = vector.load %arg24[%c14, %c16] : memref<16x32xf32, #tpu.memory_space<vmem>>, vector<2x16xf32>
    tpu.vector_store %arg24[%c14, %c16], %269 {strides = array<i32>} : memref<16x32xf32, #tpu.memory_space<vmem>>, vector<2x16xf32>,
    %271 = vector.extract_strided_slice %244 {offsets = [2, 0], sizes = [2, 128], strides = [1, 1]} : vector<16x128xf32> to vector<2x128xf32>
    %cst_55 = arith.constant dense<0.000000e+00> : vector<2x128xf32>
    %272 = tpu.matmul %266, %245, %cst_55 {dimension_numbers = #tpu.dot_dimension_numbers<[1], [0], [0], [1], [0, 0, 1, 1], [], []>} : vector<2x32xf32>, vector<32x128xf32>, vector<2x128xf32> -> vector<2x128xf32>
    %273 = arith.addf %271, %272 : vector<2x128xf32>
    %274 = vector.extract_strided_slice %273 {offsets = [0, 0], sizes = [2, 96], strides = [1, 1]} : vector<2x128xf32> to vector<2x96xf32>
    %275 = arith.negf %274 : vector<2x96xf32>
    %276 = math.exp %275 : vector<2x96xf32>
    %cst_56 = arith.constant 1.000000e+00 : f32
    %277 = vector.broadcast %cst_56 : f32 to vector<2x96xf32>
    %278 = arith.addf %277, %276 : vector<2x96xf32>
    %279 = arith.divf %277, %278 : vector<2x96xf32>
    %280 = vector.extract_strided_slice %273 {offsets = [0, 96], sizes = [2, 32], strides = [1, 1]} : vector<2x128xf32> to vector<2x32xf32>
    %281 = math.tanh %280 : vector<2x32xf32>
    %282 = vector.extract_strided_slice %279 {offsets = [0, 32], sizes = [2, 32], strides = [1, 1]} : vector<2x96xf32> to vector<2x32xf32>
    %283 = arith.mulf %282, %263 : vector<2x32xf32>
    %284 = vector.extract_strided_slice %279 {offsets = [0, 0], sizes = [2, 32], strides = [1, 1]} : vector<2x96xf32> to vector<2x32xf32>
    %285 = arith.mulf %284, %281 : vector<2x32xf32>
    %286 = arith.addf %283, %285 : vector<2x32xf32>
    %287 = vector.extract_strided_slice %279 {offsets = [0, 64], sizes = [2, 32], strides = [1, 1]} : vector<2x96xf32> to vector<2x32xf32>
    %288 = math.tanh %286 : vector<2x32xf32>
    %289 = arith.mulf %287, %288 : vector<2x32xf32>
    %290 = vector.extract_strided_slice %289 {offsets = [0, 0], sizes = [2, 16], strides = [1, 1]} : vector<2x32xf32> to vector<2x16xf32>
    %c2 = arith.constant 2 : index
    %c0_57 = arith.constant 0 : index
    %291 = vector.load %arg24[%c2, %c0_57] : memref<16x32xf32, #tpu.memory_space<vmem>>, vector<2x16xf32>
    tpu.vector_store %arg24[%c2, %c0_57], %290 {strides = array<i32>} : memref<16x32xf32, #tpu.memory_space<vmem>>, vector<2x16xf32>,
    %292 = vector.extract_strided_slice %289 {offsets = [0, 16], sizes = [2, 16], strides = [1, 1]} : vector<2x32xf32> to vector<2x16xf32>
    %c12 = arith.constant 12 : index
    %c16_58 = arith.constant 16 : index
    %293 = vector.load %arg24[%c12, %c16_58] : memref<16x32xf32, #tpu.memory_space<vmem>>, vector<2x16xf32>
    tpu.vector_store %arg24[%c12, %c16_58], %292 {strides = array<i32>} : memref<16x32xf32, #tpu.memory_space<vmem>>, vector<2x16xf32>,
    %294 = vector.extract_strided_slice %244 {offsets = [4, 0], sizes = [2, 128], strides = [1, 1]} : vector<16x128xf32> to vector<2x128xf32>
    %cst_59 = arith.constant dense<0.000000e+00> : vector<2x128xf32>
    %295 = tpu.matmul %289, %245, %cst_59 {dimension_numbers = #tpu.dot_dimension_numbers<[1], [0], [0], [1], [0, 0, 1, 1], [], []>} : vector<2x32xf32>, vector<32x128xf32>, vector<2x128xf32> -> vector<2x128xf32>
    %296 = arith.addf %294, %295 : vector<2x128xf32>
    %297 = vector.extract_strided_slice %296 {offsets = [0, 0], sizes = [2, 96], strides = [1, 1]} : vector<2x128xf32> to vector<2x96xf32>
    %298 = arith.negf %297 : vector<2x96xf32>
    %299 = math.exp %298 : vector<2x96xf32>
    %cst_60 = arith.constant 1.000000e+00 : f32
    %300 = vector.broadcast %cst_60 : f32 to vector<2x96xf32>
    %301 = arith.addf %300, %299 : vector<2x96xf32>
    %302 = arith.divf %300, %301 : vector<2x96xf32>
    %303 = vector.extract_strided_slice %296 {offsets = [0, 96], sizes = [2, 32], strides = [1, 1]} : vector<2x128xf32> to vector<2x32xf32>
    %304 = math.tanh %303 : vector<2x32xf32>
    %305 = vector.extract_strided_slice %302 {offsets = [0, 32], sizes = [2, 32], strides = [1, 1]} : vector<2x96xf32> to vector<2x32xf32>
    %306 = arith.mulf %305, %286 : vector<2x32xf32>
    %307 = vector.extract_strided_slice %302 {offsets = [0, 0], sizes = [2, 32], strides = [1, 1]} : vector<2x96xf32> to vector<2x32xf32>
    %308 = arith.mulf %307, %304 : vector<2x32xf32>
    %309 = arith.addf %306, %308 : vector<2x32xf32>
    %310 = vector.extract_strided_slice %302 {offsets = [0, 64], sizes = [2, 32], strides = [1, 1]} : vector<2x96xf32> to vector<2x32xf32>
    %311 = math.tanh %309 : vector<2x32xf32>
    %312 = arith.mulf %310, %311 : vector<2x32xf32>
    %313 = vector.extract_strided_slice %312 {offsets = [0, 0], sizes = [2, 16], strides = [1, 1]} : vector<2x32xf32> to vector<2x16xf32>
    %c4 = arith.constant 4 : index
    %c0_61 = arith.constant 0 : index
    %314 = vector.load %arg24[%c4, %c0_61] : memref<16x32xf32, #tpu.memory_space<vmem>>, vector<2x16xf32>
    tpu.vector_store %arg24[%c4, %c0_61], %313 {strides = array<i32>} : memref<16x32xf32, #tpu.memory_space<vmem>>, vector<2x16xf32>,
    %315 = vector.extract_strided_slice %312 {offsets = [0, 16], sizes = [2, 16], strides = [1, 1]} : vector<2x32xf32> to vector<2x16xf32>
    %c10 = arith.constant 10 : index
    %c16_62 = arith.constant 16 : index
    %316 = vector.load %arg24[%c10, %c16_62] : memref<16x32xf32, #tpu.memory_space<vmem>>, vector<2x16xf32>
    tpu.vector_store %arg24[%c10, %c16_62], %315 {strides = array<i32>} : memref<16x32xf32, #tpu.memory_space<vmem>>, vector<2x16xf32>,
    %317 = vector.extract_strided_slice %244 {offsets = [6, 0], sizes = [2, 128], strides = [1, 1]} : vector<16x128xf32> to vector<2x128xf32>
    %cst_63 = arith.constant dense<0.000000e+00> : vector<2x128xf32>
    %318 = tpu.matmul %312, %245, %cst_63 {dimension_numbers = #tpu.dot_dimension_numbers<[1], [0], [0], [1], [0, 0, 1, 1], [], []>} : vector<2x32xf32>, vector<32x128xf32>, vector<2x128xf32> -> vector<2x128xf32>
    %319 = arith.addf %317, %318 : vector<2x128xf32>
    %320 = vector.extract_strided_slice %319 {offsets = [0, 0], sizes = [2, 96], strides = [1, 1]} : vector<2x128xf32> to vector<2x96xf32>
    %321 = arith.negf %320 : vector<2x96xf32>
    %322 = math.exp %321 : vector<2x96xf32>
    %cst_64 = arith.constant 1.000000e+00 : f32
    %323 = vector.broadcast %cst_64 : f32 to vector<2x96xf32>
    %324 = arith.addf %323, %322 : vector<2x96xf32>
    %325 = arith.divf %323, %324 : vector<2x96xf32>
    %326 = vector.extract_strided_slice %319 {offsets = [0, 96], sizes = [2, 32], strides = [1, 1]} : vector<2x128xf32> to vector<2x32xf32>
    %327 = math.tanh %326 : vector<2x32xf32>
    %328 = vector.extract_strided_slice %325 {offsets = [0, 32], sizes = [2, 32], strides = [1, 1]} : vector<2x96xf32> to vector<2x32xf32>
    %329 = arith.mulf %328, %309 : vector<2x32xf32>
    %330 = vector.extract_strided_slice %325 {offsets = [0, 0], sizes = [2, 32], strides = [1, 1]} : vector<2x96xf32> to vector<2x32xf32>
    %331 = arith.mulf %330, %327 : vector<2x32xf32>
    %332 = arith.addf %329, %331 : vector<2x32xf32>
    %333 = vector.extract_strided_slice %325 {offsets = [0, 64], sizes = [2, 32], strides = [1, 1]} : vector<2x96xf32> to vector<2x32xf32>
    %334 = math.tanh %332 : vector<2x32xf32>
    %335 = arith.mulf %333, %334 : vector<2x32xf32>
    %336 = vector.extract_strided_slice %335 {offsets = [0, 0], sizes = [2, 16], strides = [1, 1]} : vector<2x32xf32> to vector<2x16xf32>
    %c6 = arith.constant 6 : index
    %c0_65 = arith.constant 0 : index
    %337 = vector.load %arg24[%c6, %c0_65] : memref<16x32xf32, #tpu.memory_space<vmem>>, vector<2x16xf32>
    tpu.vector_store %arg24[%c6, %c0_65], %336 {strides = array<i32>} : memref<16x32xf32, #tpu.memory_space<vmem>>, vector<2x16xf32>,
    %338 = vector.extract_strided_slice %335 {offsets = [0, 16], sizes = [2, 16], strides = [1, 1]} : vector<2x32xf32> to vector<2x16xf32>
    %c8 = arith.constant 8 : index
    %c16_66 = arith.constant 16 : index
    %339 = vector.load %arg24[%c8, %c16_66] : memref<16x32xf32, #tpu.memory_space<vmem>>, vector<2x16xf32>
    tpu.vector_store %arg24[%c8, %c16_66], %338 {strides = array<i32>} : memref<16x32xf32, #tpu.memory_space<vmem>>, vector<2x16xf32>,
    %340 = vector.extract_strided_slice %244 {offsets = [8, 0], sizes = [2, 128], strides = [1, 1]} : vector<16x128xf32> to vector<2x128xf32>
    %cst_67 = arith.constant dense<0.000000e+00> : vector<2x128xf32>
    %341 = tpu.matmul %335, %245, %cst_67 {dimension_numbers = #tpu.dot_dimension_numbers<[1], [0], [0], [1], [0, 0, 1, 1], [], []>} : vector<2x32xf32>, vector<32x128xf32>, vector<2x128xf32> -> vector<2x128xf32>
    %342 = arith.addf %340, %341 : vector<2x128xf32>
    %343 = vector.extract_strided_slice %342 {offsets = [0, 0], sizes = [2, 96], strides = [1, 1]} : vector<2x128xf32> to vector<2x96xf32>
    %344 = arith.negf %343 : vector<2x96xf32>
    %345 = math.exp %344 : vector<2x96xf32>
    %cst_68 = arith.constant 1.000000e+00 : f32
    %346 = vector.broadcast %cst_68 : f32 to vector<2x96xf32>
    %347 = arith.addf %346, %345 : vector<2x96xf32>
    %348 = arith.divf %346, %347 : vector<2x96xf32>
    %349 = vector.extract_strided_slice %342 {offsets = [0, 96], sizes = [2, 32], strides = [1, 1]} : vector<2x128xf32> to vector<2x32xf32>
    %350 = math.tanh %349 : vector<2x32xf32>
    %351 = vector.extract_strided_slice %348 {offsets = [0, 32], sizes = [2, 32], strides = [1, 1]} : vector<2x96xf32> to vector<2x32xf32>
    %352 = arith.mulf %351, %332 : vector<2x32xf32>
    %353 = vector.extract_strided_slice %348 {offsets = [0, 0], sizes = [2, 32], strides = [1, 1]} : vector<2x96xf32> to vector<2x32xf32>
    %354 = arith.mulf %353, %350 : vector<2x32xf32>
    %355 = arith.addf %352, %354 : vector<2x32xf32>
    %356 = vector.extract_strided_slice %348 {offsets = [0, 64], sizes = [2, 32], strides = [1, 1]} : vector<2x96xf32> to vector<2x32xf32>
    %357 = math.tanh %355 : vector<2x32xf32>
    %358 = arith.mulf %356, %357 : vector<2x32xf32>
    %359 = vector.extract_strided_slice %358 {offsets = [0, 0], sizes = [2, 16], strides = [1, 1]} : vector<2x32xf32> to vector<2x16xf32>
    %c8_69 = arith.constant 8 : index
    %c0_70 = arith.constant 0 : index
    %360 = vector.load %arg24[%c8_69, %c0_70] : memref<16x32xf32, #tpu.memory_space<vmem>>, vector<2x16xf32>
    tpu.vector_store %arg24[%c8_69, %c0_70], %359 {strides = array<i32>} : memref<16x32xf32, #tpu.memory_space<vmem>>, vector<2x16xf32>,
    %361 = vector.extract_strided_slice %358 {offsets = [0, 16], sizes = [2, 16], strides = [1, 1]} : vector<2x32xf32> to vector<2x16xf32>
    %c6_71 = arith.constant 6 : index
    %c16_72 = arith.constant 16 : index
    %362 = vector.load %arg24[%c6_71, %c16_72] : memref<16x32xf32, #tpu.memory_space<vmem>>, vector<2x16xf32>
    tpu.vector_store %arg24[%c6_71, %c16_72], %361 {strides = array<i32>} : memref<16x32xf32, #tpu.memory_space<vmem>>, vector<2x16xf32>,
    %363 = vector.extract_strided_slice %244 {offsets = [10, 0], sizes = [2, 128], strides = [1, 1]} : vector<16x128xf32> to vector<2x128xf32>
    %cst_73 = arith.constant dense<0.000000e+00> : vector<2x128xf32>
    %364 = tpu.matmul %358, %245, %cst_73 {dimension_numbers = #tpu.dot_dimension_numbers<[1], [0], [0], [1], [0, 0, 1, 1], [], []>} : vector<2x32xf32>, vector<32x128xf32>, vector<2x128xf32> -> vector<2x128xf32>
    %365 = arith.addf %363, %364 : vector<2x128xf32>
    %366 = vector.extract_strided_slice %365 {offsets = [0, 0], sizes = [2, 96], strides = [1, 1]} : vector<2x128xf32> to vector<2x96xf32>
    %367 = arith.negf %366 : vector<2x96xf32>
    %368 = math.exp %367 : vector<2x96xf32>
    %cst_74 = arith.constant 1.000000e+00 : f32
    %369 = vector.broadcast %cst_74 : f32 to vector<2x96xf32>
    %370 = arith.addf %369, %368 : vector<2x96xf32>
    %371 = arith.divf %369, %370 : vector<2x96xf32>
    %372 = vector.extract_strided_slice %365 {offsets = [0, 96], sizes = [2, 32], strides = [1, 1]} : vector<2x128xf32> to vector<2x32xf32>
    %373 = math.tanh %372 : vector<2x32xf32>
    %374 = vector.extract_strided_slice %371 {offsets = [0, 32], sizes = [2, 32], strides = [1, 1]} : vector<2x96xf32> to vector<2x32xf32>
    %375 = arith.mulf %374, %355 : vector<2x32xf32>
    %376 = vector.extract_strided_slice %371 {offsets = [0, 0], sizes = [2, 32], strides = [1, 1]} : vector<2x96xf32> to vector<2x32xf32>
    %377 = arith.mulf %376, %373 : vector<2x32xf32>
    %378 = arith.addf %375, %377 : vector<2x32xf32>
    %379 = vector.extract_strided_slice %371 {offsets = [0, 64], sizes = [2, 32], strides = [1, 1]} : vector<2x96xf32> to vector<2x32xf32>
    %380 = math.tanh %378 : vector<2x32xf32>
    %381 = arith.mulf %379, %380 : vector<2x32xf32>
    %382 = vector.extract_strided_slice %381 {offsets = [0, 0], sizes = [2, 16], strides = [1, 1]} : vector<2x32xf32> to vector<2x16xf32>
    %c10_75 = arith.constant 10 : index
    %c0_76 = arith.constant 0 : index
    %383 = vector.load %arg24[%c10_75, %c0_76] : memref<16x32xf32, #tpu.memory_space<vmem>>, vector<2x16xf32>
    tpu.vector_store %arg24[%c10_75, %c0_76], %382 {strides = array<i32>} : memref<16x32xf32, #tpu.memory_space<vmem>>, vector<2x16xf32>,
    %384 = vector.extract_strided_slice %381 {offsets = [0, 16], sizes = [2, 16], strides = [1, 1]} : vector<2x32xf32> to vector<2x16xf32>
    %c4_77 = arith.constant 4 : index
    %c16_78 = arith.constant 16 : index
    %385 = vector.load %arg24[%c4_77, %c16_78] : memref<16x32xf32, #tpu.memory_space<vmem>>, vector<2x16xf32>
    tpu.vector_store %arg24[%c4_77, %c16_78], %384 {strides = array<i32>} : memref<16x32xf32, #tpu.memory_space<vmem>>, vector<2x16xf32>,
    %386 = vector.extract_strided_slice %244 {offsets = [12, 0], sizes = [2, 128], strides = [1, 1]} : vector<16x128xf32> to vector<2x128xf32>
    %cst_79 = arith.constant dense<0.000000e+00> : vector<2x128xf32>
    %387 = tpu.matmul %381, %245, %cst_79 {dimension_numbers = #tpu.dot_dimension_numbers<[1], [0], [0], [1], [0, 0, 1, 1], [], []>} : vector<2x32xf32>, vector<32x128xf32>, vector<2x128xf32> -> vector<2x128xf32>
    %388 = arith.addf %386, %387 : vector<2x128xf32>
    %389 = vector.extract_strided_slice %388 {offsets = [0, 0], sizes = [2, 96], strides = [1, 1]} : vector<2x128xf32> to vector<2x96xf32>
    %390 = arith.negf %389 : vector<2x96xf32>
    %391 = math.exp %390 : vector<2x96xf32>
    %cst_80 = arith.constant 1.000000e+00 : f32
    %392 = vector.broadcast %cst_80 : f32 to vector<2x96xf32>
    %393 = arith.addf %392, %391 : vector<2x96xf32>
    %394 = arith.divf %392, %393 : vector<2x96xf32>
    %395 = vector.extract_strided_slice %388 {offsets = [0, 96], sizes = [2, 32], strides = [1, 1]} : vector<2x128xf32> to vector<2x32xf32>
    %396 = math.tanh %395 : vector<2x32xf32>
    %397 = vector.extract_strided_slice %394 {offsets = [0, 32], sizes = [2, 32], strides = [1, 1]} : vector<2x96xf32> to vector<2x32xf32>
    %398 = arith.mulf %397, %378 : vector<2x32xf32>
    %399 = vector.extract_strided_slice %394 {offsets = [0, 0], sizes = [2, 32], strides = [1, 1]} : vector<2x96xf32> to vector<2x32xf32>
    %400 = arith.mulf %399, %396 : vector<2x32xf32>
    %401 = arith.addf %398, %400 : vector<2x32xf32>
    %402 = vector.extract_strided_slice %394 {offsets = [0, 64], sizes = [2, 32], strides = [1, 1]} : vector<2x96xf32> to vector<2x32xf32>
    %403 = math.tanh %401 : vector<2x32xf32>
    %404 = arith.mulf %402, %403 : vector<2x32xf32>
    %405 = vector.extract_strided_slice %404 {offsets = [0, 0], sizes = [2, 16], strides = [1, 1]} : vector<2x32xf32> to vector<2x16xf32>
    %c12_81 = arith.constant 12 : index
    %c0_82 = arith.constant 0 : index
    %406 = vector.load %arg24[%c12_81, %c0_82] : memref<16x32xf32, #tpu.memory_space<vmem>>, vector<2x16xf32>
    tpu.vector_store %arg24[%c12_81, %c0_82], %405 {strides = array<i32>} : memref<16x32xf32, #tpu.memory_space<vmem>>, vector<2x16xf32>,
    %407 = vector.extract_strided_slice %404 {offsets = [0, 16], sizes = [2, 16], strides = [1, 1]} : vector<2x32xf32> to vector<2x16xf32>
    %c2_83 = arith.constant 2 : index
    %c16_84 = arith.constant 16 : index
    %408 = vector.load %arg24[%c2_83, %c16_84] : memref<16x32xf32, #tpu.memory_space<vmem>>, vector<2x16xf32>
    tpu.vector_store %arg24[%c2_83, %c16_84], %407 {strides = array<i32>} : memref<16x32xf32, #tpu.memory_space<vmem>>, vector<2x16xf32>,
    %409 = vector.extract_strided_slice %244 {offsets = [14, 0], sizes = [2, 128], strides = [1, 1]} : vector<16x128xf32> to vector<2x128xf32>
    %cst_85 = arith.constant dense<0.000000e+00> : vector<2x128xf32>
    %410 = tpu.matmul %404, %245, %cst_85 {dimension_numbers = #tpu.dot_dimension_numbers<[1], [0], [0], [1], [0, 0, 1, 1], [], []>} : vector<2x32xf32>, vector<32x128xf32>, vector<2x128xf32> -> vector<2x128xf32>
    %411 = arith.addf %409, %410 : vector<2x128xf32>
    %412 = vector.extract_strided_slice %411 {offsets = [0, 0], sizes = [2, 96], strides = [1, 1]} : vector<2x128xf32> to vector<2x96xf32>
    %413 = arith.negf %412 : vector<2x96xf32>
    %414 = math.exp %413 : vector<2x96xf32>
    %cst_86 = arith.constant 1.000000e+00 : f32
    %415 = vector.broadcast %cst_86 : f32 to vector<2x96xf32>
    %416 = arith.addf %415, %414 : vector<2x96xf32>
    %417 = arith.divf %415, %416 : vector<2x96xf32>
    %418 = vector.extract_strided_slice %411 {offsets = [0, 96], sizes = [2, 32], strides = [1, 1]} : vector<2x128xf32> to vector<2x32xf32>
    %419 = math.tanh %418 : vector<2x32xf32>
    %420 = vector.extract_strided_slice %417 {offsets = [0, 32], sizes = [2, 32], strides = [1, 1]} : vector<2x96xf32> to vector<2x32xf32>
    %421 = arith.mulf %420, %401 : vector<2x32xf32>
    %422 = vector.extract_strided_slice %417 {offsets = [0, 0], sizes = [2, 32], strides = [1, 1]} : vector<2x96xf32> to vector<2x32xf32>
    %423 = arith.mulf %422, %419 : vector<2x32xf32>
    %424 = arith.addf %421, %423 : vector<2x32xf32>
    %425 = vector.extract_strided_slice %417 {offsets = [0, 64], sizes = [2, 32], strides = [1, 1]} : vector<2x96xf32> to vector<2x32xf32>
    %426 = math.tanh %424 : vector<2x32xf32>
    %427 = arith.mulf %425, %426 : vector<2x32xf32>
    %428 = vector.extract_strided_slice %427 {offsets = [0, 0], sizes = [2, 16], strides = [1, 1]} : vector<2x32xf32> to vector<2x16xf32>
    %c14_87 = arith.constant 14 : index
    %c0_88 = arith.constant 0 : index
    %429 = vector.load %arg24[%c14_87, %c0_88] : memref<16x32xf32, #tpu.memory_space<vmem>>, vector<2x16xf32>
    tpu.vector_store %arg24[%c14_87, %c0_88], %428 {strides = array<i32>} : memref<16x32xf32, #tpu.memory_space<vmem>>, vector<2x16xf32>,
    %430 = vector.extract_strided_slice %427 {offsets = [0, 16], sizes = [2, 16], strides = [1, 1]} : vector<2x32xf32> to vector<2x16xf32>
    %c0_89 = arith.constant 0 : index
    %c16_90 = arith.constant 16 : index
    %431 = vector.load %arg24[%c0_89, %c16_90] : memref<16x32xf32, #tpu.memory_space<vmem>>, vector<2x16xf32>
    tpu.vector_store %arg24[%c0_89, %c16_90], %430 {strides = array<i32>} : memref<16x32xf32, #tpu.memory_space<vmem>>, vector<2x16xf32>,
    %c0_91 = arith.constant 0 : index
    %c0_92 = arith.constant 0 : index
    %432 = vector.load %arg24[%c0_91, %c0_92] : memref<16x32xf32, #tpu.memory_space<vmem>>, vector<16x32xf32>
    %c0_93 = arith.constant 0 : index
    %c0_94 = arith.constant 0 : index
    %433 = vector.load %arg15[%c0_93, %c0_94] : memref<32x9xf32, #tpu.memory_space<vmem>>, vector<32x9xf32>
    %cst_95 = arith.constant dense<0.000000e+00> : vector<16x9xf32>
    %434 = tpu.matmul %432, %433, %cst_95 {dimension_numbers = #tpu.dot_dimension_numbers<[1], [0], [0], [1], [0, 0, 1, 1], [], []>} : vector<16x32xf32>, vector<32x9xf32>, vector<16x9xf32> -> vector<16x9xf32>
    %c0_96 = arith.constant 0 : index
    %c0_97 = arith.constant 0 : index
    %435 = vector.load %arg5[%c0_96, %c0_97] : memref<16x1xf32, #tpu.memory_space<vmem>>, vector<16x1xf32>
    %c0_98 = arith.constant 0 : index
    %c0_99 = arith.constant 0 : index
    %436 = vector.load %arg16[%c0_98, %c0_99] : memref<1x9xf32, #tpu.memory_space<vmem>>, vector<1x9xf32>
    %437 = vector.broadcast %435 : vector<16x1xf32> to vector<16x9xf32>
    %438 = vector.broadcast %436 : vector<1x9xf32> to vector<16x9xf32>
    %439 = arith.mulf %437, %438 : vector<16x9xf32>
    %440 = arith.addf %434, %439 : vector<16x9xf32>
    %c0_100 = arith.constant 0 : index
    %c0_101 = arith.constant 0 : index
    %441 = vector.load %arg17[%c0_100, %c0_101] : memref<1x9xf32, #tpu.memory_space<vmem>>, vector<1x9xf32>
    %442 = vector.broadcast %441 : vector<1x9xf32> to vector<16x9xf32>
    %443 = arith.addf %440, %442 : vector<16x9xf32>
    %444 = vector.extract_strided_slice %443 {offsets = [0, 0], sizes = [16, 8], strides = [1, 1]} : vector<16x9xf32> to vector<16x8xf32>
    %445 = vector.extract_strided_slice %443 {offsets = [0, 8], sizes = [16, 1], strides = [1, 1]} : vector<16x9xf32> to vector<16x1xf32>
    %cst_102 = arith.constant 0.000000e+00 : f32
    %446 = vector.broadcast %cst_102 : f32 to vector<2x1xf32>
    %447 = vector.extract_strided_slice %445 {offsets = [0, 0], sizes = [2, 1], strides = [1, 1]} : vector<16x1xf32> to vector<2x1xf32>
    %448 = arith.addf %446, %447 : vector<2x1xf32>
    %449 = vector.extract_strided_slice %445 {offsets = [2, 0], sizes = [2, 1], strides = [1, 1]} : vector<16x1xf32> to vector<2x1xf32>
    %450 = arith.addf %448, %449 : vector<2x1xf32>
    %451 = vector.extract_strided_slice %445 {offsets = [4, 0], sizes = [2, 1], strides = [1, 1]} : vector<16x1xf32> to vector<2x1xf32>
    %452 = arith.addf %450, %451 : vector<2x1xf32>
    %453 = vector.extract_strided_slice %445 {offsets = [6, 0], sizes = [2, 1], strides = [1, 1]} : vector<16x1xf32> to vector<2x1xf32>
    %454 = arith.addf %452, %453 : vector<2x1xf32>
    %455 = vector.extract_strided_slice %445 {offsets = [8, 0], sizes = [2, 1], strides = [1, 1]} : vector<16x1xf32> to vector<2x1xf32>
    %456 = arith.addf %454, %455 : vector<2x1xf32>
    %457 = vector.extract_strided_slice %445 {offsets = [10, 0], sizes = [2, 1], strides = [1, 1]} : vector<16x1xf32> to vector<2x1xf32>
    %458 = arith.addf %456, %457 : vector<2x1xf32>
    %459 = vector.extract_strided_slice %445 {offsets = [12, 0], sizes = [2, 1], strides = [1, 1]} : vector<16x1xf32> to vector<2x1xf32>
    %460 = arith.addf %458, %459 : vector<2x1xf32>
    %461 = vector.extract_strided_slice %445 {offsets = [14, 0], sizes = [2, 1], strides = [1, 1]} : vector<16x1xf32> to vector<2x1xf32>
    %462 = arith.addf %460, %461 : vector<2x1xf32>
    %cst_103 = arith.constant 1.250000e-01 : f32
    %463 = vector.broadcast %cst_103 : f32 to vector<2x1xf32>
    %464 = arith.mulf %462, %463 : vector<2x1xf32>
    %c0_104 = arith.constant 0 : index
    %c0_105 = arith.constant 0 : index
    %465 = vector.load %arg21[%c0_104, %c0_105] : memref<2x1xf32, #tpu.memory_space<vmem>>, vector<2x1xf32>
    tpu.vector_store %arg21[%c0_104, %c0_105], %464 {strides = array<i32>} : memref<2x1xf32, #tpu.memory_space<vmem>>, vector<2x1xf32>,
    %c0_106 = arith.constant 0 : index
    %c0_107 = arith.constant 0 : index
    %466 = vector.load %arg3[%c0_106, %c0_107] : memref<16x1xi32, #tpu.memory_space<vmem>>, vector<16x1xi32>
    %c0_i32 = arith.constant 0 : i32
    %467 = vector.broadcast %c0_i32 : i32 to vector<16x1xi32>
    %468 = arith.cmpi ne, %466, %467 : vector<16x1xi32>
    %469 = arith.extui %468 : vector<16x1xi1> to vector<16x1xi32>
    %470 = arith.sitofp %469 : vector<16x1xi32> to vector<16x1xf32>
    %471 = arith.extui %468 : vector<16x1xi1> to vector<16x1xi32>
    %c0_108 = arith.constant 0 : index
    %c0_109 = arith.constant 0 : index
    %472 = vector.load %arg18[%c0_108, %c0_109] : memref<8x8xf32, #tpu.memory_space<vmem>>, vector<8x8xf32>
    %c0_110 = arith.constant 0 : index
    %c0_111 = arith.constant 0 : index
    %473 = vector.load %arg19[%c0_110, %c0_111] : memref<8x8xf32, #tpu.memory_space<vmem>>, vector<8x8xf32>
    %474 = arith.mulf %472, %473 : vector<8x8xf32>
    %cst_112 = arith.constant 1.000000e+00 : f32
    %475 = vector.broadcast %cst_112 : f32 to vector<8x8xf32>
    %476 = arith.subf %475, %473 : vector<8x8xf32>
    %cst_113 = arith.constant 1.000000e+06 : f32
    %477 = vector.broadcast %cst_113 : f32 to vector<8x8xf32>
    %478 = arith.mulf %477, %476 : vector<8x8xf32>
    %479 = arith.subf %474, %478 : vector<8x8xf32>
    %480 = tpu.iota {dimensions = array<i32: 1>} : vector<2x8xi32>
    %c6_i32 = arith.constant 6 : i32
    %481 = vector.broadcast %c6_i32 : i32 to vector<2x8xi32>
    %482 = arith.cmpi eq, %480, %481 : vector<2x8xi32>
    %cst_114 = arith.constant 0.000000e+00 : f32
    %cst_115 = arith.constant -1.000000e+04 : f32
    %483 = vector.broadcast %cst_114 : f32 to vector<2x8xf32>
    %484 = vector.broadcast %cst_115 : f32 to vector<2x8xf32>
    %485 = arith.select %482, %483, %484 : vector<2x8xi1>, vector<2x8xf32>
    %486 = tpu.iota {dimensions = array<i32: 2>} : vector<2x8x8xi32>
    %487 = vector.extract_strided_slice %468 {offsets = [0, 0], sizes = [2, 1], strides = [1, 1]} : vector<16x1xi1> to vector<2x1xi1>
    %488 = vector.extract_strided_slice %444 {offsets = [0, 0], sizes = [2, 8], strides = [1, 1]} : vector<16x8xf32> to vector<2x8xf32>
    %489 = vector.shape_cast %485 : vector<2x8xf32> to vector<2x1x8xf32>
    %490 = vector.shape_cast %488 : vector<2x8xf32> to vector<2x8x1xf32>
    %491 = vector.broadcast %489 : vector<2x1x8xf32> to vector<2x8x8xf32>
    %492 = vector.broadcast %490 : vector<2x8x1xf32> to vector<2x8x8xf32>
    %493 = arith.addf %491, %492 : vector<2x8x8xf32>
    %494 = vector.shape_cast %472 : vector<8x8xf32> to vector<1x8x8xf32>
    %495 = vector.broadcast %494 : vector<1x8x8xf32> to vector<2x8x8xf32>
    %496 = arith.addf %493, %495 : vector<2x8x8xf32>
    %cst_116 = arith.constant dense<0xFF800000> : vector<2x8xf32>
    %497 = vector.multi_reduction <maximumf>, %496, %cst_116 [2] : vector<2x8x8xf32> to vector<2x8xf32>
    %498 = vector.shape_cast %497 : vector<2x8xf32> to vector<2x8x1xf32>
    %499 = vector.broadcast %498 : vector<2x8x1xf32> to vector<2x8x8xf32>
    %500 = arith.subf %496, %499 : vector<2x8x8xf32>
    %501 = math.exp %500 : vector<2x8x8xf32>
    %cst_117 = arith.constant dense<0.000000e+00> : vector<2x8xf32>
    %502 = vector.multi_reduction <add>, %501, %cst_117 [2] : vector<2x8x8xf32> to vector<2x8xf32>
    %503 = math.log %502 : vector<2x8xf32>
    %504 = arith.addf %497, %503 : vector<2x8xf32>
    %505 = vector.shape_cast %487 : vector<2x1xi1> to vector<2x1xi1>
    %506 = vector.broadcast %505 : vector<2x1xi1> to vector<2x8xi1>
    %507 = arith.select %506, %504, %485 : vector<2x8xi1>, vector<2x8xf32>
    %508 = vector.shape_cast %485 : vector<2x8xf32> to vector<2x1x8xf32>
    %509 = vector.shape_cast %479 : vector<8x8xf32> to vector<1x8x8xf32>
    %510 = vector.broadcast %508 : vector<2x1x8xf32> to vector<2x8x8xf32>
    %511 = vector.broadcast %509 : vector<1x8x8xf32> to vector<2x8x8xf32>
    %512 = arith.addf %510, %511 : vector<2x8x8xf32>
    %cst_118 = arith.constant dense<0xFF800000> : vector<2x8xf32>
    %513 = vector.multi_reduction <maximumf>, %512, %cst_118 [2] : vector<2x8x8xf32> to vector<2x8xf32>
    %514 = vector.shape_cast %513 : vector<2x8xf32> to vector<2x8x1xf32>
    %515 = vector.broadcast %514 : vector<2x8x1xf32> to vector<2x8x8xf32>
    %516 = arith.cmpf oeq, %512, %515 : vector<2x8x8xf32>
    %c8_i32 = arith.constant 8 : i32
    %517 = vector.broadcast %c8_i32 : i32 to vector<2x8x8xi32>
    %518 = arith.select %516, %486, %517 : vector<2x8x8xi1>, vector<2x8x8xi32>
    %cst_119 = arith.constant dense<2147483647> : vector<2x8xi32>
    %519 = vector.multi_reduction <minsi>, %518, %cst_119 [2] : vector<2x8x8xi32> to vector<2x8xi32>
    %520 = arith.addf %513, %488 : vector<2x8xf32>
    %521 = vector.shape_cast %487 : vector<2x1xi1> to vector<2x1xi1>
    %522 = vector.broadcast %521 : vector<2x1xi1> to vector<2x8xi1>
    %523 = arith.select %522, %520, %485 : vector<2x8xi1>, vector<2x8xf32>
    %524 = vector.extract_strided_slice %468 {offsets = [2, 0], sizes = [2, 1], strides = [1, 1]} : vector<16x1xi1> to vector<2x1xi1>
    %525 = vector.extract_strided_slice %444 {offsets = [2, 0], sizes = [2, 8], strides = [1, 1]} : vector<16x8xf32> to vector<2x8xf32>
    %526 = vector.shape_cast %507 : vector<2x8xf32> to vector<2x1x8xf32>
    %527 = vector.shape_cast %525 : vector<2x8xf32> to vector<2x8x1xf32>
    %528 = vector.broadcast %526 : vector<2x1x8xf32> to vector<2x8x8xf32>
    %529 = vector.broadcast %527 : vector<2x8x1xf32> to vector<2x8x8xf32>
    %530 = arith.addf %528, %529 : vector<2x8x8xf32>
    %531 = vector.shape_cast %472 : vector<8x8xf32> to vector<1x8x8xf32>
    %532 = vector.broadcast %531 : vector<1x8x8xf32> to vector<2x8x8xf32>
    %533 = arith.addf %530, %532 : vector<2x8x8xf32>
    %cst_120 = arith.constant dense<0xFF800000> : vector<2x8xf32>
    %534 = vector.multi_reduction <maximumf>, %533, %cst_120 [2] : vector<2x8x8xf32> to vector<2x8xf32>
    %535 = vector.shape_cast %534 : vector<2x8xf32> to vector<2x8x1xf32>
    %536 = vector.broadcast %535 : vector<2x8x1xf32> to vector<2x8x8xf32>
    %537 = arith.subf %533, %536 : vector<2x8x8xf32>
    %538 = math.exp %537 : vector<2x8x8xf32>
    %cst_121 = arith.constant dense<0.000000e+00> : vector<2x8xf32>
    %539 = vector.multi_reduction <add>, %538, %cst_121 [2] : vector<2x8x8xf32> to vector<2x8xf32>
    %540 = math.log %539 : vector<2x8xf32>
    %541 = arith.addf %534, %540 : vector<2x8xf32>
    %542 = vector.shape_cast %524 : vector<2x1xi1> to vector<2x1xi1>
    %543 = vector.broadcast %542 : vector<2x1xi1> to vector<2x8xi1>
    %544 = arith.select %543, %541, %507 : vector<2x8xi1>, vector<2x8xf32>
    %545 = vector.shape_cast %523 : vector<2x8xf32> to vector<2x1x8xf32>
    %546 = vector.shape_cast %479 : vector<8x8xf32> to vector<1x8x8xf32>
    %547 = vector.broadcast %545 : vector<2x1x8xf32> to vector<2x8x8xf32>
    %548 = vector.broadcast %546 : vector<1x8x8xf32> to vector<2x8x8xf32>
    %549 = arith.addf %547, %548 : vector<2x8x8xf32>
    %cst_122 = arith.constant dense<0xFF800000> : vector<2x8xf32>
    %550 = vector.multi_reduction <maximumf>, %549, %cst_122 [2] : vector<2x8x8xf32> to vector<2x8xf32>
    %551 = vector.shape_cast %550 : vector<2x8xf32> to vector<2x8x1xf32>
    %552 = vector.broadcast %551 : vector<2x8x1xf32> to vector<2x8x8xf32>
    %553 = arith.cmpf oeq, %549, %552 : vector<2x8x8xf32>
    %c8_i32_123 = arith.constant 8 : i32
    %554 = vector.broadcast %c8_i32_123 : i32 to vector<2x8x8xi32>
    %555 = arith.select %553, %486, %554 : vector<2x8x8xi1>, vector<2x8x8xi32>
    %cst_124 = arith.constant dense<2147483647> : vector<2x8xi32>
    %556 = vector.multi_reduction <minsi>, %555, %cst_124 [2] : vector<2x8x8xi32> to vector<2x8xi32>
    %557 = arith.addf %550, %525 : vector<2x8xf32>
    %558 = vector.shape_cast %524 : vector<2x1xi1> to vector<2x1xi1>
    %559 = vector.broadcast %558 : vector<2x1xi1> to vector<2x8xi1>
    %560 = arith.select %559, %557, %523 : vector<2x8xi1>, vector<2x8xf32>
    %561 = vector.extract_strided_slice %468 {offsets = [4, 0], sizes = [2, 1], strides = [1, 1]} : vector<16x1xi1> to vector<2x1xi1>
    %562 = vector.extract_strided_slice %444 {offsets = [4, 0], sizes = [2, 8], strides = [1, 1]} : vector<16x8xf32> to vector<2x8xf32>
    %563 = vector.shape_cast %544 : vector<2x8xf32> to vector<2x1x8xf32>
    %564 = vector.shape_cast %562 : vector<2x8xf32> to vector<2x8x1xf32>
    %565 = vector.broadcast %563 : vector<2x1x8xf32> to vector<2x8x8xf32>
    %566 = vector.broadcast %564 : vector<2x8x1xf32> to vector<2x8x8xf32>
    %567 = arith.addf %565, %566 : vector<2x8x8xf32>
    %568 = vector.shape_cast %472 : vector<8x8xf32> to vector<1x8x8xf32>
    %569 = vector.broadcast %568 : vector<1x8x8xf32> to vector<2x8x8xf32>
    %570 = arith.addf %567, %569 : vector<2x8x8xf32>
    %cst_125 = arith.constant dense<0xFF800000> : vector<2x8xf32>
    %571 = vector.multi_reduction <maximumf>, %570, %cst_125 [2] : vector<2x8x8xf32> to vector<2x8xf32>
    %572 = vector.shape_cast %571 : vector<2x8xf32> to vector<2x8x1xf32>
    %573 = vector.broadcast %572 : vector<2x8x1xf32> to vector<2x8x8xf32>
    %574 = arith.subf %570, %573 : vector<2x8x8xf32>
    %575 = math.exp %574 : vector<2x8x8xf32>
    %cst_126 = arith.constant dense<0.000000e+00> : vector<2x8xf32>
    %576 = vector.multi_reduction <add>, %575, %cst_126 [2] : vector<2x8x8xf32> to vector<2x8xf32>
    %577 = math.log %576 : vector<2x8xf32>
    %578 = arith.addf %571, %577 : vector<2x8xf32>
    %579 = vector.shape_cast %561 : vector<2x1xi1> to vector<2x1xi1>
    %580 = vector.broadcast %579 : vector<2x1xi1> to vector<2x8xi1>
    %581 = arith.select %580, %578, %544 : vector<2x8xi1>, vector<2x8xf32>
    %582 = vector.shape_cast %560 : vector<2x8xf32> to vector<2x1x8xf32>
    %583 = vector.shape_cast %479 : vector<8x8xf32> to vector<1x8x8xf32>
    %584 = vector.broadcast %582 : vector<2x1x8xf32> to vector<2x8x8xf32>
    %585 = vector.broadcast %583 : vector<1x8x8xf32> to vector<2x8x8xf32>
    %586 = arith.addf %584, %585 : vector<2x8x8xf32>
    %cst_127 = arith.constant dense<0xFF800000> : vector<2x8xf32>
    %587 = vector.multi_reduction <maximumf>, %586, %cst_127 [2] : vector<2x8x8xf32> to vector<2x8xf32>
    %588 = vector.shape_cast %587 : vector<2x8xf32> to vector<2x8x1xf32>
    %589 = vector.broadcast %588 : vector<2x8x1xf32> to vector<2x8x8xf32>
    %590 = arith.cmpf oeq, %586, %589 : vector<2x8x8xf32>
    %c8_i32_128 = arith.constant 8 : i32
    %591 = vector.broadcast %c8_i32_128 : i32 to vector<2x8x8xi32>
    %592 = arith.select %590, %486, %591 : vector<2x8x8xi1>, vector<2x8x8xi32>
    %cst_129 = arith.constant dense<2147483647> : vector<2x8xi32>
    %593 = vector.multi_reduction <minsi>, %592, %cst_129 [2] : vector<2x8x8xi32> to vector<2x8xi32>
    %594 = arith.addf %587, %562 : vector<2x8xf32>
    %595 = vector.shape_cast %561 : vector<2x1xi1> to vector<2x1xi1>
    %596 = vector.broadcast %595 : vector<2x1xi1> to vector<2x8xi1>
    %597 = arith.select %596, %594, %560 : vector<2x8xi1>, vector<2x8xf32>
    %598 = vector.extract_strided_slice %468 {offsets = [6, 0], sizes = [2, 1], strides = [1, 1]} : vector<16x1xi1> to vector<2x1xi1>
    %599 = vector.extract_strided_slice %444 {offsets = [6, 0], sizes = [2, 8], strides = [1, 1]} : vector<16x8xf32> to vector<2x8xf32>
    %600 = vector.shape_cast %581 : vector<2x8xf32> to vector<2x1x8xf32>
    %601 = vector.shape_cast %599 : vector<2x8xf32> to vector<2x8x1xf32>
    %602 = vector.broadcast %600 : vector<2x1x8xf32> to vector<2x8x8xf32>
    %603 = vector.broadcast %601 : vector<2x8x1xf32> to vector<2x8x8xf32>
    %604 = arith.addf %602, %603 : vector<2x8x8xf32>
    %605 = vector.shape_cast %472 : vector<8x8xf32> to vector<1x8x8xf32>
    %606 = vector.broadcast %605 : vector<1x8x8xf32> to vector<2x8x8xf32>
    %607 = arith.addf %604, %606 : vector<2x8x8xf32>
    %cst_130 = arith.constant dense<0xFF800000> : vector<2x8xf32>
    %608 = vector.multi_reduction <maximumf>, %607, %cst_130 [2] : vector<2x8x8xf32> to vector<2x8xf32>
    %609 = vector.shape_cast %608 : vector<2x8xf32> to vector<2x8x1xf32>
    %610 = vector.broadcast %609 : vector<2x8x1xf32> to vector<2x8x8xf32>
    %611 = arith.subf %607, %610 : vector<2x8x8xf32>
    %612 = math.exp %611 : vector<2x8x8xf32>
    %cst_131 = arith.constant dense<0.000000e+00> : vector<2x8xf32>
    %613 = vector.multi_reduction <add>, %612, %cst_131 [2] : vector<2x8x8xf32> to vector<2x8xf32>
    %614 = math.log %613 : vector<2x8xf32>
    %615 = arith.addf %608, %614 : vector<2x8xf32>
    %616 = vector.shape_cast %598 : vector<2x1xi1> to vector<2x1xi1>
    %617 = vector.broadcast %616 : vector<2x1xi1> to vector<2x8xi1>
    %618 = arith.select %617, %615, %581 : vector<2x8xi1>, vector<2x8xf32>
    %619 = vector.shape_cast %597 : vector<2x8xf32> to vector<2x1x8xf32>
    %620 = vector.shape_cast %479 : vector<8x8xf32> to vector<1x8x8xf32>
    %621 = vector.broadcast %619 : vector<2x1x8xf32> to vector<2x8x8xf32>
    %622 = vector.broadcast %620 : vector<1x8x8xf32> to vector<2x8x8xf32>
    %623 = arith.addf %621, %622 : vector<2x8x8xf32>
    %cst_132 = arith.constant dense<0xFF800000> : vector<2x8xf32>
    %624 = vector.multi_reduction <maximumf>, %623, %cst_132 [2] : vector<2x8x8xf32> to vector<2x8xf32>
    %625 = vector.shape_cast %624 : vector<2x8xf32> to vector<2x8x1xf32>
    %626 = vector.broadcast %625 : vector<2x8x1xf32> to vector<2x8x8xf32>
    %627 = arith.cmpf oeq, %623, %626 : vector<2x8x8xf32>
    %c8_i32_133 = arith.constant 8 : i32
    %628 = vector.broadcast %c8_i32_133 : i32 to vector<2x8x8xi32>
    %629 = arith.select %627, %486, %628 : vector<2x8x8xi1>, vector<2x8x8xi32>
    %cst_134 = arith.constant dense<2147483647> : vector<2x8xi32>
    %630 = vector.multi_reduction <minsi>, %629, %cst_134 [2] : vector<2x8x8xi32> to vector<2x8xi32>
    %631 = arith.addf %624, %599 : vector<2x8xf32>
    %632 = vector.shape_cast %598 : vector<2x1xi1> to vector<2x1xi1>
    %633 = vector.broadcast %632 : vector<2x1xi1> to vector<2x8xi1>
    %634 = arith.select %633, %631, %597 : vector<2x8xi1>, vector<2x8xf32>
    %635 = vector.extract_strided_slice %468 {offsets = [8, 0], sizes = [2, 1], strides = [1, 1]} : vector<16x1xi1> to vector<2x1xi1>
    %636 = vector.extract_strided_slice %444 {offsets = [8, 0], sizes = [2, 8], strides = [1, 1]} : vector<16x8xf32> to vector<2x8xf32>
    %637 = vector.shape_cast %618 : vector<2x8xf32> to vector<2x1x8xf32>
    %638 = vector.shape_cast %636 : vector<2x8xf32> to vector<2x8x1xf32>
    %639 = vector.broadcast %637 : vector<2x1x8xf32> to vector<2x8x8xf32>
    %640 = vector.broadcast %638 : vector<2x8x1xf32> to vector<2x8x8xf32>
    %641 = arith.addf %639, %640 : vector<2x8x8xf32>
    %642 = vector.shape_cast %472 : vector<8x8xf32> to vector<1x8x8xf32>
    %643 = vector.broadcast %642 : vector<1x8x8xf32> to vector<2x8x8xf32>
    %644 = arith.addf %641, %643 : vector<2x8x8xf32>
    %cst_135 = arith.constant dense<0xFF800000> : vector<2x8xf32>
    %645 = vector.multi_reduction <maximumf>, %644, %cst_135 [2] : vector<2x8x8xf32> to vector<2x8xf32>
    %646 = vector.shape_cast %645 : vector<2x8xf32> to vector<2x8x1xf32>
    %647 = vector.broadcast %646 : vector<2x8x1xf32> to vector<2x8x8xf32>
    %648 = arith.subf %644, %647 : vector<2x8x8xf32>
    %649 = math.exp %648 : vector<2x8x8xf32>
    %cst_136 = arith.constant dense<0.000000e+00> : vector<2x8xf32>
    %650 = vector.multi_reduction <add>, %649, %cst_136 [2] : vector<2x8x8xf32> to vector<2x8xf32>
    %651 = math.log %650 : vector<2x8xf32>
    %652 = arith.addf %645, %651 : vector<2x8xf32>
    %653 = vector.shape_cast %635 : vector<2x1xi1> to vector<2x1xi1>
    %654 = vector.broadcast %653 : vector<2x1xi1> to vector<2x8xi1>
    %655 = arith.select %654, %652, %618 : vector<2x8xi1>, vector<2x8xf32>
    %656 = vector.shape_cast %634 : vector<2x8xf32> to vector<2x1x8xf32>
    %657 = vector.shape_cast %479 : vector<8x8xf32> to vector<1x8x8xf32>
    %658 = vector.broadcast %656 : vector<2x1x8xf32> to vector<2x8x8xf32>
    %659 = vector.broadcast %657 : vector<1x8x8xf32> to vector<2x8x8xf32>
    %660 = arith.addf %658, %659 : vector<2x8x8xf32>
    %cst_137 = arith.constant dense<0xFF800000> : vector<2x8xf32>
    %661 = vector.multi_reduction <maximumf>, %660, %cst_137 [2] : vector<2x8x8xf32> to vector<2x8xf32>
    %662 = vector.shape_cast %661 : vector<2x8xf32> to vector<2x8x1xf32>
    %663 = vector.broadcast %662 : vector<2x8x1xf32> to vector<2x8x8xf32>
    %664 = arith.cmpf oeq, %660, %663 : vector<2x8x8xf32>
    %c8_i32_138 = arith.constant 8 : i32
    %665 = vector.broadcast %c8_i32_138 : i32 to vector<2x8x8xi32>
    %666 = arith.select %664, %486, %665 : vector<2x8x8xi1>, vector<2x8x8xi32>
    %cst_139 = arith.constant dense<2147483647> : vector<2x8xi32>
    %667 = vector.multi_reduction <minsi>, %666, %cst_139 [2] : vector<2x8x8xi32> to vector<2x8xi32>
    %668 = arith.addf %661, %636 : vector<2x8xf32>
    %669 = vector.shape_cast %635 : vector<2x1xi1> to vector<2x1xi1>
    %670 = vector.broadcast %669 : vector<2x1xi1> to vector<2x8xi1>
    %671 = arith.select %670, %668, %634 : vector<2x8xi1>, vector<2x8xf32>
    %672 = vector.extract_strided_slice %468 {offsets = [10, 0], sizes = [2, 1], strides = [1, 1]} : vector<16x1xi1> to vector<2x1xi1>
    %673 = vector.extract_strided_slice %444 {offsets = [10, 0], sizes = [2, 8], strides = [1, 1]} : vector<16x8xf32> to vector<2x8xf32>
    %674 = vector.shape_cast %655 : vector<2x8xf32> to vector<2x1x8xf32>
    %675 = vector.shape_cast %673 : vector<2x8xf32> to vector<2x8x1xf32>
    %676 = vector.broadcast %674 : vector<2x1x8xf32> to vector<2x8x8xf32>
    %677 = vector.broadcast %675 : vector<2x8x1xf32> to vector<2x8x8xf32>
    %678 = arith.addf %676, %677 : vector<2x8x8xf32>
    %679 = vector.shape_cast %472 : vector<8x8xf32> to vector<1x8x8xf32>
    %680 = vector.broadcast %679 : vector<1x8x8xf32> to vector<2x8x8xf32>
    %681 = arith.addf %678, %680 : vector<2x8x8xf32>
    %cst_140 = arith.constant dense<0xFF800000> : vector<2x8xf32>
    %682 = vector.multi_reduction <maximumf>, %681, %cst_140 [2] : vector<2x8x8xf32> to vector<2x8xf32>
    %683 = vector.shape_cast %682 : vector<2x8xf32> to vector<2x8x1xf32>
    %684 = vector.broadcast %683 : vector<2x8x1xf32> to vector<2x8x8xf32>
    %685 = arith.subf %681, %684 : vector<2x8x8xf32>
    %686 = math.exp %685 : vector<2x8x8xf32>
    %cst_141 = arith.constant dense<0.000000e+00> : vector<2x8xf32>
    %687 = vector.multi_reduction <add>, %686, %cst_141 [2] : vector<2x8x8xf32> to vector<2x8xf32>
    %688 = math.log %687 : vector<2x8xf32>
    %689 = arith.addf %682, %688 : vector<2x8xf32>
    %690 = vector.shape_cast %672 : vector<2x1xi1> to vector<2x1xi1>
    %691 = vector.broadcast %690 : vector<2x1xi1> to vector<2x8xi1>
    %692 = arith.select %691, %689, %655 : vector<2x8xi1>, vector<2x8xf32>
    %693 = vector.shape_cast %671 : vector<2x8xf32> to vector<2x1x8xf32>
    %694 = vector.shape_cast %479 : vector<8x8xf32> to vector<1x8x8xf32>
    %695 = vector.broadcast %693 : vector<2x1x8xf32> to vector<2x8x8xf32>
    %696 = vector.broadcast %694 : vector<1x8x8xf32> to vector<2x8x8xf32>
    %697 = arith.addf %695, %696 : vector<2x8x8xf32>
    %cst_142 = arith.constant dense<0xFF800000> : vector<2x8xf32>
    %698 = vector.multi_reduction <maximumf>, %697, %cst_142 [2] : vector<2x8x8xf32> to vector<2x8xf32>
    %699 = vector.shape_cast %698 : vector<2x8xf32> to vector<2x8x1xf32>
    %700 = vector.broadcast %699 : vector<2x8x1xf32> to vector<2x8x8xf32>
    %701 = arith.cmpf oeq, %697, %700 : vector<2x8x8xf32>
    %c8_i32_143 = arith.constant 8 : i32
    %702 = vector.broadcast %c8_i32_143 : i32 to vector<2x8x8xi32>
    %703 = arith.select %701, %486, %702 : vector<2x8x8xi1>, vector<2x8x8xi32>
    %cst_144 = arith.constant dense<2147483647> : vector<2x8xi32>
    %704 = vector.multi_reduction <minsi>, %703, %cst_144 [2] : vector<2x8x8xi32> to vector<2x8xi32>
    %705 = arith.addf %698, %673 : vector<2x8xf32>
    %706 = vector.shape_cast %672 : vector<2x1xi1> to vector<2x1xi1>
    %707 = vector.broadcast %706 : vector<2x1xi1> to vector<2x8xi1>
    %708 = arith.select %707, %705, %671 : vector<2x8xi1>, vector<2x8xf32>
    %709 = vector.extract_strided_slice %468 {offsets = [12, 0], sizes = [2, 1], strides = [1, 1]} : vector<16x1xi1> to vector<2x1xi1>
    %710 = vector.extract_strided_slice %444 {offsets = [12, 0], sizes = [2, 8], strides = [1, 1]} : vector<16x8xf32> to vector<2x8xf32>
    %711 = vector.shape_cast %692 : vector<2x8xf32> to vector<2x1x8xf32>
    %712 = vector.shape_cast %710 : vector<2x8xf32> to vector<2x8x1xf32>
    %713 = vector.broadcast %711 : vector<2x1x8xf32> to vector<2x8x8xf32>
    %714 = vector.broadcast %712 : vector<2x8x1xf32> to vector<2x8x8xf32>
    %715 = arith.addf %713, %714 : vector<2x8x8xf32>
    %716 = vector.shape_cast %472 : vector<8x8xf32> to vector<1x8x8xf32>
    %717 = vector.broadcast %716 : vector<1x8x8xf32> to vector<2x8x8xf32>
    %718 = arith.addf %715, %717 : vector<2x8x8xf32>
    %cst_145 = arith.constant dense<0xFF800000> : vector<2x8xf32>
    %719 = vector.multi_reduction <maximumf>, %718, %cst_145 [2] : vector<2x8x8xf32> to vector<2x8xf32>
    %720 = vector.shape_cast %719 : vector<2x8xf32> to vector<2x8x1xf32>
    %721 = vector.broadcast %720 : vector<2x8x1xf32> to vector<2x8x8xf32>
    %722 = arith.subf %718, %721 : vector<2x8x8xf32>
    %723 = math.exp %722 : vector<2x8x8xf32>
    %cst_146 = arith.constant dense<0.000000e+00> : vector<2x8xf32>
    %724 = vector.multi_reduction <add>, %723, %cst_146 [2] : vector<2x8x8xf32> to vector<2x8xf32>
    %725 = math.log %724 : vector<2x8xf32>
    %726 = arith.addf %719, %725 : vector<2x8xf32>
    %727 = vector.shape_cast %709 : vector<2x1xi1> to vector<2x1xi1>
    %728 = vector.broadcast %727 : vector<2x1xi1> to vector<2x8xi1>
    %729 = arith.select %728, %726, %692 : vector<2x8xi1>, vector<2x8xf32>
    %730 = vector.shape_cast %708 : vector<2x8xf32> to vector<2x1x8xf32>
    %731 = vector.shape_cast %479 : vector<8x8xf32> to vector<1x8x8xf32>
    %732 = vector.broadcast %730 : vector<2x1x8xf32> to vector<2x8x8xf32>
    %733 = vector.broadcast %731 : vector<1x8x8xf32> to vector<2x8x8xf32>
    %734 = arith.addf %732, %733 : vector<2x8x8xf32>
    %cst_147 = arith.constant dense<0xFF800000> : vector<2x8xf32>
    %735 = vector.multi_reduction <maximumf>, %734, %cst_147 [2] : vector<2x8x8xf32> to vector<2x8xf32>
    %736 = vector.shape_cast %735 : vector<2x8xf32> to vector<2x8x1xf32>
    %737 = vector.broadcast %736 : vector<2x8x1xf32> to vector<2x8x8xf32>
    %738 = arith.cmpf oeq, %734, %737 : vector<2x8x8xf32>
    %c8_i32_148 = arith.constant 8 : i32
    %739 = vector.broadcast %c8_i32_148 : i32 to vector<2x8x8xi32>
    %740 = arith.select %738, %486, %739 : vector<2x8x8xi1>, vector<2x8x8xi32>
    %cst_149 = arith.constant dense<2147483647> : vector<2x8xi32>
    %741 = vector.multi_reduction <minsi>, %740, %cst_149 [2] : vector<2x8x8xi32> to vector<2x8xi32>
    %742 = arith.addf %735, %710 : vector<2x8xf32>
    %743 = vector.shape_cast %709 : vector<2x1xi1> to vector<2x1xi1>
    %744 = vector.broadcast %743 : vector<2x1xi1> to vector<2x8xi1>
    %745 = arith.select %744, %742, %708 : vector<2x8xi1>, vector<2x8xf32>
    %746 = vector.extract_strided_slice %468 {offsets = [14, 0], sizes = [2, 1], strides = [1, 1]} : vector<16x1xi1> to vector<2x1xi1>
    %747 = vector.extract_strided_slice %444 {offsets = [14, 0], sizes = [2, 8], strides = [1, 1]} : vector<16x8xf32> to vector<2x8xf32>
    %748 = vector.shape_cast %729 : vector<2x8xf32> to vector<2x1x8xf32>
    %749 = vector.shape_cast %747 : vector<2x8xf32> to vector<2x8x1xf32>
    %750 = vector.broadcast %748 : vector<2x1x8xf32> to vector<2x8x8xf32>
    %751 = vector.broadcast %749 : vector<2x8x1xf32> to vector<2x8x8xf32>
    %752 = arith.addf %750, %751 : vector<2x8x8xf32>
    %753 = vector.shape_cast %472 : vector<8x8xf32> to vector<1x8x8xf32>
    %754 = vector.broadcast %753 : vector<1x8x8xf32> to vector<2x8x8xf32>
    %755 = arith.addf %752, %754 : vector<2x8x8xf32>
    %cst_150 = arith.constant dense<0xFF800000> : vector<2x8xf32>
    %756 = vector.multi_reduction <maximumf>, %755, %cst_150 [2] : vector<2x8x8xf32> to vector<2x8xf32>
    %757 = vector.shape_cast %756 : vector<2x8xf32> to vector<2x8x1xf32>
    %758 = vector.broadcast %757 : vector<2x8x1xf32> to vector<2x8x8xf32>
    %759 = arith.subf %755, %758 : vector<2x8x8xf32>
    %760 = math.exp %759 : vector<2x8x8xf32>
    %cst_151 = arith.constant dense<0.000000e+00> : vector<2x8xf32>
    %761 = vector.multi_reduction <add>, %760, %cst_151 [2] : vector<2x8x8xf32> to vector<2x8xf32>
    %762 = math.log %761 : vector<2x8xf32>
    %763 = arith.addf %756, %762 : vector<2x8xf32>
    %764 = vector.shape_cast %746 : vector<2x1xi1> to vector<2x1xi1>
    %765 = vector.broadcast %764 : vector<2x1xi1> to vector<2x8xi1>
    %766 = arith.select %765, %763, %729 : vector<2x8xi1>, vector<2x8xf32>
    %767 = vector.shape_cast %745 : vector<2x8xf32> to vector<2x1x8xf32>
    %768 = vector.shape_cast %479 : vector<8x8xf32> to vector<1x8x8xf32>
    %769 = vector.broadcast %767 : vector<2x1x8xf32> to vector<2x8x8xf32>
    %770 = vector.broadcast %768 : vector<1x8x8xf32> to vector<2x8x8xf32>
    %771 = arith.addf %769, %770 : vector<2x8x8xf32>
    %cst_152 = arith.constant dense<0xFF800000> : vector<2x8xf32>
    %772 = vector.multi_reduction <maximumf>, %771, %cst_152 [2] : vector<2x8x8xf32> to vector<2x8xf32>
    %773 = vector.shape_cast %772 : vector<2x8xf32> to vector<2x8x1xf32>
    %774 = vector.broadcast %773 : vector<2x8x1xf32> to vector<2x8x8xf32>
    %775 = arith.cmpf oeq, %771, %774 : vector<2x8x8xf32>
    %c8_i32_153 = arith.constant 8 : i32
    %776 = vector.broadcast %c8_i32_153 : i32 to vector<2x8x8xi32>
    %777 = arith.select %775, %486, %776 : vector<2x8x8xi1>, vector<2x8x8xi32>
    %cst_154 = arith.constant dense<2147483647> : vector<2x8xi32>
    %778 = vector.multi_reduction <minsi>, %777, %cst_154 [2] : vector<2x8x8xi32> to vector<2x8xi32>
    %779 = arith.addf %772, %747 : vector<2x8xf32>
    %780 = vector.shape_cast %746 : vector<2x1xi1> to vector<2x1xi1>
    %781 = vector.broadcast %780 : vector<2x1xi1> to vector<2x8xi1>
    %782 = arith.select %781, %779, %745 : vector<2x8xi1>, vector<2x8xf32>
    %783 = vector.extract_strided_slice %472 {offsets = [7, 0], sizes = [1, 8], strides = [1, 1]} : vector<8x8xf32> to vector<1x8xf32>
    %784 = vector.broadcast %783 : vector<1x8xf32> to vector<2x8xf32>
    %785 = arith.addf %766, %784 : vector<2x8xf32>
    %cst_155 = arith.constant dense<0xFF800000> : vector<2xf32>
    %786 = vector.multi_reduction <maximumf>, %785, %cst_155 [1] : vector<2x8xf32> to vector<2xf32>
    %787 = vector.shape_cast %786 : vector<2xf32> to vector<2x1xf32>
    %788 = vector.broadcast %787 : vector<2x1xf32> to vector<2x8xf32>
    %789 = arith.subf %785, %788 : vector<2x8xf32>
    %790 = math.exp %789 : vector<2x8xf32>
    %cst_156 = arith.constant dense<0.000000e+00> : vector<2xf32>
    %791 = vector.multi_reduction <add>, %790, %cst_156 [1] : vector<2x8xf32> to vector<2xf32>
    %792 = vector.shape_cast %791 : vector<2xf32> to vector<2x1xf32>
    %793 = math.log %792 : vector<2x1xf32>
    %794 = arith.addf %787, %793 : vector<2x1xf32>
    %795 = vector.extract_strided_slice %479 {offsets = [7, 0], sizes = [1, 8], strides = [1, 1]} : vector<8x8xf32> to vector<1x8xf32>
    %796 = vector.broadcast %795 : vector<1x8xf32> to vector<2x8xf32>
    %797 = arith.addf %782, %796 : vector<2x8xf32>
    %c0_157 = arith.constant 0 : index
    %c0_158 = arith.constant 0 : index
    %798 = vector.load %arg23[%c0_157, %c0_158] : memref<2x8xf32, #tpu.memory_space<vmem>>, vector<2x8xf32>
    tpu.vector_store %arg23[%c0_157, %c0_158], %797 {strides = array<i32>} : memref<2x8xf32, #tpu.memory_space<vmem>>, vector<2x8xf32>,
    %799 = tpu.concatenate %519, %556, %593, %630, %667, %704, %741, %778 in 1 : vector<2x8xi32>, vector<2x8xi32>, vector<2x8xi32>, vector<2x8xi32>, vector<2x8xi32>, vector<2x8xi32>, vector<2x8xi32>, vector<2x8xi32> -> vector<2x64xi32>
    %c0_159 = arith.constant 0 : index
    %c0_160 = arith.constant 0 : index
    %800 = vector.load %arg22[%c0_159, %c0_160] : memref<2x64xi32, #tpu.memory_space<vmem>>, vector<2x64xi32>
    tpu.vector_store %arg22[%c0_159, %c0_160], %799 {strides = array<i32>} : memref<2x64xi32, #tpu.memory_space<vmem>>, vector<2x64xi32>,
    %801 = tpu.iota {dimensions = array<i32: 1>} : vector<16x8xi32>
    %c0_161 = arith.constant 0 : index
    %c0_162 = arith.constant 0 : index
    %802 = vector.load %arg4[%c0_161, %c0_162] : memref<16x1xi32, #tpu.memory_space<vmem>>, vector<16x1xi32>
    %803 = vector.broadcast %802 : vector<16x1xi32> to vector<16x8xi32>
    %804 = arith.cmpi eq, %801, %803 : vector<16x8xi32>
    %805 = arith.extui %804 : vector<16x8xi1> to vector<16x8xi32>
    %806 = arith.sitofp %805 : vector<16x8xi32> to vector<16x8xf32>
    %c6_i32_163 = arith.constant 6 : i32
    %807 = vector.broadcast %c6_i32_163 : i32 to vector<2x8xi32>
    %808 = arith.cmpi eq, %480, %807 : vector<2x8xi32>
    %809 = arith.extui %808 : vector<2x8xi1> to vector<2x8xi32>
    %810 = arith.sitofp %809 : vector<2x8xi32> to vector<2x8xf32>
    %811 = vector.extract_strided_slice %806 {offsets = [0, 0], sizes = [14, 8], strides = [1, 1]} : vector<16x8xf32> to vector<14x8xf32>
    %812 = tpu.concatenate %810, %811 in 0 : vector<2x8xf32>, vector<14x8xf32> -> vector<16x8xf32>
    %813 = arith.mulf %444, %806 : vector<16x8xf32>
    %cst_164 = arith.constant dense<0.000000e+00> : vector<16xf32>
    %814 = vector.multi_reduction <add>, %813, %cst_164 [1] : vector<16x8xf32> to vector<16xf32>
    %815 = vector.shape_cast %814 : vector<16xf32> to vector<16x1xf32>
    %cst_165 = arith.constant dense<0.000000e+00> : vector<16x8xf32>
    %816 = tpu.matmul %806, %472, %cst_165 {dimension_numbers = #tpu.dot_dimension_numbers<[1], [0], [0], [1], [0, 0, 1, 1], [], []>} : vector<16x8xf32>, vector<8x8xf32>, vector<16x8xf32> -> vector<16x8xf32>
    %817 = arith.mulf %812, %816 : vector<16x8xf32>
    %cst_166 = arith.constant dense<0.000000e+00> : vector<16xf32>
    %818 = vector.multi_reduction <add>, %817, %cst_166 [1] : vector<16x8xf32> to vector<16xf32>
    %819 = vector.shape_cast %818 : vector<16xf32> to vector<16x1xf32>
    %820 = arith.addf %815, %819 : vector<16x1xf32>
    %821 = arith.mulf %820, %470 : vector<16x1xf32>
    %cst_167 = arith.constant 0.000000e+00 : f32
    %822 = vector.broadcast %cst_167 : f32 to vector<2x1xf32>
    %c0_i32_168 = arith.constant 0 : i32
    %823 = vector.broadcast %c0_i32_168 : i32 to vector<2x1xi32>
    %824 = vector.extract_strided_slice %821 {offsets = [0, 0], sizes = [2, 1], strides = [1, 1]} : vector<16x1xf32> to vector<2x1xf32>
    %825 = arith.addf %822, %824 : vector<2x1xf32>
    %826 = vector.extract_strided_slice %471 {offsets = [0, 0], sizes = [2, 1], strides = [1, 1]} : vector<16x1xi32> to vector<2x1xi32>
    %827 = arith.addi %823, %826 : vector<2x1xi32>
    %828 = vector.extract_strided_slice %821 {offsets = [2, 0], sizes = [2, 1], strides = [1, 1]} : vector<16x1xf32> to vector<2x1xf32>
    %829 = arith.addf %825, %828 : vector<2x1xf32>
    %830 = vector.extract_strided_slice %471 {offsets = [2, 0], sizes = [2, 1], strides = [1, 1]} : vector<16x1xi32> to vector<2x1xi32>
    %831 = arith.addi %827, %830 : vector<2x1xi32>
    %832 = vector.extract_strided_slice %821 {offsets = [4, 0], sizes = [2, 1], strides = [1, 1]} : vector<16x1xf32> to vector<2x1xf32>
    %833 = arith.addf %829, %832 : vector<2x1xf32>
    %834 = vector.extract_strided_slice %471 {offsets = [4, 0], sizes = [2, 1], strides = [1, 1]} : vector<16x1xi32> to vector<2x1xi32>
    %835 = arith.addi %831, %834 : vector<2x1xi32>
    %836 = vector.extract_strided_slice %821 {offsets = [6, 0], sizes = [2, 1], strides = [1, 1]} : vector<16x1xf32> to vector<2x1xf32>
    %837 = arith.addf %833, %836 : vector<2x1xf32>
    %838 = vector.extract_strided_slice %471 {offsets = [6, 0], sizes = [2, 1], strides = [1, 1]} : vector<16x1xi32> to vector<2x1xi32>
    %839 = arith.addi %835, %838 : vector<2x1xi32>
    %840 = vector.extract_strided_slice %821 {offsets = [8, 0], sizes = [2, 1], strides = [1, 1]} : vector<16x1xf32> to vector<2x1xf32>
    %841 = arith.addf %837, %840 : vector<2x1xf32>
    %842 = vector.extract_strided_slice %471 {offsets = [8, 0], sizes = [2, 1], strides = [1, 1]} : vector<16x1xi32> to vector<2x1xi32>
    %843 = arith.addi %839, %842 : vector<2x1xi32>
    %844 = vector.extract_strided_slice %821 {offsets = [10, 0], sizes = [2, 1], strides = [1, 1]} : vector<16x1xf32> to vector<2x1xf32>
    %845 = arith.addf %841, %844 : vector<2x1xf32>
    %846 = vector.extract_strided_slice %471 {offsets = [10, 0], sizes = [2, 1], strides = [1, 1]} : vector<16x1xi32> to vector<2x1xi32>
    %847 = arith.addi %843, %846 : vector<2x1xi32>
    %848 = vector.extract_strided_slice %821 {offsets = [12, 0], sizes = [2, 1], strides = [1, 1]} : vector<16x1xf32> to vector<2x1xf32>
    %849 = arith.addf %845, %848 : vector<2x1xf32>
    %850 = vector.extract_strided_slice %471 {offsets = [12, 0], sizes = [2, 1], strides = [1, 1]} : vector<16x1xi32> to vector<2x1xi32>
    %851 = arith.addi %847, %850 : vector<2x1xi32>
    %852 = vector.extract_strided_slice %821 {offsets = [14, 0], sizes = [2, 1], strides = [1, 1]} : vector<16x1xf32> to vector<2x1xf32>
    %853 = arith.addf %849, %852 : vector<2x1xf32>
    %854 = vector.extract_strided_slice %471 {offsets = [14, 0], sizes = [2, 1], strides = [1, 1]} : vector<16x1xi32> to vector<2x1xi32>
    %855 = arith.addi %851, %854 : vector<2x1xi32>
    %c0_i32_169 = arith.constant 0 : i32
    %856 = vector.broadcast %c0_i32_169 : i32 to vector<2x1xi32>
    %857 = arith.cmpi eq, %855, %856 : vector<2x1xi32>
    %cst_170 = arith.constant 0.000000e+00 : f32
    %858 = vector.shape_cast %857 : vector<2x1xi1> to vector<2x1xi1>
    %859 = vector.broadcast %858 : vector<2x1xi1> to vector<2x8xi1>
    %860 = vector.broadcast %cst_170 : f32 to vector<2x8xf32>
    %861 = arith.select %859, %810, %860 : vector<2x8xi1>, vector<2x8xf32>
    %c1_i32 = arith.constant 1 : i32
    %862 = vector.broadcast %c1_i32 : i32 to vector<2x1xi32>
    %863 = arith.cmpi eq, %855, %862 : vector<2x1xi32>
    %864 = vector.extract_strided_slice %806 {offsets = [0, 0], sizes = [2, 8], strides = [1, 1]} : vector<16x8xf32> to vector<2x8xf32>
    %cst_171 = arith.constant 0.000000e+00 : f32
    %865 = vector.shape_cast %863 : vector<2x1xi1> to vector<2x1xi1>
    %866 = vector.broadcast %865 : vector<2x1xi1> to vector<2x8xi1>
    %867 = vector.broadcast %cst_171 : f32 to vector<2x8xf32>
    %868 = arith.select %866, %864, %867 : vector<2x8xi1>, vector<2x8xf32>
    %869 = arith.addf %861, %868 : vector<2x8xf32>
    %c2_i32 = arith.constant 2 : i32
    %870 = vector.broadcast %c2_i32 : i32 to vector<2x1xi32>
    %871 = arith.cmpi eq, %855, %870 : vector<2x1xi32>
    %872 = vector.extract_strided_slice %806 {offsets = [2, 0], sizes = [2, 8], strides = [1, 1]} : vector<16x8xf32> to vector<2x8xf32>
    %cst_172 = arith.constant 0.000000e+00 : f32
    %873 = vector.shape_cast %871 : vector<2x1xi1> to vector<2x1xi1>
    %874 = vector.broadcast %873 : vector<2x1xi1> to vector<2x8xi1>
    %875 = vector.broadcast %cst_172 : f32 to vector<2x8xf32>
    %876 = arith.select %874, %872, %875 : vector<2x8xi1>, vector<2x8xf32>
    %877 = arith.addf %869, %876 : vector<2x8xf32>
    %c3_i32 = arith.constant 3 : i32
    %878 = vector.broadcast %c3_i32 : i32 to vector<2x1xi32>
    %879 = arith.cmpi eq, %855, %878 : vector<2x1xi32>
    %880 = vector.extract_strided_slice %806 {offsets = [4, 0], sizes = [2, 8], strides = [1, 1]} : vector<16x8xf32> to vector<2x8xf32>
    %cst_173 = arith.constant 0.000000e+00 : f32
    %881 = vector.shape_cast %879 : vector<2x1xi1> to vector<2x1xi1>
    %882 = vector.broadcast %881 : vector<2x1xi1> to vector<2x8xi1>
    %883 = vector.broadcast %cst_173 : f32 to vector<2x8xf32>
    %884 = arith.select %882, %880, %883 : vector<2x8xi1>, vector<2x8xf32>
    %885 = arith.addf %877, %884 : vector<2x8xf32>
    %c4_i32 = arith.constant 4 : i32
    %886 = vector.broadcast %c4_i32 : i32 to vector<2x1xi32>
    %887 = arith.cmpi eq, %855, %886 : vector<2x1xi32>
    %888 = vector.extract_strided_slice %806 {offsets = [6, 0], sizes = [2, 8], strides = [1, 1]} : vector<16x8xf32> to vector<2x8xf32>
    %cst_174 = arith.constant 0.000000e+00 : f32
    %889 = vector.shape_cast %887 : vector<2x1xi1> to vector<2x1xi1>
    %890 = vector.broadcast %889 : vector<2x1xi1> to vector<2x8xi1>
    %891 = vector.broadcast %cst_174 : f32 to vector<2x8xf32>
    %892 = arith.select %890, %888, %891 : vector<2x8xi1>, vector<2x8xf32>
    %893 = arith.addf %885, %892 : vector<2x8xf32>
    %c5_i32 = arith.constant 5 : i32
    %894 = vector.broadcast %c5_i32 : i32 to vector<2x1xi32>
    %895 = arith.cmpi eq, %855, %894 : vector<2x1xi32>
    %896 = vector.extract_strided_slice %806 {offsets = [8, 0], sizes = [2, 8], strides = [1, 1]} : vector<16x8xf32> to vector<2x8xf32>
    %cst_175 = arith.constant 0.000000e+00 : f32
    %897 = vector.shape_cast %895 : vector<2x1xi1> to vector<2x1xi1>
    %898 = vector.broadcast %897 : vector<2x1xi1> to vector<2x8xi1>
    %899 = vector.broadcast %cst_175 : f32 to vector<2x8xf32>
    %900 = arith.select %898, %896, %899 : vector<2x8xi1>, vector<2x8xf32>
    %901 = arith.addf %893, %900 : vector<2x8xf32>
    %c6_i32_176 = arith.constant 6 : i32
    %902 = vector.broadcast %c6_i32_176 : i32 to vector<2x1xi32>
    %903 = arith.cmpi eq, %855, %902 : vector<2x1xi32>
    %904 = vector.extract_strided_slice %806 {offsets = [10, 0], sizes = [2, 8], strides = [1, 1]} : vector<16x8xf32> to vector<2x8xf32>
    %cst_177 = arith.constant 0.000000e+00 : f32
    %905 = vector.shape_cast %903 : vector<2x1xi1> to vector<2x1xi1>
    %906 = vector.broadcast %905 : vector<2x1xi1> to vector<2x8xi1>
    %907 = vector.broadcast %cst_177 : f32 to vector<2x8xf32>
    %908 = arith.select %906, %904, %907 : vector<2x8xi1>, vector<2x8xf32>
    %909 = arith.addf %901, %908 : vector<2x8xf32>
    %c7_i32 = arith.constant 7 : i32
    %910 = vector.broadcast %c7_i32 : i32 to vector<2x1xi32>
    %911 = arith.cmpi eq, %855, %910 : vector<2x1xi32>
    %912 = vector.extract_strided_slice %806 {offsets = [12, 0], sizes = [2, 8], strides = [1, 1]} : vector<16x8xf32> to vector<2x8xf32>
    %cst_178 = arith.constant 0.000000e+00 : f32
    %913 = vector.shape_cast %911 : vector<2x1xi1> to vector<2x1xi1>
    %914 = vector.broadcast %913 : vector<2x1xi1> to vector<2x8xi1>
    %915 = vector.broadcast %cst_178 : f32 to vector<2x8xf32>
    %916 = arith.select %914, %912, %915 : vector<2x8xi1>, vector<2x8xf32>
    %917 = arith.addf %909, %916 : vector<2x8xf32>
    %c8_i32_179 = arith.constant 8 : i32
    %918 = vector.broadcast %c8_i32_179 : i32 to vector<2x1xi32>
    %919 = arith.cmpi eq, %855, %918 : vector<2x1xi32>
    %920 = vector.extract_strided_slice %806 {offsets = [14, 0], sizes = [2, 8], strides = [1, 1]} : vector<16x8xf32> to vector<2x8xf32>
    %cst_180 = arith.constant 0.000000e+00 : f32
    %921 = vector.shape_cast %919 : vector<2x1xi1> to vector<2x1xi1>
    %922 = vector.broadcast %921 : vector<2x1xi1> to vector<2x8xi1>
    %923 = vector.broadcast %cst_180 : f32 to vector<2x8xf32>
    %924 = arith.select %922, %920, %923 : vector<2x8xi1>, vector<2x8xf32>
    %925 = arith.addf %917, %924 : vector<2x8xf32>
    %926 = vector.extract_strided_slice %472 {offsets = [7, 0], sizes = [1, 8], strides = [1, 1]} : vector<8x8xf32> to vector<1x8xf32>
    %927 = vector.broadcast %926 : vector<1x8xf32> to vector<2x8xf32>
    %928 = arith.mulf %925, %927 : vector<2x8xf32>
    %cst_181 = arith.constant dense<0.000000e+00> : vector<2xf32>
    %929 = vector.multi_reduction <add>, %928, %cst_181 [1] : vector<2x8xf32> to vector<2xf32>
    %930 = vector.shape_cast %929 : vector<2xf32> to vector<2x1xf32>
    %931 = arith.addf %853, %930 : vector<2x1xf32>
    %932 = arith.subf %794, %931 : vector<2x1xf32>
    %cst_182 = arith.constant dense<0.000000e+00> : vector<1xf32>
    %933 = vector.multi_reduction <add>, %932, %cst_182 [0] : vector<2x1xf32> to vector<1xf32>
    %934 = vector.shape_cast %933 : vector<1xf32> to vector<1x1xf32>
    %cst_183 = arith.constant 5.000000e-01 : f32
    %935 = vector.broadcast %cst_183 : f32 to vector<1x1xf32>
    %936 = arith.mulf %934, %935 : vector<1x1xf32>
    %c0_184 = arith.constant 0 : index
    %c0_185 = arith.constant 0 : index
    %937 = vector.load %arg20[%c0_184, %c0_185] : memref<1x1xf32, #tpu.memory_space<vmem>>, vector<1x1xf32>
    tpu.vector_store %arg20[%c0_184, %c0_185], %936 {strides = array<i32>} : memref<1x1xf32, #tpu.memory_space<vmem>>, vector<1x1xf32>,
    return
  }
}

</mosaic_0001>

<bundles_post_ra>
// kernel: model_forward.1
= control target key start
LH: loop header
LB: loop body
LE: loop exit
PB: predicated region body
PF: predicated region fallthrough
CT: control target
= control target key end

     0   :  { %s7223_s0 = inlined_call_operand.vmem [shape: s32[20,1], index: 0, kind: input, shape index: {}]   ;;  %s7224_s1 = inlined_call_operand.vmem [shape: s32[16,1], index: 1, kind: input, shape index: {}]   ;;  %s7225_s2 = inlined_call_operand.vmem [shape: s32[16,1], index: 2, kind: input, shape index: {}]   ;;  %s7226_s3 = inlined_call_operand.vmem [shape: s32[16,1], index: 3, kind: input, shape index: {}]   ;;  %s7227_s4 = inlined_call_operand.vmem [shape: s32[16,1], index: 4, kind: input, shape index: {}]   ;;  %s7228_s5 = inlined_call_operand.vmem [shape: f32[16,1], index: 5, kind: input, shape index: {}]   ;;  %s7229_s6 = inlined_call_operand.vmem [shape: f32[32,8], index: 6, kind: input, shape index: {}]   ;;  %s7230_s7 = inlined_call_operand.vmem [shape: f32[32,8], index: 7, kind: input, shape index: {}]   ;;  %s7231_s8 = inlined_call_operand.vmem [shape: f32[8,64], index: 8, kind: input, shape index: {}]   ;;  %s7232_s9 = inlined_call_operand.vmem [shape: f32[16,64], index: 9, kind: input, shape index: {}]   ;;  %s7233_s10 = inlined_call_operand.vmem [shape: f32[1,64], index: 10, kind: input, shape index: {}]   ;;  %s7234_s11 = inlined_call_operand.vmem [shape: f32[16,128], index: 11, kind: input, shape index: {}]   ;;  %s7235_s12 = inlined_call_operand.vmem [shape: f32[16,128], index: 12, kind: input, shape index: {}]   ;;  %s7236_s13 = inlined_call_operand.vmem [shape: f32[1,128], index: 13, kind: input, shape index: {}]   ;;  %s7237_s14 = inlined_call_operand.vmem [shape: f32[32,128], index: 14, kind: input, shape index: {}]   ;;  %s7238_s15 = inlined_call_operand.vmem [shape: f32[32,9], index: 15, kind: input, shape index: {}]   ;;  %s7239_s16 = inlined_call_operand.vmem [shape: f32[1,9], index: 16, kind: input, shape index: {}]   ;;  %s7240_s17 = inlined_call_operand.vmem [shape: f32[1,9], index: 17, kind: input, shape index: {}]   ;;  %s7241_s18 = inlined_call_operand.vmem [shape: f32[8,8], index: 18, kind: input, shape index: {}]   ;;  %s7242_s19 = inlined_call_operand.vmem [shape: f32[8,8], index: 19, kind: input, shape index: {}]   ;;  %s7243_s20 = inlined_call_operand.hbm [shape: f32[1,1], index: 20, kind: output, shape index: {0}]   ;;  %s7244_s21 = inlined_call_operand.vmem [shape: f32[2,1], index: 21, kind: output, shape index: {1}]   ;;  %s7245_s22 = inlined_call_operand.hbm [shape: s32[2,64], index: 22, kind: output, shape index: {2}]   ;;  %s7246_s23 = inlined_call_operand.hbm [shape: f32[2,8], index: 23, kind: output, shape index: {3}]  }
   0x1   :  { %7269 = sst [smem:[#allocation20_spill]] %s7223_s0 }
   0x2   :  { %7270 = sst [smem:[#allocation21_spill]] %s7224_s1 }
   0x3   :  { %7271 = sst [smem:[#allocation22_spill]] %s7225_s2 }
   0x4   :  { %7272 = sst [smem:[#allocation23_spill]] %s7226_s3 }
   0x5   :  { %7273 = sst [smem:[#allocation24_spill]] %s7227_s4 }
   0x6   :  { %7274 = sst [smem:[#allocation25_spill]] %s7228_s5 }
   0x7   :  { %7275 = sst [smem:[#allocation26_spill]] %s7229_s6 }
   0x8   :  { %7276 = sst [smem:[#allocation27_spill]] %s7230_s7 }
   0x9   :  { %29 = vsyncpa [#allocation4], 0  ;;  %s7277_s24 = sld [smem:[#allocation20_spill]]  ;;  %s7278_s1 = sld [smem:[#allocation21_spill]]  ;;  %v5610_v2 = vmov 0   ;;  %v5611_v8 = vmov 0.0|0.0  }
   0xa   :  { %5325 = vset.pattern.permute.xlu0 %v5610_v2  ;;  %5326 = vset.pattern.permute.xlu1 %v5610_v2  ;;  %s7279_s29 = sld [smem:[#allocation26_spill]]  ;;  %vm5612_vm0 = vmmov 0   ;;  %v7263_v11 = vmov 0.0   ;;  %s7280_s2 = sld [smem:[#allocation27_spill]] }
   0xb   :  { %5201 = vmatprep.subr.bf16.mxu0 %v5611_v8  ;;  %4979 = vmatprep.mubr.msk.f32.mxu0 %vm5612_vm0, %v7263_v11 }
   0xf   :  { %v73_v0 = vld [vmem:[%s7277_s24] sm:$0xff]  ;;  %v189_v1 = vld [vmem:[%s7278_s1 + $0x8] sm:$0xff] }
  0x10   :  { %v188_v3 = vld [vmem:[%s7278_s1] sm:$0xff]  ;;  %v74_v4 = vld [vmem:[%s7277_s24 + $0x8] sm:$0xff]  ;;  %77 = vperm.xlu0 %5325, %v73_v0   ;;  %194 = vperm.xlu1 %5326, %v189_v1   ;;  %v96_v7 = vld [vmem:[%s7279_s29 + $0x10] sm:$0xff] }
  0x11   :  { %v94_v5 = vld [vmem:[%s7279_s29] sm:$0xff]  ;;  %v95_v6 = vld [vmem:[%s7279_s29 + $0x8] sm:$0xff]  ;;  %v97_v10 = vld [vmem:[%s7279_s29 + $0x18] sm:$0xff] }
  0x12   :  { %v5202_v9 = vpack.c.bf16 %v95_v6, %v94_v5  ;;  %v216_v12 = vld [vmem:[%s7280_s2] sm:$0xff]  ;;  %v217_v13 = vld [vmem:[%s7280_s2 + $0x8] sm:$0xff]  ;;  %v218_v15 = vld [vmem:[%s7280_s2 + $0x10] sm:$0xff] }
  0x13   :  { %v5207_v14 = vpack.c.bf16 %v217_v13, %v216_v12  ;;  %v219_v16 = vld [vmem:[%s7280_s2 + $0x18] sm:$0xff] }
  0x14   :  { %30 = vsyncpa [#allocation6], 0  ;;  %5203 = vmatpush3.bf16.msra.mxu0 %v5202_v9  ;;  %v5205_v17 = vpack.c.bf16 %v97_v10, %v96_v7  ;;  %v5211_v18 = vpack.c.bf16 %v219_v16, %v218_v15  ;;  %191 = vperm.xlu0 %5325, %v188_v3   ;;  %s7281_s30 = sld [smem:[#allocation22_spill]]  ;;  %v75_v20 = vld [vmem:[%s7277_s24 + $0x10] sm:$0xf]  ;;  %v71_v22 = vlaneseq  ;;  %v425_v24 = vld [vmem:[%s7232_s9] sm:$0xff] }
  0x15   :  { %80 = vperm.xlu1 %5326, %v74_v4   ;;  %5204 = vmatprep.subr.bf16.mxu0 %v5611_v8  ;;  %v426_v25 = vld [vmem:[%s7232_s9 + $0x8] sm:$0xff]  ;;  %vm98_vm1 = vcmask 261120   ;;  %v328_v35 = vld [vmem:[%s7231_s8] sm:$0xff]  ;;  %vm325_vm9 = vcmask 64512   ;;  %s5614_s3 = smov 80   ;;  %s5616_s29 = smov 96  }
  0x16   :  { %5208 = vmatprep.subr.bf16.mxu1 %v5207_v14  ;;  %v5801_v23 = vand.u32 127, %v71_v22  ;;  %v5809_v28 = vpack.c.bf16 %v426_v25, %v425_v24  ;;  %v4812_v54 = vld [vmem:[%s7233_s10] ss:$0 sm:$0xff]  ;;  %s5615_s10 = smov 16   ;;  %vm427_vm10 = vcmask 130048   ;;  %s5617_s0 = smov 8  }
  0x17   :  { %5210 = vmatpush3.bf16.msra.mxu1 %v5207_v14  ;;  %vm1593_vm11 = vcmask 1041408   ;;  %vm1595_vm12 = vcmask 1043456   ;;  %vm1597_vm13 = vcmask 1045504   ;;  %vm1804_vm14 = vcmask 123904   ;;  %s7285_s28 = sld [smem:[#allocation23_spill]]  ;;  %s5624_s2 = smov [#allocation5]  }
  0x18   :  { %5206 = vmatpush3.bf16.msra.mxu0 %v5205_v17  ;;  %5212 = vmatprep.subr.bf16.mxu1 %v5211_v18  ;;  %7282 = vst [vmem:[#allocation10_spill] sm:$0xff] %v5801_v23  ;;  %vm1806_vm15 = vcmask 255104   ;;  %s4771_s6 = sshll.u32 %s5624_s2, 4  ;;  %s4772_s6 = int_to_ptr.vmem [resolvable:$true] %s4771_s6 }
  0x19   :  { %5215 = vmatprep.subr.bf16.mxu0 %v5611_v8  ;;  %p5545_p1 = scmp.lt.s32.totalorder %s4772_s6, %s4772_s6 }
  0x1a   :  { %v202_v19 = vld [vmem:[%s7281_s30] sm:$0xff]  ;;  %v203_v21 = vld [vmem:[%s7281_s30 + $0x8] sm:$0xff]  ;;  %s7283_s30 = sld [smem:[#allocation25_spill]] }
  0x1b   :  { %205 = vperm.xlu0 %5325, %v202_v19   ;;  %5214 = vmatpush3.bf16.msra.mxu1 %v5211_v18 }
  0x1c   :  { %5002 = vmatprep.subr.mxu1 %v7263_v11  ;;  %208 = vperm.xlu1 %5326, %v203_v21  }
  0x1f   :  { %83 = vperm.xlu0 %5325, %v75_v20  }
  0x8f   :  { %v78_v26 = vpop.permute.xlu0 %77  ;;  %v195_v27 = vpop.permute.xlu1 %194 }
  0x90   :  { %vm85_vm2 = vcmp.eq.s32.totalorder %v5801_v23, %v78_v26  ;;  %vm197_vm3 = vcmp.eq.s32.totalorder %v5801_v23, %v195_v27 }
  0x91   :  { %v4798_v29 = vsel %vm85_vm2, 1.0, %v7263_v11  ;;  %v4805_v32 = vsel %vm197_vm3, 1.0, %v7263_v11  ;;  %vm1917_vm2 = vcmask 257154   ;;  %vm2143_vm3 = vcmask 130054  }
  0x92   :  { %4980 = vmatmul.mubr.msk.f32.vlgmr.msra.gmra.mrb[0].mxu0 %vm98_vm1, %v4798_v29 }
  0x93   :  { %v192_v30 = vpop.permute.xlu0 %191  ;;  %4982 = vmatprep.mubr.msk.f32.mxu0 %vm5612_vm0, %v7263_v11  ;;  %5217 = vmatpush3.bf16.msra.mxu0 %v5809_v28 }
  0x94   :  { %v81_v31 = vpop.permute.xlu1 %80  ;;  %vm196_vm4 = vcmp.eq.s32.totalorder %v5801_v23, %v192_v30  ;;  %5218 = vmatprep.subr.bf16.mxu0 %v5611_v8 }
  0x95   :  { %vm86_vm5 = vcmp.eq.s32.totalorder %v5801_v23, %v81_v31  ;;  %v4804_v33 = vsel %vm196_vm4, 1.0, %v7263_v11  ;;  %vm2145_vm4 = vcmask 261254  }
  0x96   :  { %v4799_v34 = vsel %vm86_vm5, 1.0, %v7263_v11  ;;  %4996 = vmatprep.mubr.msk.f32.mxu1 %vm98_vm1, %v4804_v33  ;;  %vm2029_vm5 = vcmask 128004  }
  0x97   :  { %4983 = vmatmul.mubr.msk.f32.gmra.mrb[2].mxu0 %vm98_vm1, %v4799_v34  ;;  %4997 = vmatmul.mubr.msk.f32.vlgmr.msra.gmra.mrb[0].mxu1 %vm98_vm1, %v4805_v32 }
  0x98   :  { %4985 = vmatprep.mubr.msk.f32.mxu0 %vm5612_vm0, %v7263_v11  ;;  %5003 = vmatpush3.msra.mxu1 %v328_v35 }
  0x99   :  { %5224 = vmatprep.subr.bf16.mxu1 %v5611_v8 }
  0x9a   :  { %v206_v36 = vpop.permute.xlu0 %205 }
  0x9b   :  { %vm210_vm6 = vcmp.eq.s32.totalorder %v5801_v23, %v206_v36  ;;  %v209_v40 = vpop.permute.xlu1 %208 }
  0x9c   :  { %v4806_v37 = vsel %vm210_vm6, 1.0, %v7263_v11  ;;  %vm211_vm8 = vcmp.eq.s32.totalorder %v5801_v23, %v209_v40  ;;  %vm2031_vm6 = vcmask 259204  }
  0x9d   :  { %4999 = vmatprep.mubr.msk.f32.mxu1 %vm98_vm1, %v4806_v37  ;;  %v4807_v41 = vsel %vm211_vm8, 1.0, %v7263_v11 }
  0x9e   :  { %v84_v38 = vpop.permute.xlu0 %83  ;;  %5000 = vmatmul.mubr.msk.f32.gmra.mrb[2].mxu1 %vm98_vm1, %v4807_v41 }
  0x9f   :  { %vm87_vm7 = vcmp.eq.s32.totalorder %v5801_v23, %v84_v38  ;;  %5004 = vmatprep.mubr.msk.f32.mxu1 %vm5612_vm0, %v7263_v11 }
  0xa0   :  { %v4800_v39 = vsel %vm87_vm7, 1.0, %v7263_v11  ;;  %vm2749_vm7 = vcmp.eq.s32.totalorder %v5801_v23, 6 }
  0xa1   :  { %4986 = vmatmul.mubr.msk.f32.gmra.mrb[4].mxu0 %vm98_vm1, %v4800_v39 }
  0xa2   :  { %5017 = vmatprep.mubr.msk.f32.mxu0 %vm5612_vm0, %v7263_v11 }
  0xa5   :  { %5018 = vmatmul.mubr.f32.vlgmr.msra.gmra.mrb[6].mxu0 %v7263_v11 }
  0xa6   :  { %5220 = vmatpush3.bf16.msra.mxu0 %v5809_v28  ;;  %5024 = vmatprep.mubr.msk.f32.mxu0 %vm5612_vm0, %v7263_v11 }
  0xa7   :  { %5221 = vmatprep.subr.bf16.mxu0 %v5611_v8 }
 0x165   :  { %v174_v42 = vpop.f32.mrb[0].mxu0 }
 0x166   :  { %v4981_v43 = vpop.f32.mrb[1].mxu0  ;;  %5005 = vmatmul.mubr.msk.f32.vlgmr.msra.gmra.mrb[4].mxu1 %vm325_vm9, %v174_v42 }
 0x167   :  { %5007 = vmatprep.mubr.msk.f32.mxu1 %vm5612_vm0, %v7263_v11  ;;  %5226 = vmatpush3.bf16.msra.mxu1 %v5809_v28 }
 0x168   :  { %5230 = vmatprep.subr.bf16.mxu1 %v5611_v8 }
 0x16a   :  { %v179_v44 = vpop.f32.mrb[2].mxu0  ;;  %v5857_v46 = vpop.f32.mrb[0].mxu1 }
 0x16b   :  { %5008 = vmatmul.mubr.msk.f32.gmra.mrb[6].mxu1 %vm325_vm9, %v179_v44  ;;  %v4984_v45 = vpop.f32.mrb[3].mxu0  ;;  %v5861_v47 = vpop.f32.mrb[1].mxu1 }
 0x16c   :  { %5010 = vmatprep.mubr.msk.f32.mxu1 %vm5612_vm0, %v7263_v11 }
 0x171   :  { %v5866_v50 = vpop.f32.mrb[2].mxu1 }
 0x172   :  { %v5868_v51 = vpop.f32.mrb[3].mxu1 }
 0x174   :  { %v184_v48 = vpop.f32.mrb[4].mxu0 }
 0x175   :  { %v4987_v49 = vpop.f32.mrb[5].mxu0  ;;  %5011 = vmatmul.mubr.msk.f32.gmra.mrb[8].mxu1 %vm325_vm9, %v184_v48 }
 0x176   :  { %5038 = vmatprep.mubr.msk.f32.mxu1 %vm5612_vm0, %v7263_v11 }
 0x178   :  { %v497_v52 = vpop.f32.mrb[6].mxu0 }
 0x179   :  { %v5019_v53 = vpop.f32.mrb[7].mxu0 }
 0x239   :  { %v411_v55 = vpop.f32.mrb[4].mxu1 }
 0x23a   :  { %v5873_v56 = vadd.f32 %v4812_v54, %v411_v55  ;;  %v5006_v57 = vpop.f32.mrb[5].mxu1 }
 0x23c   :  { %v501_v58 = vadd.f32 %v497_v52, %v5873_v56 }
 0x23e   :  { %v416_v59 = vpop.f32.mrb[6].mxu1  ;;  %5327 = vtanh.f32 %v501_v58  ;;  %v4816_v3 = vmul.f32 -1.442695, %v501_v58 }
 0x23f   :  { %v5876_v60 = vadd.f32 %v4812_v54, %v416_v59  ;;  %v5009_v61 = vpop.f32.mrb[7].mxu1 }
 0x240   :  { %5329 = vpow2.f32 %v4816_v3 }
 0x248   :  { %v421_v62 = vpop.f32.mrb[8].mxu1  ;;  %v5328_v1 = vpop.eup %5327 }
 0x249   :  { %v5878_v63 = vadd.f32 %v4812_v54, %v421_v62  ;;  %v5012_v0 = vpop.f32.mrb[9].mxu1  ;;  %511 = vrot.lane.b32.xlu1 %v5328_v1, %s5614_s3 }
 0x24a   :  { %v5330_v4 = vpop.eup %5329 }
 0x24b   :  { %v505_v5 = vadd.f32 1.0, %v5330_v4 }
 0x24d   :  { %5331 = vrcp.f32 %v505_v5 }
 0x257   :  { %v5332_v6 = vpop.eup %5331 }
 0x258   :  { %v509_v10 = vmul.f32 0.0, %v5332_v6 }
 0x2bb   :  { %v512_v7 = vpop.permute.xlu1 %511 }
 0x2bc   :  { %v514_v9 = vmul.f32 %v5332_v6, %v512_v7 }
 0x2be   :  { %516 = vrot.lane.b32.xlu0 %v514_v9, %s5615_s10 }
 0x330   :  { %v517_v12 = vpop.permute.xlu0 %516 }
 0x331   :  { %v519_v13 = vadd.f32 %v517_v12, %v509_v10 }
 0x333   :  { %5333 = vtanh.f32 %v519_v13  ;;  %v614_v32 = vrot.slane %v519_v13, 6 }
 0x33d   :  { %v5334_v14 = vpop.eup %5333 }
 0x33e   :  { %522 = vrot.lane.b32.xlu1 %v5334_v14, %s5615_s10 }
 0x3b0   :  { %v523_v15 = vpop.permute.xlu1 %522 }
 0x3b1   :  { %v5883_v16 = vmul.f32 %v5332_v6, %v523_v15 }
 0x3b3   :  { %528 = vrot.lane.b32.xlu0 %v5883_v16, %s5616_s29 }
 0x425   :  { %v529_v17 = vpop.permute.xlu0 %528 }
 0x426   :  { %5025 = vmatmul.mubr.msk.f32.vlgmr.msra.gmra.mrb[8].mxu0 %vm427_vm10, %v529_v17 }
 0x427   :  { %5223 = vmatpush3.bf16.msra.mxu0 %v5809_v28  ;;  %5031 = vmatprep.mubr.msk.f32.mxu0 %vm5612_vm0, %v7263_v11 }
 0x428   :  { %5227 = vmatprep.subr.bf16.mxu0 %v5611_v8 }
 0x4f9   :  { %v598_v18 = vpop.f32.mrb[8].mxu0 }
 0x4fa   :  { %v603_v19 = vrot.slane %v598_v18, 6  ;;  %v5026_v20 = vpop.f32.mrb[9].mxu0 }
 0x4fc   :  { %v605_v21 = vadd.f32 %v603_v19, %v5873_v56 }
 0x4fe   :  { %5335 = vtanh.f32 %v605_v21  ;;  %v4818_v25 = vmul.f32 -1.442695, %v605_v21 }
 0x500   :  { %5337 = vpow2.f32 %v4818_v25 }
 0x508   :  { %v5336_v24 = vpop.eup %5335 }
 0x509   :  { %618 = vrot.lane.b32.xlu1 %v5336_v24, %s5614_s3 }
 0x50a   :  { %v5338_v26 = vpop.eup %5337 }
 0x50b   :  { %v609_v27 = vadd.f32 1.0, %v5338_v26 }
 0x50d   :  { %5339 = vrcp.f32 %v609_v27 }
 0x517   :  { %v5340_v29 = vpop.eup %5339 }
 0x518   :  { %v616_v33 = vmul.f32 %v5340_v29, %v614_v32 }
 0x57b   :  { %v619_v30 = vpop.permute.xlu1 %618 }
 0x57c   :  { %v621_v31 = vmul.f32 %v5340_v29, %v619_v30 }
 0x57e   :  { %623 = vrot.lane.b32.xlu0 %v621_v31, %s5615_s10 }
 0x5f0   :  { %v624_v34 = vpop.permute.xlu0 %623 }
 0x5f1   :  { %v626_v35 = vadd.f32 %v624_v34, %v616_v33 }
 0x5f3   :  { %5341 = vtanh.f32 %v626_v35  ;;  %v723_v57 = vrot.slane %v626_v35, 6 }
 0x5fd   :  { %v5342_v36 = vpop.eup %5341 }
 0x5fe   :  { %629 = vrot.lane.b32.xlu1 %v5342_v36, %s5615_s10 }
 0x670   :  { %v630_v37 = vpop.permute.xlu1 %629 }
 0x671   :  { %v632_v38 = vmul.f32 %v5340_v29, %v630_v37 }
 0x673   :  { %v634_v39 = vrot.slane %v632_v38, 2 }
 0x675   :  { %637 = vrot.lane.b32.xlu0 %v634_v39, %s5616_s29  ;;  %v636_v3 = vadd.f32 %v634_v39, %v5883_v16 }
 0x6e7   :  { %v638_v40 = vpop.permute.xlu0 %637 }
 0x6e8   :  { %5032 = vmatmul.mubr.msk.f32.vlgmr.msra.gmra.mrb[10].mxu0 %vm427_vm10, %v638_v40 }
 0x6e9   :  { %5229 = vmatpush3.bf16.msra.mxu0 %v5809_v28  ;;  %5045 = vmatprep.mubr.msk.f32.mxu0 %vm5612_vm0, %v7263_v11 }
 0x6ea   :  { %5233 = vmatprep.subr.bf16.mxu0 %v5611_v8 }
 0x7bb   :  { %v707_v41 = vpop.f32.mrb[10].mxu0 }
 0x7bc   :  { %v712_v42 = vrot.slane %v707_v41, 4  ;;  %v5033_v43 = vpop.f32.mrb[11].mxu0 }
 0x7be   :  { %v714_v44 = vadd.f32 %v712_v42, %v5873_v56 }
 0x7c0   :  { %5343 = vtanh.f32 %v714_v44  ;;  %v4820_v48 = vmul.f32 -1.442695, %v714_v44 }
 0x7c2   :  { %5345 = vpow2.f32 %v4820_v48 }
 0x7ca   :  { %v5344_v45 = vpop.eup %5343 }
 0x7cb   :  { %727 = vrot.lane.b32.xlu1 %v5344_v45, %s5614_s3 }
 0x7cc   :  { %v5346_v49 = vpop.eup %5345 }
 0x7cd   :  { %v718_v52 = vadd.f32 1.0, %v5346_v49 }
 0x7cf   :  { %5347 = vrcp.f32 %v718_v52 }
 0x7d9   :  { %v5348_v53 = vpop.eup %5347 }
 0x7da   :  { %v725_v58 = vmul.f32 %v5348_v53, %v723_v57 }
 0x83d   :  { %v728_v54 = vpop.permute.xlu1 %727 }
 0x83e   :  { %v730_v55 = vmul.f32 %v5348_v53, %v728_v54 }
 0x840   :  { %732 = vrot.lane.b32.xlu0 %v730_v55, %s5615_s10 }
 0x8b2   :  { %v733_v59 = vpop.permute.xlu0 %732 }
 0x8b3   :  { %v735_v61 = vadd.f32 %v733_v59, %v725_v58 }
 0x8b5   :  { %5349 = vtanh.f32 %v735_v61  ;;  %v832_v20 = vrot.slane %v735_v61, 6 }
 0x8bf   :  { %v5350_v62 = vpop.eup %5349 }
 0x8c0   :  { %738 = vrot.lane.b32.xlu1 %v5350_v62, %s5615_s10 }
 0x932   :  { %v739_v0 = vpop.permute.xlu1 %738 }
 0x933   :  { %v741_v1 = vmul.f32 %v5348_v53, %v739_v0 }
 0x935   :  { %v743_v4 = vrot.slane %v741_v1, 4 }
 0x937   :  { %v745_v5 = vadd.f32 %v743_v4, %v636_v3  ;;  %746 = vrot.lane.b32.xlu0 %v743_v4, %s5616_s29 }
 0x9a9   :  { %v747_v6 = vpop.permute.xlu0 %746 }
 0x9aa   :  { %5039 = vmatmul.mubr.msk.f32.vlgmr.msra.gmra.mrb[10].mxu1 %vm427_vm10, %v747_v6 }
 0x9ab   :  { %5232 = vmatpush3.bf16.msra.mxu1 %v5809_v28  ;;  %5052 = vmatprep.mubr.msk.f32.mxu1 %vm5612_vm0, %v7263_v11 }
 0x9ac   :  { %5236 = vmatprep.subr.bf16.mxu1 %v5611_v8 }
 0xa7d   :  { %v816_v7 = vpop.f32.mrb[10].mxu1 }
 0xa7e   :  { %v821_v9 = vrot.slane %v816_v7, 2  ;;  %v5040_v10 = vpop.f32.mrb[11].mxu1 }
 0xa80   :  { %v823_v12 = vadd.f32 %v821_v9, %v5873_v56 }
 0xa82   :  { %5351 = vtanh.f32 %v823_v12  ;;  %v4822_v14 = vmul.f32 -1.442695, %v823_v12 }
 0xa84   :  { %5353 = vpow2.f32 %v4822_v14 }
 0xa8c   :  { %v5352_v13 = vpop.eup %5351 }
 0xa8d   :  { %836 = vrot.lane.b32.xlu1 %v5352_v13, %s5614_s3 }
 0xa8e   :  { %v5354_v15 = vpop.eup %5353 }
 0xa8f   :  { %v827_v16 = vadd.f32 1.0, %v5354_v15 }
 0xa91   :  { %5355 = vrcp.f32 %v827_v16 }
 0xa9b   :  { %v5356_v17 = vpop.eup %5355 }
 0xa9c   :  { %v834_v21 = vmul.f32 %v5356_v17, %v832_v20 }
 0xaff   :  { %v837_v18 = vpop.permute.xlu1 %836 }
 0xb00   :  { %v839_v19 = vmul.f32 %v5356_v17, %v837_v18 }
 0xb02   :  { %841 = vrot.lane.b32.xlu0 %v839_v19, %s5615_s10 }
 0xb74   :  { %v842_v24 = vpop.permute.xlu0 %841 }
 0xb75   :  { %v844_v25 = vadd.f32 %v842_v24, %v834_v21 }
 0xb77   :  { %5357 = vtanh.f32 %v844_v25  ;;  %v938_v42 = vrot.slane %v844_v25, 6 }
 0xb81   :  { %v5358_v56 = vpop.eup %5357 }
 0xb82   :  { %847 = vrot.lane.b32.xlu1 %v5358_v56, %s5615_s10 }
 0xbf4   :  { %v848_v26 = vpop.permute.xlu1 %847 }
 0xbf5   :  { %v850_v27 = vmul.f32 %v5356_v17, %v848_v26 }
 0xbf7   :  { %v852_v29 = vrot.slane %v850_v27, 6 }
 0xbf9   :  { %v854_v30 = vadd.f32 %v852_v29, %v745_v5  ;;  %855 = vrot.lane.b32.xlu0 %v852_v29, %s5616_s29 }
 0xc6b   :  { %v856_v31 = vpop.permute.xlu0 %855 }
 0xc6c   :  { %5046 = vmatmul.mubr.msk.f32.vlgmr.msra.gmra.mrb[12].mxu0 %vm427_vm10, %v856_v31 }
 0xc6d   :  { %5235 = vmatpush3.bf16.msra.mxu0 %v5809_v28  ;;  %5059 = vmatprep.mubr.msk.f32.mxu0 %vm5612_vm0, %v7263_v11 }
 0xc6e   :  { %5239 = vmatprep.subr.bf16.mxu0 %v5611_v8 }
 0xd3f   :  { %v925_v32 = vpop.f32.mrb[12].mxu0 }
 0xd40   :  { %v929_v33 = vadd.f32 %v925_v32, %v5876_v60  ;;  %v5047_v34 = vpop.f32.mrb[13].mxu0 }
 0xd42   :  { %5359 = vtanh.f32 %v929_v33  ;;  %v4824_v36 = vmul.f32 -1.442695, %v929_v33 }
 0xd44   :  { %5361 = vpow2.f32 %v4824_v36 }
 0xd4c   :  { %v5360_v35 = vpop.eup %5359 }
 0xd4d   :  { %942 = vrot.lane.b32.xlu1 %v5360_v35, %s5614_s3 }
 0xd4e   :  { %v5362_v37 = vpop.eup %5361 }
 0xd4f   :  { %v933_v38 = vadd.f32 1.0, %v5362_v37 }
 0xd51   :  { %5363 = vrcp.f32 %v933_v38 }
 0xd5b   :  { %v5364_v39 = vpop.eup %5363 }
 0xd5c   :  { %v940_v43 = vmul.f32 %v5364_v39, %v938_v42 }
 0xdbf   :  { %v943_v40 = vpop.permute.xlu1 %942 }
 0xdc0   :  { %v945_v41 = vmul.f32 %v5364_v39, %v943_v40 }
 0xdc2   :  { %947 = vrot.lane.b32.xlu0 %v945_v41, %s5615_s10 }
 0xe34   :  { %v948_v44 = vpop.permute.xlu0 %947 }
 0xe35   :  { %v950_v45 = vadd.f32 %v948_v44, %v940_v43 }
 0xe37   :  { %5365 = vtanh.f32 %v950_v45  ;;  %v1045_v6 = vrot.slane %v950_v45, 6 }
 0xe41   :  { %v5366_v48 = vpop.eup %5365 }
 0xe42   :  { %953 = vrot.lane.b32.xlu1 %v5366_v48, %s5615_s10 }
 0xeb4   :  { %v954_v49 = vpop.permute.xlu1 %953 }
 0xeb5   :  { %v956_v52 = vmul.f32 %v5364_v39, %v954_v49 }
 0xeb7   :  { %v957_v53 = vadd.f32 %v956_v52, %v854_v30  ;;  %959 = vrot.lane.b32.xlu0 %v956_v52, %s5616_s29 }
 0xf29   :  { %v960_v54 = vpop.permute.xlu0 %959 }
 0xf2a   :  { %5053 = vmatmul.mubr.msk.f32.vlgmr.msra.gmra.mrb[12].mxu1 %vm427_vm10, %v960_v54 }
 0xf2b   :  { %5238 = vmatpush3.bf16.msra.mxu1 %v5809_v28  ;;  %5066 = vmatprep.mubr.msk.f32.mxu1 %vm5612_vm0, %v7263_v11 }
 0xf2c   :  { %5242 = vmatprep.subr.bf16.mxu1 %v5611_v8 }
 0xffd   :  { %v1029_v55 = vpop.f32.mrb[12].mxu1 }
 0xffe   :  { %v1034_v57 = vrot.slane %v1029_v55, 6  ;;  %v5054_v58 = vpop.f32.mrb[13].mxu1 }
0x1000   :  { %v1036_v59 = vadd.f32 %v1034_v57, %v5876_v60 }
0x1002   :  { %5367 = vtanh.f32 %v1036_v59  ;;  %v4826_v62 = vmul.f32 -1.442695, %v1036_v59 }
0x1004   :  { %5369 = vpow2.f32 %v4826_v62 }
0x100c   :  { %v5368_v61 = vpop.eup %5367 }
0x100d   :  { %1049 = vrot.lane.b32.xlu1 %v5368_v61, %s5614_s3 }
0x100e   :  { %v5370_v0 = vpop.eup %5369 }
0x100f   :  { %v1040_v1 = vadd.f32 1.0, %v5370_v0 }
0x1011   :  { %5371 = vrcp.f32 %v1040_v1 }
0x101b   :  { %v5372_v3 = vpop.eup %5371 }
0x101c   :  { %v1047_v7 = vmul.f32 %v5372_v3, %v1045_v6 }
0x107f   :  { %v1050_v4 = vpop.permute.xlu1 %1049 }
0x1080   :  { %v1052_v5 = vmul.f32 %v5372_v3, %v1050_v4 }
0x1082   :  { %1054 = vrot.lane.b32.xlu0 %v1052_v5, %s5615_s10 }
0x10f4   :  { %v1055_v9 = vpop.permute.xlu0 %1054 }
0x10f5   :  { %v1057_v10 = vadd.f32 %v1055_v9, %v1047_v7 }
0x10f7   :  { %5373 = vtanh.f32 %v1057_v10  ;;  %v1154_v31 = vrot.slane %v1057_v10, 6 }
0x1101   :  { %v5374_v12 = vpop.eup %5373 }
0x1102   :  { %1060 = vrot.lane.b32.xlu1 %v5374_v12, %s5615_s10 }
0x1174   :  { %v1061_v13 = vpop.permute.xlu1 %1060 }
0x1175   :  { %v1063_v14 = vmul.f32 %v5372_v3, %v1061_v13 }
0x1177   :  { %v1065_v15 = vrot.slane %v1063_v14, 2 }
0x1179   :  { %v1067_v16 = vadd.f32 %v1065_v15, %v957_v53  ;;  %1068 = vrot.lane.b32.xlu0 %v1065_v15, %s5616_s29 }
0x11eb   :  { %v1069_v17 = vpop.permute.xlu0 %1068 }
0x11ec   :  { %5060 = vmatmul.mubr.msk.f32.vlgmr.msra.gmra.mrb[14].mxu0 %vm427_vm10, %v1069_v17 }
0x11ed   :  { %5241 = vmatpush3.bf16.msra.mxu0 %v5809_v28  ;;  %5073 = vmatprep.mubr.msk.f32.mxu0 %vm5612_vm0, %v7263_v11 }
0x11ee   :  { %5245 = vmatprep.subr.bf16.mxu0 %v5611_v8 }
0x12bf   :  { %v1138_v18 = vpop.f32.mrb[14].mxu0 }
0x12c0   :  { %v1143_v19 = vrot.slane %v1138_v18, 4  ;;  %v5061_v20 = vpop.f32.mrb[15].mxu0 }
0x12c2   :  { %v1145_v21 = vadd.f32 %v1143_v19, %v5876_v60 }
0x12c4   :  { %5375 = vtanh.f32 %v1145_v21  ;;  %v4828_v25 = vmul.f32 -1.442695, %v1145_v21 }
0x12c6   :  { %5377 = vpow2.f32 %v4828_v25 }
0x12ce   :  { %v5376_v24 = vpop.eup %5375 }
0x12cf   :  { %1158 = vrot.lane.b32.xlu1 %v5376_v24, %s5614_s3 }
0x12d0   :  { %v5378_v56 = vpop.eup %5377 }
0x12d1   :  { %v1149_v26 = vadd.f32 1.0, %v5378_v56 }
0x12d3   :  { %5379 = vrcp.f32 %v1149_v26 }
0x12dd   :  { %v5380_v27 = vpop.eup %5379 }
0x12de   :  { %v1156_v32 = vmul.f32 %v5380_v27, %v1154_v31 }
0x1341   :  { %v1159_v29 = vpop.permute.xlu1 %1158 }
0x1342   :  { %v1161_v30 = vmul.f32 %v5380_v27, %v1159_v29 }
0x1344   :  { %1163 = vrot.lane.b32.xlu0 %v1161_v30, %s5615_s10 }
0x13b6   :  { %v1164_v33 = vpop.permute.xlu0 %1163 }
0x13b7   :  { %v1166_v34 = vadd.f32 %v1164_v33, %v1156_v32 }
0x13b9   :  { %5381 = vtanh.f32 %v1166_v34  ;;  %v1263_v55 = vrot.slane %v1166_v34, 6 }
0x13c3   :  { %v5382_v35 = vpop.eup %5381 }
0x13c4   :  { %1169 = vrot.lane.b32.xlu1 %v5382_v35, %s5615_s10 }
0x1436   :  { %v1170_v36 = vpop.permute.xlu1 %1169 }
0x1437   :  { %v1172_v37 = vmul.f32 %v5380_v27, %v1170_v36 }
0x1439   :  { %v1174_v38 = vrot.slane %v1172_v37, 4 }
0x143b   :  { %v1176_v39 = vadd.f32 %v1174_v38, %v1067_v16  ;;  %1177 = vrot.lane.b32.xlu0 %v1174_v38, %s5616_s29 }
0x14ad   :  { %v1178_v40 = vpop.permute.xlu0 %1177 }
0x14ae   :  { %5067 = vmatmul.mubr.msk.f32.vlgmr.msra.gmra.mrb[14].mxu1 %vm427_vm10, %v1178_v40 }
0x14af   :  { %5244 = vmatpush3.bf16.msra.mxu1 %v5809_v28  ;;  %5080 = vmatprep.mubr.msk.f32.mxu1 %vm5612_vm0, %v7263_v11 }
0x1581   :  { %v1247_v41 = vpop.f32.mrb[14].mxu1 }
0x1582   :  { %v1252_v42 = vrot.slane %v1247_v41, 2  ;;  %v5068_v43 = vpop.f32.mrb[15].mxu1 }
0x1583   :  { %v1503_v43 = vld [vmem:[%s7235_s12 + $0x8] sm:$0xff] }
0x1584   :  { %v1254_v44 = vadd.f32 %v1252_v42, %v5876_v60  ;;  %v1502_v42 = vld [vmem:[%s7235_s12] sm:$0xff]  ;;  %s5618_s12 = smov 112  }
0x1586   :  { %5383 = vtanh.f32 %v1254_v44  ;;  %v4830_v48 = vmul.f32 -1.442695, %v1254_v44  ;;  %v5246_v44 = vpack.c.bf16 %v1503_v43, %v1502_v42 }
0x1588   :  { %5385 = vpow2.f32 %v4830_v48 }
0x1590   :  { %v5384_v45 = vpop.eup %5383 }
0x1591   :  { %1267 = vrot.lane.b32.xlu1 %v5384_v45, %s5614_s3  ;;  %v1500_v45 = vld [vmem:[%s7234_s11] sm:$0xff] }
0x1592   :  { %v5386_v49 = vpop.eup %5385 }
0x1593   :  { %v1258_v52 = vadd.f32 1.0, %v5386_v49 }
0x1595   :  { %5387 = vrcp.f32 %v1258_v52 }
0x159f   :  { %v5388_v53 = vpop.eup %5387 }
0x15a0   :  { %v1265_v57 = vmul.f32 %v5388_v53, %v1263_v55 }
0x1603   :  { %v1268_v54 = vpop.permute.xlu1 %1267 }
0x1604   :  { %v1270_v28 = vmul.f32 %v5388_v53, %v1268_v54 }
0x1606   :  { %1272 = vrot.lane.b32.xlu0 %v1270_v28, %s5615_s10 }
0x1678   :  { %v1273_v58 = vpop.permute.xlu0 %1272 }
0x1679   :  { %v1275_v59 = vadd.f32 %v1273_v58, %v1265_v57 }
0x167b   :  { %5389 = vtanh.f32 %v1275_v59  ;;  %v1369_v16 = vrot.slane %v1275_v59, 6  ;;  %v1680_v59 = vld [vmem:[%s7237_s14] sm:$0xff] }
0x1685   :  { %v5390_v60 = vpop.eup %5389 }
0x1686   :  { %1278 = vrot.lane.b32.xlu1 %v5390_v60, %s5615_s10 }
0x16f8   :  { %v1279_v61 = vpop.permute.xlu1 %1278 }
0x16f9   :  { %v1281_v62 = vmul.f32 %v5388_v53, %v1279_v61 }
0x16fb   :  { %v1283_v0 = vrot.slane %v1281_v62, 6 }
0x16fd   :  { %v1285_v1 = vadd.f32 %v1283_v0, %v1176_v39  ;;  %1286 = vrot.lane.b32.xlu0 %v1283_v0, %s5616_s29  ;;  %v1682_v0 = vld [vmem:[%s7237_s14 + $0x10] sm:$0xff] }
0x176f   :  { %v1287_v3 = vpop.permute.xlu0 %1286 }
0x1770   :  { %5074 = vmatmul.mubr.msk.f32.vlgmr.msra.gmra.mrb[16].mxu0 %vm427_vm10, %v1287_v3 }
0x1771   :  { %5087 = vmatprep.mubr.msk.f32.mxu0 %vm5612_vm0, %v7263_v11  ;;  %5247 = vmatpush3.bf16.msra.mxu0 %v5246_v44 }
0x1772   :  { %5252 = vmatprep.subr.bf16.mxu0 %v5611_v8 }
0x1843   :  { %v1356_v4 = vpop.f32.mrb[16].mxu0 }
0x1844   :  { %v1360_v5 = vadd.f32 %v1356_v4, %v5878_v63  ;;  %v5075_v6 = vpop.f32.mrb[17].mxu0 }
0x1846   :  { %5391 = vtanh.f32 %v1360_v5  ;;  %v4832_v9 = vmul.f32 -1.442695, %v1360_v5 }
0x1848   :  { %5393 = vpow2.f32 %v4832_v9 }
0x1850   :  { %v5392_v7 = vpop.eup %5391 }
0x1851   :  { %1373 = vrot.lane.b32.xlu1 %v5392_v7, %s5614_s3 }
0x1852   :  { %v5394_v10 = vpop.eup %5393 }
0x1853   :  { %v1364_v12 = vadd.f32 1.0, %v5394_v10 }
0x1855   :  { %5395 = vrcp.f32 %v1364_v12 }
0x185f   :  { %v5396_v13 = vpop.eup %5395 }
0x1860   :  { %v1371_v17 = vmul.f32 %v5396_v13, %v1369_v16 }
0x18c3   :  { %v1374_v14 = vpop.permute.xlu1 %1373 }
0x18c4   :  { %v1376_v15 = vmul.f32 %v5396_v13, %v1374_v14 }
0x18c6   :  { %1378 = vrot.lane.b32.xlu0 %v1376_v15, %s5615_s10 }
0x1938   :  { %v1379_v18 = vpop.permute.xlu0 %1378 }
0x1939   :  { %v1381_v19 = vadd.f32 %v1379_v18, %v1371_v17 }
0x193b   :  { %5397 = vtanh.f32 %v1381_v19  ;;  %v1476_v38 = vrot.slane %v1381_v19, 6 }
0x1945   :  { %v5398_v20 = vpop.eup %5397 }
0x1946   :  { %1384 = vrot.lane.b32.xlu1 %v5398_v20, %s5615_s10 }
0x19b8   :  { %v1385_v21 = vpop.permute.xlu1 %1384 }
0x19b9   :  { %v1387_v24 = vmul.f32 %v5396_v13, %v1385_v21 }
0x19bb   :  { %v1388_v25 = vadd.f32 %v1387_v24, %v1285_v1  ;;  %1390 = vrot.lane.b32.xlu0 %v1387_v24, %s5616_s29 }
0x1a2d   :  { %v1391_v56 = vpop.permute.xlu0 %1390 }
0x1a2e   :  { %5081 = vmatmul.mubr.msk.f32.vlgmr.msra.gmra.mrb[16].mxu1 %vm427_vm10, %v1391_v56 }
0x1b01   :  { %v1460_v26 = vpop.f32.mrb[16].mxu1 }
0x1b02   :  { %v1465_v27 = vrot.slane %v1460_v26, 6  ;;  %v5082_v29 = vpop.f32.mrb[17].mxu1 }
0x1b04   :  { %v1467_v30 = vadd.f32 %v1465_v27, %v5878_v63 }
0x1b06   :  { %5399 = vtanh.f32 %v1467_v30  ;;  %v4834_v32 = vmul.f32 -1.442695, %v1467_v30 }
0x1b08   :  { %5401 = vpow2.f32 %v4834_v32 }
0x1b10   :  { %v5400_v31 = vpop.eup %5399 }
0x1b11   :  { %1480 = vrot.lane.b32.xlu1 %v5400_v31, %s5614_s3 }
0x1b12   :  { %v5402_v33 = vpop.eup %5401 }
0x1b13   :  { %v1471_v34 = vadd.f32 1.0, %v5402_v33 }
0x1b15   :  { %5403 = vrcp.f32 %v1471_v34 }
0x1b1f   :  { %v5404_v35 = vpop.eup %5403 }
0x1b20   :  { %v1478_v39 = vmul.f32 %v5404_v35, %v1476_v38 }
0x1b83   :  { %v1481_v36 = vpop.permute.xlu1 %1480 }
0x1b84   :  { %v1483_v37 = vmul.f32 %v5404_v35, %v1481_v36 }
0x1b86   :  { %1485 = vrot.lane.b32.xlu0 %v1483_v37, %s5615_s10 }
0x1bf8   :  { %v1486_v40 = vpop.permute.xlu0 %1485 }
0x1bf9   :  { %v1488_v41 = vadd.f32 %v1486_v40, %v1478_v39 }
0x1bfb   :  { %5405 = vtanh.f32 %v1488_v41 }
0x1c05   :  { %v5406_v63 = vpop.eup %5405 }
0x1c06   :  { %1491 = vrot.lane.b32.xlu1 %v5406_v63, %s5615_s10  ;;  %s5619_s10 = smov 32  }
0x1c0a   :  { %319 = vrot.lane.b32.xlu1 %v5868_v51, %s5617_s0  ;;  %v1501_v51 = vld [vmem:[%s7234_s11 + $0x8] sm:$0xff] }
0x1c0b   :  { %v5248_v48 = vpack.c.bf16 %v1501_v51, %v1500_v45 }
0x1c0d   :  { %5249 = vmatprep.subr.bf16.mxu1 %v5248_v48 }
0x1c0e   :  { %5251 = vmatpush3.bf16.msra.mxu1 %v5248_v48 }
0x1c0f   :  { %5258 = vmatprep.subr.bf16.mxu1 %v5611_v8 }
0x1c78   :  { %v1492_v49 = vpop.permute.xlu1 %1491 }
0x1c79   :  { %v1494_v52 = vmul.f32 %v5404_v35, %v1492_v49 }
0x1c7b   :  { %v1496_v53 = vrot.slane %v1494_v52, 2  ;;  %1684 = vrot.lane.b32.xlu1 %v1494_v52, %s5616_s29 }
0x1c7c   :  { %v320_v54 = vpop.permute.xlu1 %319 }
0x1c7d   :  { %v326_v28 = vsel %vm325_vm9, %v5861_v47, %v320_v54  ;;  %v1498_v55 = vadd.f32 %v1496_v53, %v1388_v25  ;;  %v1681_v47 = vld [vmem:[%s7237_s14 + $0x8] sm:$0xff] }
0x1c7e   :  { %5094 = vmatprep.mubr.msk.f32.mxu1 %vm427_vm10, %v326_v28  ;;  %v5997_v61 = vpack.c.bf16 %v1681_v47, %v1680_v59 }
0x1c7f   :  { %1692 = vrot.lane.b32.xlu1 %v1488_v41, %s5618_s12  ;;  %v1499_v57 = vmul.f32 0.1, %v1498_v55 }
0x1c81   :  { %1512 = vrot.lane.b32.xlu0 %v1499_v57, %s5616_s29 }
0x1c85   :  { %321 = vrot.lane.b32.xlu0 %v5866_v50, %s5617_s0  ;;  %v1683_v50 = vld [vmem:[%s7237_s14 + $0x18] sm:$0xff] }
0x1c86   :  { %v6009_v4 = vpack.c.bf16 %v1683_v50, %v1682_v0 }
0x1c89   :  { %1687 = vrot.lane.b32.xlu0 %v1494_v52, %s5618_s12  ;;  %s5540_s12 = scalar_lea.vmem %s4772_s6, 32 }
0x1c8a   :  { %p5541_p0 = scmp.ne.s32.totalorder %s4772_s6, %s5540_s12  ;;  %p5546_p2 = scmp.lt.s32.totalorder %s5540_s12, %s5540_s12 }
0x1c8c   :  { %p5547_p3 = por %p5546_p2, %p5545_p1 }
0x1c8e   :  { %p5548_p4 = pnand %p5547_p3, %p5541_p0 }
0x1ced   :  { %v1685_v58 = vpop.permute.xlu1 %1684 }
0x1cf1   :  { %v1693_v60 = vpop.permute.xlu1 %1692 }
0x1cf2   :  { %v1695_v62 = vsel %vm427_vm10, %v1693_v60, %v1488_v41 }
0x1cf3   :  { %v1779_v1 = vrot.slane %v1695_v62, 2  ;;  %v1513_v3 = vpop.permute.xlu0 %1512 }
0x1cf4   :  { %5088 = vmatmul.mubr.msk.f32.vlgmr.msra.gmra.mrb[18].mxu0 %vm427_vm10, %v1513_v3 }
0x1cf5   :  { %1780 = vrot.lane.b32.xlu1 %v1779_v1, %s5619_s10  ;;  %5254 = vmatpush3.bf16.msra.mxu0 %v5997_v61 }
0x1cf6   :  { %5255 = vmatprep.subr.bf16.mxu0 %v5611_v8  ;;  %5105 = vmatprep.mubr.msk.f32.mxu0 %vm5612_vm0, %v7263_v11 }
0x1cf7   :  { %v322_v5 = vpop.permute.xlu0 %321 }
0x1cf8   :  { %v327_v6 = vsel %vm325_vm9, %v5857_v46, %v322_v5  ;;  %v4835_v46 = vld [vmem:[%s7236_s13] ss:$0 sm:$0xff]  ;;  %s5620_s13 = smov 64  }
0x1cf9   :  { %5095 = vmatmul.mubr.msk.f32.vlgmr.msra.gmra.mrb[18].mxu1 %vm427_vm10, %v327_v6  ;;  %5257 = vmatpush3.bf16.msra.mxu0 %v6009_v4 }
0x1cfa   :  { %5260 = vmatpush3.bf16.msra.mxu1 %v5997_v61  ;;  %5116 = vmatprep.mubr.msk.f32.mxu1 %vm5612_vm0, %v7263_v11 }
0x1cfb   :  { %v1688_v7 = vpop.permute.xlu0 %1687  ;;  %5261 = vmatprep.subr.bf16.mxu1 %v5611_v8  ;;  %5264 = vmatprep.subr.bf16.mxu0 %v5611_v8 }
0x1cfc   :  { %v1690_v9 = vsel %vm427_vm10, %v1685_v58, %v1688_v7 }
0x1cfd   :  { %v1697_v10 = vrot.slane %v1690_v9, 2 }
0x1cfe   :  { %5263 = vmatpush3.bf16.msra.mxu1 %v6009_v4 }
0x1cff   :  { %5106 = vmatmul.mubr.msk.f32.vlgmr.msra.gmra.mrb[20].mxu0 %vm98_vm1, %v1697_v10  ;;  %5270 = vmatprep.subr.bf16.mxu1 %v5611_v8 }
0x1d00   :  { %5266 = vmatpush3.bf16.msra.mxu0 %v5997_v61  ;;  %5127 = vmatprep.mubr.msk.f32.mxu0 %vm5612_vm0, %v7263_v11 }
0x1d01   :  { %5267 = vmatprep.subr.bf16.mxu0 %v5611_v8 }
0x1d04   :  { %5269 = vmatpush3.bf16.msra.mxu0 %v6009_v4 }
0x1d05   :  { %5276 = vmatprep.subr.bf16.mxu0 %v5611_v8 }
0x1d67   :  { %v1781_v37 = vpop.permute.xlu1 %1780 }
0x1dc7   :  { %v1582_v12 = vpop.f32.mrb[18].mxu0 }
0x1dc8   :  { %v1583_v13 = vadd.f32 %v4835_v46, %v1582_v12  ;;  %v5089_v14 = vpop.f32.mrb[19].mxu0 }
0x1dca   :  { %v1587_v15 = vrot.slane %v1583_v13, 6  ;;  %v1589_v16 = vrot.slane %v1583_v13, 4  ;;  %v1591_v17 = vrot.slane %v1583_v13, 2 }
0x1dcc   :  { %v1594_v18 = vsel %vm1593_vm11, %v1583_v13, %v1587_v15  ;;  %v5096_v19 = vpop.f32.mrb[18].mxu1 }
0x1dcd   :  { %v1596_v20 = vsel %vm1595_vm12, %v1594_v18, %v1589_v16  ;;  %v1671_v21 = vpop.f32.mrb[19].mxu1  ;;  %vm2840_vm12 = vcmask 1041409  }
0x1dce   :  { %v1598_v24 = vsel %vm1597_vm13, %v1596_v20, %v1591_v17 }
0x1dcf   :  { %v6037_v25 = vadd.f32 %v5096_v19, %v1598_v24  ;;  %v6039_v56 = vadd.f32 %v1671_v21, %v1598_v24 }
0x1dd2   :  { %v1766_v26 = vpop.f32.mrb[20].mxu0 }
0x1dd3   :  { %v1770_v27 = vadd.f32 %v1766_v26, %v6039_v56  ;;  %v5107_v29 = vpop.f32.mrb[21].mxu0 }
0x1dd5   :  { %5407 = vtanh.f32 %v1770_v27  ;;  %v4840_v31 = vmul.f32 -1.442695, %v1770_v27 }
0x1dd7   :  { %5409 = vpow2.f32 %v4840_v31 }
0x1ddf   :  { %v5408_v30 = vpop.eup %5407 }
0x1de0   :  { %1785 = vrot.lane.b32.xlu0 %v5408_v30, %s5619_s10 }
0x1de1   :  { %v5410_v32 = vpop.eup %5409 }
0x1de2   :  { %v1774_v33 = vadd.f32 1.0, %v5410_v32 }
0x1de4   :  { %5411 = vrcp.f32 %v1774_v33 }
0x1dee   :  { %v5412_v34 = vpop.eup %5411 }
0x1def   :  { %v1783_v38 = vmul.f32 %v5412_v34, %v1781_v37 }
0x1e52   :  { %v1786_v35 = vpop.permute.xlu0 %1785 }
0x1e53   :  { %v1788_v36 = vmul.f32 %v5412_v34, %v1786_v35 }
0x1e55   :  { %1790 = vrot.lane.b32.xlu0 %v1788_v36, %s5619_s10 }
0x1ec7   :  { %v1791_v39 = vpop.permute.xlu0 %1790 }
0x1ec8   :  { %v1793_v40 = vadd.f32 %v1791_v39, %v1783_v38 }
0x1eca   :  { %5413 = vtanh.f32 %v1793_v40  ;;  %v1892_v58 = vrot.slane %v1793_v40, 6 }
0x1ed4   :  { %v5414_v41 = vpop.eup %5413 }
0x1ed5   :  { %1796 = vrot.lane.b32.xlu1 %v5414_v41, %s5619_s10 }
0x1f47   :  { %v1797_v63 = vpop.permute.xlu1 %1796 }
0x1f48   :  { %v1799_v42 = vmul.f32 %v5412_v34, %v1797_v63 }
0x1f4a   :  { %1801 = vrot.lane.b32.xlu0 %v1799_v42, %s5620_s13 }
0x1fbc   :  { %v1802_v43 = vpop.permute.xlu0 %1801 }
0x1fbd   :  { %5117 = vmatmul.mubr.msk.f32.vlgmr.msra.gmra.mrb[20].mxu1 %vm98_vm1, %v1802_v43  ;;  %1805 = vst.msk [vmem:[#allocation2] sm:$0x3] %vm1804_vm14, %v1802_v43 }
0x1fbe   :  { %1807 = vst.msk [vmem:[#allocation2 + $0xe] sm:$0x3] %vm1806_vm15, %v1802_v43  ;;  %5272 = vmatpush3.bf16.msra.mxu1 %v5997_v61  ;;  %5138 = vmatprep.mubr.msk.f32.mxu1 %vm5612_vm0, %v7263_v11 }
0x1fbf   :  { %5273 = vmatprep.subr.bf16.mxu1 %v5611_v8 }
0x1fc2   :  { %5275 = vmatpush3.bf16.msra.mxu1 %v6009_v4 }
0x1fc3   :  { %5282 = vmatprep.subr.bf16.mxu1 %v5611_v8 }
0x2090   :  { %v1876_v44 = vpop.f32.mrb[20].mxu1 }
0x2091   :  { %v1881_v45 = vrot.slane %v1876_v44, 6  ;;  %v5118_v51 = vpop.f32.mrb[21].mxu1 }
0x2093   :  { %v1883_v48 = vadd.f32 %v1881_v45, %v6039_v56 }
0x2095   :  { %5415 = vtanh.f32 %v1883_v48  ;;  %v4842_v52 = vmul.f32 -1.442695, %v1883_v48 }
0x2097   :  { %5417 = vpow2.f32 %v4842_v52 }
0x209f   :  { %v5416_v49 = vpop.eup %5415 }
0x20a0   :  { %1896 = vrot.lane.b32.xlu1 %v5416_v49, %s5619_s10 }
0x20a1   :  { %v5418_v53 = vpop.eup %5417 }
0x20a2   :  { %v1887_v54 = vadd.f32 1.0, %v5418_v53 }
0x20a4   :  { %5419 = vrcp.f32 %v1887_v54 }
0x20ae   :  { %v5420_v28 = vpop.eup %5419 }
0x20af   :  { %v1894_v59 = vmul.f32 %v5420_v28, %v1892_v58 }
0x2112   :  { %v1897_v55 = vpop.permute.xlu1 %1896 }
0x2113   :  { %v1899_v57 = vmul.f32 %v5420_v28, %v1897_v55 }
0x2115   :  { %1901 = vrot.lane.b32.xlu0 %v1899_v57, %s5619_s10 }
0x2187   :  { %v1902_v47 = vpop.permute.xlu0 %1901 }
0x2188   :  { %v1904_v60 = vadd.f32 %v1902_v47, %v1894_v59 }
0x218a   :  { %5421 = vtanh.f32 %v1904_v60  ;;  %v2006_v17 = vrot.slane %v1904_v60, 6 }
0x2194   :  { %v5422_v62 = vpop.eup %5421 }
0x2195   :  { %1907 = vrot.lane.b32.xlu1 %v5422_v62, %s5619_s10 }
0x2207   :  { %v1908_v0 = vpop.permute.xlu1 %1907 }
0x2208   :  { %v6059_v50 = vmul.f32 %v5420_v28, %v1908_v0 }
0x220a   :  { %v1919_v1 = vrot.slane %v6059_v50, 2 }
0x220c   :  { %1920 = vrot.lane.b32.xlu0 %v1919_v1, %s5620_s13 }
0x227e   :  { %v1921_v3 = vpop.permute.xlu0 %1920 }
0x227f   :  { %5128 = vmatmul.mubr.msk.f32.vlgmr.msra.gmra.mrb[22].mxu0 %vm98_vm1, %v1921_v3 }
0x2280   :  { %5278 = vmatpush3.bf16.msra.mxu0 %v5997_v61  ;;  %5149 = vmatprep.mubr.msk.f32.mxu0 %vm5612_vm0, %v7263_v11 }
0x2281   :  { %5279 = vmatprep.subr.bf16.mxu0 %v5611_v8 }
0x2284   :  { %5281 = vmatpush3.bf16.msra.mxu0 %v6009_v4 }
0x2285   :  { %5288 = vmatprep.subr.bf16.mxu0 %v5611_v8 }
0x2352   :  { %v1990_v5 = vpop.f32.mrb[22].mxu0 }
0x2353   :  { %v1995_v6 = vrot.slane %v1990_v5, 4  ;;  %v5129_v7 = vpop.f32.mrb[23].mxu0 }
0x2355   :  { %v1997_v9 = vadd.f32 %v1995_v6, %v6039_v56 }
0x2357   :  { %5423 = vtanh.f32 %v1997_v9  ;;  %v4844_v46 = vmul.f32 -1.442695, %v1997_v9 }
0x2359   :  { %5425 = vpow2.f32 %v4844_v46 }
0x2361   :  { %v5424_v10 = vpop.eup %5423 }
0x2362   :  { %2010 = vrot.lane.b32.xlu1 %v5424_v10, %s5619_s10 }
0x2363   :  { %v5426_v12 = vpop.eup %5425 }
0x2364   :  { %v2001_v13 = vadd.f32 1.0, %v5426_v12 }
0x2366   :  { %5427 = vrcp.f32 %v2001_v13 }
0x2370   :  { %v5428_v14 = vpop.eup %5427 }
0x2371   :  { %v2008_v18 = vmul.f32 %v5428_v14, %v2006_v17 }
0x23d4   :  { %v2011_v15 = vpop.permute.xlu1 %2010 }
0x23d5   :  { %v2013_v16 = vmul.f32 %v5428_v14, %v2011_v15 }
0x23d7   :  { %2015 = vrot.lane.b32.xlu0 %v2013_v16, %s5619_s10 }
0x2449   :  { %v2016_v19 = vpop.permute.xlu0 %2015 }
0x244a   :  { %v2018_v20 = vadd.f32 %v2016_v19, %v2008_v18 }
0x244c   :  { %5429 = vtanh.f32 %v2018_v20  ;;  %v2120_v41 = vrot.slane %v2018_v20, 6 }
0x2456   :  { %v5430_v21 = vpop.eup %5429 }
0x2457   :  { %2021 = vrot.lane.b32.xlu1 %v5430_v21, %s5619_s10 }
0x24c9   :  { %v2022_v24 = vpop.permute.xlu1 %2021 }
0x24ca   :  { %v6074_v26 = vmul.f32 %v5428_v14, %v2022_v24 }
0x24cc   :  { %v2033_v27 = vrot.slane %v6074_v26, 4 }
0x24ce   :  { %2034 = vrot.lane.b32.xlu0 %v2033_v27, %s5620_s13 }
0x2540   :  { %v2035_v29 = vpop.permute.xlu0 %2034 }
0x2541   :  { %5139 = vmatmul.mubr.msk.f32.vlgmr.msra.gmra.mrb[22].mxu1 %vm98_vm1, %v2035_v29 }
0x2542   :  { %5284 = vmatpush3.bf16.msra.mxu1 %v5997_v61  ;;  %5160 = vmatprep.mubr.msk.f32.mxu1 %vm5612_vm0, %v7263_v11 }
0x2543   :  { %5285 = vmatprep.subr.bf16.mxu1 %v5611_v8 }
0x2546   :  { %5287 = vmatpush3.bf16.msra.mxu1 %v6009_v4 }
0x2547   :  { %5294 = vmatprep.subr.bf16.mxu1 %v5611_v8 }
0x2614   :  { %v2104_v30 = vpop.f32.mrb[22].mxu1 }
0x2615   :  { %v2109_v31 = vrot.slane %v2104_v30, 2  ;;  %v5140_v32 = vpop.f32.mrb[23].mxu1 }
0x2617   :  { %v2111_v33 = vadd.f32 %v2109_v31, %v6039_v56 }
0x2619   :  { %5431 = vtanh.f32 %v2111_v33  ;;  %v4846_v35 = vmul.f32 -1.442695, %v2111_v33 }
0x261b   :  { %5433 = vpow2.f32 %v4846_v35 }
0x2623   :  { %v5432_v34 = vpop.eup %5431 }
0x2624   :  { %2124 = vrot.lane.b32.xlu1 %v5432_v34, %s5619_s10 }
0x2625   :  { %v5434_v36 = vpop.eup %5433 }
0x2626   :  { %v2115_v37 = vadd.f32 1.0, %v5434_v36 }
0x2628   :  { %5435 = vrcp.f32 %v2115_v37 }
0x2632   :  { %v5436_v38 = vpop.eup %5435 }
0x2633   :  { %v2122_v63 = vmul.f32 %v5436_v38, %v2120_v41 }
0x2696   :  { %v2125_v39 = vpop.permute.xlu1 %2124 }
0x2697   :  { %v2127_v40 = vmul.f32 %v5436_v38, %v2125_v39 }
0x2699   :  { %2129 = vrot.lane.b32.xlu0 %v2127_v40, %s5619_s10 }
0x270b   :  { %v2130_v42 = vpop.permute.xlu0 %2129 }
0x270c   :  { %v2132_v43 = vadd.f32 %v2130_v42, %v2122_v63 }
0x270e   :  { %5437 = vtanh.f32 %v2132_v43  ;;  %v2231_v60 = vrot.slane %v2132_v43, 6 }
0x2718   :  { %v5438_v56 = vpop.eup %5437 }
0x2719   :  { %2135 = vrot.lane.b32.xlu1 %v5438_v56, %s5619_s10 }
0x278b   :  { %v2136_v44 = vpop.permute.xlu1 %2135 }
0x278c   :  { %v6089_v45 = vmul.f32 %v5436_v38, %v2136_v44 }
0x278e   :  { %v2147_v51 = vrot.slane %v6089_v45, 6 }
0x2790   :  { %2148 = vrot.lane.b32.xlu0 %v2147_v51, %s5620_s13 }
0x2802   :  { %v2149_v48 = vpop.permute.xlu0 %2148 }
0x2803   :  { %5150 = vmatmul.mubr.msk.f32.vlgmr.msra.gmra.mrb[24].mxu0 %vm98_vm1, %v2149_v48 }
0x2804   :  { %5290 = vmatpush3.bf16.msra.mxu0 %v5997_v61  ;;  %5171 = vmatprep.mubr.msk.f32.mxu0 %vm5612_vm0, %v7263_v11 }
0x2805   :  { %5291 = vmatprep.subr.bf16.mxu0 %v5611_v8 }
0x2808   :  { %5293 = vmatpush3.bf16.msra.mxu0 %v6009_v4 }
0x28d6   :  { %v2218_v49 = vpop.f32.mrb[24].mxu0 }
0x28d7   :  { %v2222_v52 = vadd.f32 %v2218_v49, %v6037_v25  ;;  %v5151_v53 = vpop.f32.mrb[25].mxu0 }
0x28d9   :  { %5439 = vtanh.f32 %v2222_v52  ;;  %v4848_v28 = vmul.f32 -1.442695, %v2222_v52 }
0x28db   :  { %5441 = vpow2.f32 %v4848_v28 }
0x28e3   :  { %v5440_v54 = vpop.eup %5439 }
0x28e4   :  { %2235 = vrot.lane.b32.xlu1 %v5440_v54, %s5619_s10 }
0x28e5   :  { %v5442_v55 = vpop.eup %5441 }
0x28e6   :  { %v2226_v57 = vadd.f32 1.0, %v5442_v55 }
0x28e8   :  { %5443 = vrcp.f32 %v2226_v57 }
0x28f2   :  { %v5444_v58 = vpop.eup %5443 }
0x28f3   :  { %v2233_v62 = vmul.f32 %v5444_v58, %v2231_v60 }
0x2956   :  { %v2236_v59 = vpop.permute.xlu1 %2235 }
0x2957   :  { %v2238_v47 = vmul.f32 %v5444_v58, %v2236_v59 }
0x2959   :  { %2240 = vrot.lane.b32.xlu0 %v2238_v47, %s5619_s10 }
0x29cb   :  { %v2241_v0 = vpop.permute.xlu0 %2240 }
0x29cc   :  { %v2243_v1 = vadd.f32 %v2241_v0, %v2233_v62 }
0x29ce   :  { %5445 = vtanh.f32 %v2243_v1 }
0x29d8   :  { %v5446_v3 = vpop.eup %5445 }
0x29d9   :  { %2246 = vrot.lane.b32.xlu1 %v5446_v3, %s5619_s10 }
0x2a4b   :  { %v2247_v5 = vpop.permute.xlu1 %2246 }
0x2a4c   :  { %v2249_v6 = vmul.f32 %v5444_v58, %v2247_v5 }
0x2a4e   :  { %2251 = vrot.lane.b32.xlu0 %v2249_v6, %s5620_s13 }
0x2ac0   :  { %v6104_v7 = vpop.permute.xlu0 %2251 }
0x2ac1   :  { %5161 = vmatmul.mubr.msk.f32.vlgmr.msra.gmra.mrb[24].mxu1 %vm98_vm1, %v6104_v7 }
0x2ac2   :  { %5296 = vmatpush3.bf16.msra.mxu1 %v5997_v61  ;;  %5182 = vmatprep.mubr.msk.f32.mxu1 %vm5612_vm0, %v7263_v11  ;;  %vm1915_vm0 = vcmask 125954  }
0x2ac3   :  { %5297 = vmatprep.subr.bf16.mxu1 %v5611_v8  ;;  %v2340_v8 = vrot.slane %v2243_v1, 6 }
0x2ac6   :  { %5299 = vmatpush3.bf16.msra.mxu1 %v6009_v4 }
0x2b94   :  { %v2324_v9 = vpop.f32.mrb[24].mxu1 }
0x2b95   :  { %v2329_v10 = vrot.slane %v2324_v9, 6  ;;  %v5162_v46 = vpop.f32.mrb[25].mxu1 }
0x2b96   :  { %v2592_v46 = vld [vmem:[%s7238_s15 + $0x8] sm:$0xff] }
0x2b97   :  { %v2331_v12 = vadd.f32 %v2329_v10, %v6037_v25 }
0x2b99   :  { %5447 = vtanh.f32 %v2331_v12  ;;  %v4850_v14 = vmul.f32 -1.442695, %v2331_v12 }
0x2b9b   :  { %5449 = vpow2.f32 %v4850_v14 }
0x2ba3   :  { %v5448_v13 = vpop.eup %5447 }
0x2ba4   :  { %2344 = vrot.lane.b32.xlu1 %v5448_v13, %s5619_s10  ;;  %v2593_v13 = vld [vmem:[%s7238_s15 + $0x10] sm:$0xff] }
0x2ba5   :  { %v5450_v15 = vpop.eup %5449 }
0x2ba6   :  { %v2335_v61 = vadd.f32 1.0, %v5450_v15 }
0x2ba8   :  { %5451 = vrcp.f32 %v2335_v61 }
0x2bb2   :  { %v5452_v16 = vpop.eup %5451 }
0x2bb3   :  { %v2342_v4 = vmul.f32 %v5452_v16, %v2340_v8 }
0x2c16   :  { %v2345_v17 = vpop.permute.xlu1 %2344 }
0x2c17   :  { %v2347_v18 = vmul.f32 %v5452_v16, %v2345_v17 }
0x2c19   :  { %2349 = vrot.lane.b32.xlu0 %v2347_v18, %s5619_s10 }
0x2c8b   :  { %v2350_v19 = vpop.permute.xlu0 %2349 }
0x2c8c   :  { %v2352_v20 = vadd.f32 %v2350_v19, %v2342_v4  ;;  %v6178_v19 = vld [vmem:[%s7241_s18] sm:$0xff] }
0x2c8d   :  { %5196 = vmatprep.subr.mxu1 %v6178_v19 }
0x2c8e   :  { %5453 = vtanh.f32 %v2352_v20  ;;  %v2452_v63 = vrot.slane %v2352_v20, 6  ;;  %v6184_v20 = vld [vmem:[%s7239_s16] ss:$0 sm:$0xff] }
0x2c98   :  { %v5454_v21 = vpop.eup %5453 }
0x2c99   :  { %2355 = vrot.lane.b32.xlu1 %v5454_v21, %s5619_s10 }
0x2d0b   :  { %v2356_v24 = vpop.permute.xlu1 %2355 }
0x2d0c   :  { %v6117_v27 = vmul.f32 %v5452_v16, %v2356_v24  ;;  %v6188_v24 = vshrl.u32 %v71_v22, 7 }
0x2d0e   :  { %v2365_v29 = vrot.slane %v6117_v27, 2  ;;  %7284 = vst [vmem:[#allocation11_spill] sm:$0xff] %v6188_v24 }
0x2d10   :  { %2366 = vrot.lane.b32.xlu0 %v2365_v29, %s5620_s13 }
0x2d82   :  { %v2367_v30 = vpop.permute.xlu0 %2366 }
0x2d83   :  { %5172 = vmatmul.mubr.msk.f32.vlgmr.msra.gmra.mrb[26].mxu0 %vm98_vm1, %v2367_v30 }
0x2e56   :  { %v2436_v31 = vpop.f32.mrb[26].mxu0 }
0x2e57   :  { %v2441_v32 = vrot.slane %v2436_v31, 4  ;;  %v5173_v33 = vpop.f32.mrb[27].mxu0  ;;  %v6196_v31 = vld [vmem:[%s7240_s17] ss:$0 sm:$0xff] }
0x2e58   :  { %v6199_v33 = vsub.s32 0, %v6188_v24 }
0x2e59   :  { %v2443_v34 = vadd.f32 %v2441_v32, %v6037_v25 }
0x2e5b   :  { %5455 = vtanh.f32 %v2443_v34  ;;  %v4852_v36 = vmul.f32 -1.442695, %v2443_v34  ;;  %v2783_v34 = vsub.s32 1, %v6188_v24 }
0x2e5d   :  { %5457 = vpow2.f32 %v4852_v36 }
0x2e65   :  { %v5456_v35 = vpop.eup %5455 }
0x2e66   :  { %2456 = vrot.lane.b32.xlu1 %v5456_v35, %s5619_s10 }
0x2e67   :  { %v5458_v37 = vpop.eup %5457 }
0x2e68   :  { %v2447_v38 = vadd.f32 1.0, %v5458_v37  ;;  %v5621_v37 = vmov 1966171168  }
0x2e6a   :  { %5459 = vrcp.f32 %v2447_v38  ;;  %v2753_v38 = vunpack.c.l.s4 %v5621_v37 }
0x2e74   :  { %v5460_v39 = vpop.eup %5459 }
0x2e75   :  { %v2454_v42 = vmul.f32 %v5460_v39, %v2452_v63 }
0x2ed8   :  { %v2457_v40 = vpop.permute.xlu1 %2456 }
0x2ed9   :  { %v2459_v41 = vmul.f32 %v5460_v39, %v2457_v40 }
0x2edb   :  { %2461 = vrot.lane.b32.xlu0 %v2459_v41, %s5619_s10  ;;  %v5622_v41 = vmov -10000.0  }
0x2edc   :  { %v6222_v63 = vsel %vm2749_vm7, 0.0, %v5622_v41 }
0x2f4d   :  { %v2462_v43 = vpop.permute.xlu0 %2461 }
0x2f4e   :  { %v2464_v56 = vadd.f32 %v2462_v43, %v2454_v42 }
0x2f50   :  { %5461 = vtanh.f32 %v2464_v56  ;;  %v2564_v1 = vrot.slane %v2464_v56, 6 }
0x2f5a   :  { %v5462_v44 = vpop.eup %5461 }
0x2f5b   :  { %2467 = vrot.lane.b32.xlu1 %v5462_v44, %s5619_s10 }
0x2fcd   :  { %v2468_v51 = vpop.permute.xlu1 %2467 }
0x2fce   :  { %v2470_v48 = vmul.f32 %v5460_v39, %v2468_v51  ;;  %v2754_v39 = vunpack.c.0.s8 %v2753_v38 }
0x2fd0   :  { %v2477_v49 = vrot.slane %v2470_v48, 4  ;;  %v6218_v40 = vsub.s32 %v2754_v39, %v6188_v24 }
0x2fd2   :  { %2478 = vrot.lane.b32.xlu0 %v2477_v49, %s5620_s13  ;;  %v2758_v42 = vrot.slane %v6222_v63, %v6218_v40 }
0x2fd4   :  { %v2759_v43 = vcombine.high %v2758_v42, %v2758_v42  ;;  %v2766_v44 = vrot.slane %v2758_v42, %v6218_v40 }
0x2fd6   :  { %v2773_v56 = vrot.slane %v2759_v43, %v6218_v40 }
0x2fd8   :  { %v6229_v51 = vrot.slane %v2773_v56, %v6199_v33 }
0x3044   :  { %v2479_v52 = vpop.permute.xlu0 %2478 }
0x3045   :  { %5183 = vmatmul.mubr.msk.f32.vlgmr.msra.gmra.mrb[26].mxu1 %vm98_vm1, %v2479_v52 }
0x3046   :  { %5197 = vmatpush3.msra.mxu1 %v6178_v19 }
0x3118   :  { %v2548_v53 = vpop.f32.mrb[26].mxu1 }
0x3119   :  { %v2553_v54 = vrot.slane %v2548_v53, 2  ;;  %v5184_v28 = vpop.f32.mrb[27].mxu1 }
0x311b   :  { %v2555_v55 = vadd.f32 %v2553_v54, %v6037_v25  ;;  %v2595_v25 = vld [vmem:[%s7283_s30] sm:$0xff] }
0x311d   :  { %5463 = vtanh.f32 %v2555_v55  ;;  %v4854_v58 = vmul.f32 -1.442695, %v2555_v55 }
0x311f   :  { %5465 = vpow2.f32 %v4854_v58 }
0x3127   :  { %v5464_v57 = vpop.eup %5463 }
0x3128   :  { %2568 = vrot.lane.b32.xlu1 %v5464_v57, %s5619_s10 }
0x3129   :  { %v5466_v59 = vpop.eup %5465 }
0x312a   :  { %v2559_v47 = vadd.f32 1.0, %v5466_v59 }
0x312c   :  { %5467 = vrcp.f32 %v2559_v47 }
0x3136   :  { %v5468_v60 = vpop.eup %5467 }
0x3137   :  { %v2566_v3 = vmul.f32 %v5468_v60, %v2564_v1 }
0x319a   :  { %v2569_v62 = vpop.permute.xlu1 %2568 }
0x319b   :  { %v2571_v0 = vmul.f32 %v5468_v60, %v2569_v62 }
0x319d   :  { %2573 = vrot.lane.b32.xlu0 %v2571_v0, %s5619_s10 }
0x31a1   :  { %1912 = vrot.lane.b32.xlu0 %v6059_v50, %s5620_s13 }
0x31a5   :  { %2140 = vrot.lane.b32.xlu0 %v6089_v45, %s5620_s13 }
0x31a9   :  { %2472 = vrot.lane.b32.xlu0 %v2470_v48, %s5620_s13  ;;  %v6232_v48 = vrot.slane %v2766_v44, %v6199_v33 }
0x31ad   :  { %2600 = vperm.xlu0 %5325, %v2595_v25  }
0x320f   :  { %v2574_v5 = vpop.permute.xlu0 %2573 }
0x3210   :  { %v2576_v6 = vadd.f32 %v2574_v5, %v2566_v3 }
0x3212   :  { %5469 = vtanh.f32 %v2576_v6 }
0x3213   :  { %v1913_v9 = vpop.permute.xlu0 %1912 }
0x3214   :  { %1916 = vst.msk [vmem:[#allocation2] sm:$0xc] %vm1915_vm0, %v1913_v9 }
0x3215   :  { %1918 = vst.msk [vmem:[#allocation2 + $0xa] sm:$0xc] %vm1917_vm2, %v1913_v9  ;;  %v2948_v9 = vsub.s32 2, %v6188_v24 }
0x3217   :  { %v2141_v50 = vpop.permute.xlu0 %2140 }
0x3218   :  { %2144 = vst.msk [vmem:[#allocation2] sm:$0xc0] %vm2143_vm3, %v2141_v50 }
0x3219   :  { %2146 = vst.msk [vmem:[#allocation2 + $0x2] sm:$0xc0] %vm2145_vm4, %v2141_v50  ;;  %v6246_v50 = vld [vmem:[%s7285_s28] sm:$0xff] }
0x321a   :  { %2254 = vst.msk [vmem:[#allocation2 + $0x8] sm:$0x3] %vm1804_vm14, %v6104_v7  ;;  %7286 = vst [vmem:[#allocation12_spill] sm:$0xff] %v6246_v50  ;;  %vm2737_vm8 = vcmp.ne.s32.totalorder %v6246_v50, 0  ;;  %vm3008_vm14 = vcmask 1043459  }
0x321b   :  { %2255 = vst.msk [vmem:[#allocation2 + $0x6] sm:$0x3] %vm1806_vm15, %v6104_v7  ;;  %v2473_v45 = vpop.permute.xlu0 %2472  ;;  %v2591_v7 = vld [vmem:[%s7238_s15] sm:$0xff]  ;;  %vm3215_vm15 = vcmask 1045509  }
0x321c   :  { %v5470_v10 = vpop.eup %5469  ;;  %2475 = vst.msk [vmem:[#allocation2 + $0x8] sm:$0x30] %vm2029_vm5, %v2473_v45  ;;  %v5300_v12 = vpack.c.bf16 %v2592_v46, %v2591_v7  ;;  %v6264_v46 = vsel %vm2737_vm8, 1, %v5610_v2 }
0x321d   :  { %2476 = vst.msk [vmem:[#allocation2 - $0x2] sm:$0x30] %vm2031_vm6, %v2473_v45  ;;  %2579 = vrot.lane.b32.xlu1 %v5470_v10, %s5619_s10  ;;  %v2955_v10 = vsub.s32 3, %v6188_v24 }
0x321e   :  { %5301 = vmatprep.subr.bf16.mxu0 %v5300_v12 }
0x321f   :  { %5303 = vmatpush3.bf16.msra.mxu0 %v5300_v12 }
0x3221   :  { %2026 = vrot.lane.b32.xlu1 %v6074_v26, %s5620_s13  ;;  %v2594_v26 = vld [vmem:[%s7238_s15 + $0x18] sm:$0xff] }
0x3222   :  { %v5304_v14 = vpack.c.bf16 %v2594_v26, %v2593_v13 }
0x3224   :  { %5305 = vmatprep.subr.bf16.mxu0 %v5304_v14 }
0x3225   :  { %2360 = vrot.lane.b32.xlu1 %v6117_v27, %s5620_s13  ;;  %5307 = vmatpush3.bf16.msra.mxu0 %v5304_v14 }
0x322c   :  { %v2601_v21 = vpop.permute.xlu0 %2600 }
0x322d   :  { %v2614_v27 = vmul.f32 %v6184_v20, %v2601_v21 }
0x328f   :  { %v2580_v15 = vpop.permute.xlu1 %2579 }
0x3290   :  { %v2582_v61 = vmul.f32 %v5468_v60, %v2580_v15  ;;  %v6270_v15 = vsub.s32 %v5801_v23, %v6188_v24 }
0x3292   :  { %2584 = vrot.lane.b32.xlu1 %v2582_v61, %s5620_s13 }
0x3293   :  { %v2027_v16 = vpop.permute.xlu1 %2026 }
0x3294   :  { %2030 = vst.msk [vmem:[#allocation2] sm:$0x30] %vm2029_vm5, %v2027_v16 }
0x3295   :  { %2032 = vst.msk [vmem:[#allocation2 + $0x6] sm:$0x30] %vm2031_vm6, %v2027_v16 }
0x3297   :  { %v2361_v17 = vpop.permute.xlu1 %2360 }
0x3298   :  { %2363 = vst.msk [vmem:[#allocation2 + $0x8] sm:$0xc] %vm1915_vm0, %v2361_v17  ;;  %vm3423_vm0 = vcmask 1047559  }
0x3299   :  { %2364 = vst.msk [vmem:[#allocation2 + $0x2] sm:$0xc] %vm1917_vm2, %v2361_v17 }
0x3304   :  { %v2585_v18 = vpop.permute.xlu1 %2584 }
0x3305   :  { %2587 = vst.msk [vmem:[#allocation2 + $0x8] sm:$0xc0] %vm2143_vm3, %v2585_v18 }
0x3306   :  { %2588 = vst.msk [vmem:[#allocation2 - $0x6] sm:$0xc0] %vm2145_vm4, %v2585_v18 }
0x330c   :  { %v2590_v4 = vld [vmem:[#allocation2 + $0x8] sm:$0xff] }
0x330d   :  { %v2589_v8 = vld [vmem:[#allocation2] sm:$0xff] }
0x330e   :  { %5193 = vmatprep.mubr.msk.f32.mxu0 %vm98_vm1, %v2589_v8 }
0x330f   :  { %5194 = vmatmul.mubr.msk.f32.vlgmr.msra.gmra.mrb[28].mxu0 %vm98_vm1, %v2590_v4 }
0x33e2   :  { %v6191_v29 = vpop.f32.mrb[28].mxu0 }
0x33e3   :  { %v2688_v30 = vpop.f32.mrb[29].mxu0 }
0x33e4   :  { %v2689_v32 = vadd.f32 %v2688_v30, %v2614_v27 }
0x33e6   :  { %v6203_v35 = vadd.f32 %v6196_v31, %v2689_v32 }
0x33e8   :  { %v6208_v22 = vrot.slane %v6203_v35, %v2783_v34  ;;  %v6212_v36 = vrot.slane %v6203_v35, %v6199_v33  ;;  %v6251_v45 = vrot.slane %v6203_v35, %v2948_v9  ;;  %v6259_v7 = vrot.slane %v6203_v35, %v2955_v10 }
0x33ea   :  { %2786 = vbcast.lane.b32.xlu0 %v6208_v22, 256  ;;  %2779 = vbcast.lane.b32.xlu1 %v6212_v36, 256 }
0x345c   :  { %v2787_v49 = vpop.permute.xlu0 %2786  ;;  %v2780_v52 = vpop.permute.xlu1 %2779 }
0x345d   :  { %v2799_v53 = vadd.f32 %v6229_v51, %v2787_v49  ;;  %v2798_v54 = vadd.f32 %v6232_v48, %v2780_v52 }
0x345f   :  { %v2801_v28 = vadd.f32 %v2799_v53, %v6178_v19  ;;  %v2800_v55 = vadd.f32 %v2798_v54, %v6178_v19 }
0x3461   :  { %v2805_v57 = vsel %vm325_vm9, %v2801_v28, -inf  ;;  %v2802_v58 = vsel %vm325_vm9, %v2800_v55, -inf }
0x3462   :  { %2806 = vmax.xlane.f32.xlu0 %v2805_v57  ;;  %2803 = vmax.xlane.f32.xlu1 %v2802_v58 }
0x34ef   :  { %v2807_v59 = vpop.xlane.xlu0 %2806  ;;  %v2804_v47 = vpop.xlane.xlu1 %2803 }
0x34f0   :  { %v2809_v60 = vsub.f32 %v2801_v28, %v2807_v59  ;;  %v2808_v62 = vsub.f32 %v2800_v55, %v2804_v47  ;;  %v3155_v55 = vsub.s32 4, %v6188_v24 }
0x34f2   :  { %v2812_v0 = vmul.f32 1.442695, %v2809_v60  ;;  %v2810_v25 = vmul.f32 1.442695, %v2808_v62  ;;  %v6294_v57 = vrot.slane %v6203_v35, %v3155_v55 }
0x34f4   :  { %5471 = vpow2.f32 %v2812_v0 }
0x34f5   :  { %5473 = vpow2.f32 %v2810_v25 }
0x34fe   :  { %v5472_v1 = vpop.eup %5471 }
0x34ff   :  { %v5474_v3 = vpop.eup %5473  ;;  %v2817_v5 = vsel %vm325_vm9, %v5472_v1, 0.0 }
0x3500   :  { %2818 = vadd.xlane.f32.xlu1 %v2817_v5  ;;  %v2814_v6 = vsel %vm325_vm9, %v5474_v3, 0.0 }
0x3501   :  { %2815 = vadd.xlane.f32.xlu0 %v2814_v6  ;;  %v3162_v6 = vsub.s32 5, %v6188_v24 }
0x3511   :  { %2951 = vbcast.lane.b32.xlu1 %v6251_v45, 256 }
0x3515   :  { %2958 = vbcast.lane.b32.xlu1 %v6259_v7, 256 }
0x3517   :  { %2827 = vperm.xlu0 %5325, %v6264_v46  }
0x358d   :  { %v2819_v12 = vpop.xlane.xlu1 %2818 }
0x358e   :  { %v2816_v13 = vpop.xlane.xlu0 %2815  ;;  %5475 = vlog2.f32 %v2819_v12  ;;  %v6303_v12 = vrot.slane %v6203_v35, %v3162_v6 }
0x358f   :  { %5477 = vlog2.f32 %v2816_v13 }
0x3591   :  { %v2952_v37 = vpop.permute.xlu1 %2951 }
0x3595   :  { %v2959_v44 = vpop.permute.xlu1 %2958 }
0x3596   :  { %v6273_v4 = vpop.permute.xlu0 %2827 }
0x3597   :  { %vm2829_vm13 = vcmp.eq.s32.totalorder %v6273_v4, 1 }
0x3598   :  { %v5476_v26 = vpop.eup %5475 }
0x3599   :  { %v5478_v14 = vpop.eup %5477  ;;  %v2823_v61 = vmul.f32 0.6931472, %v5476_v26 }
0x359a   :  { %v2821_v16 = vmul.f32 0.6931472, %v5478_v14 }
0x359b   :  { %v2825_v17 = vadd.f32 %v2823_v61, %v2807_v59 }
0x359c   :  { %v2824_v18 = vadd.f32 %v2821_v16, %v2804_v47 }
0x359d   :  { %v2839_v8 = vrot.slane %v2825_v17, %v6270_v15 }
0x359e   :  { %v2835_v21 = vrot.slane %v2824_v18, %v6270_v15 }
0x35a0   :  { %v2841_v27 = vsel %vm2840_vm12, %v2839_v8, %v2835_v21  ;;  %v2744_v21 = vld [vmem:[%s7242_s19] sm:$0xff] }
0x35a1   :  { %v2843_v30 = vsel %vm2829_vm13, %v2841_v27, %v6222_v63 }
0x35a2   :  { %v2930_v32 = vrot.slane %v2843_v30, %v6218_v40 }
0x35a4   :  { %v2931_v38 = vcombine.high %v2930_v32, %v2930_v32  ;;  %v2938_v39 = vrot.slane %v2930_v32, %v6218_v40 }
0x35a6   :  { %v2945_v41 = vrot.slane %v2931_v38, %v6218_v40  ;;  %v2963_v42 = vrot.slane %v2938_v39, %v6199_v33  ;;  %v2746_v39 = vsub.f32 1.0, %v2744_v21 }
0x35a8   :  { %v2967_v43 = vrot.slane %v2945_v41, %v6199_v33  ;;  %v2970_v56 = vadd.f32 %v2963_v42, %v2952_v37  ;;  %v3011_v37 = vrot.slane %v2843_v30, 6 }
0x35aa   :  { %v2971_v49 = vadd.f32 %v2967_v43, %v2959_v44  ;;  %v2972_v52 = vadd.f32 %v2970_v56, %v6178_v19  ;;  %v2745_v44 = vmul.f32 %v2744_v21, %v6178_v19 }
0x35ac   :  { %v2974_v53 = vsel %vm325_vm9, %v2972_v52, -inf  ;;  %v2973_v54 = vadd.f32 %v2971_v49, %v6178_v19  ;;  %v2747_v49 = vmul.f32 1000000.0, %v2746_v39 }
0x35ad   :  { %2975 = vmax.xlane.f32.xlu0 %v2974_v53 }
0x35ae   :  { %v2977_v28 = vsel %vm325_vm9, %v2973_v54, -inf }
0x35af   :  { %2978 = vmax.xlane.f32.xlu1 %v2977_v28  ;;  %v6322_v28 = vsub.f32 %v2745_v44, %v2747_v49  ;;  %v6358_v44 = vsub.s32 7, %v6188_v24 }
0x35b1   :  { %7287 = vst [vmem:[#allocation13_spill] sm:$0xff] %v6322_v28  ;;  %v6363_v49 = vrot.slane %v6203_v35, %v6358_v44 }
0x35c0   :  { %3158 = vbcast.lane.b32.xlu1 %v6294_v57, 256 }
0x363a   :  { %v2976_v58 = vpop.xlane.xlu0 %2975 }
0x363b   :  { %v2980_v59 = vsub.f32 %v2972_v52, %v2976_v58 }
0x363c   :  { %v2979_v47 = vpop.xlane.xlu1 %2978 }
0x363d   :  { %v2982_v60 = vmul.f32 1.442695, %v2980_v59  ;;  %v2981_v62 = vsub.f32 %v2973_v54, %v2979_v47 }
0x363f   :  { %5479 = vpow2.f32 %v2982_v60  ;;  %v2984_v0 = vmul.f32 1.442695, %v2981_v62 }
0x3641   :  { %5481 = vpow2.f32 %v2984_v0 }
0x3649   :  { %v5480_v25 = vpop.eup %5479 }
0x364a   :  { %v2986_v1 = vsel %vm325_vm9, %v5480_v25, 0.0  ;;  %v6328_v25 = vadd.f32 %v6232_v48, %v6322_v28 }
0x364b   :  { %v5482_v3 = vpop.eup %5481  ;;  %2987 = vadd.xlane.f32.xlu0 %v2986_v1 }
0x364c   :  { %v2989_v5 = vsel %vm325_vm9, %v5482_v3, 0.0 }
0x364f   :  { %2990 = vadd.xlane.f32.xlu0 %v2989_v5  ;;  %v6334_v5 = vadd.f32 %v6229_v51, %v6322_v28 }
0x3665   :  { %3165 = vbcast.lane.b32.xlu0 %v6303_v12, 256 }
0x36d8   :  { %v2988_v13 = vpop.xlane.xlu0 %2987 }
0x36d9   :  { %5483 = vlog2.f32 %v2988_v13 }
0x36dc   :  { %v2991_v26 = vpop.xlane.xlu0 %2990 }
0x36dd   :  { %5485 = vlog2.f32 %v2991_v26  ;;  %v2846_v26 = vsel %vm325_vm9, %v6328_v25, -inf }
0x36e0   :  { %v3166_v60 = vpop.permute.xlu0 %3165 }
0x36e3   :  { %v5484_v14 = vpop.eup %5483 }
0x36e4   :  { %v2993_v61 = vmul.f32 0.6931472, %v5484_v14  ;;  %v2849_v14 = vsel %vm325_vm9, %v6334_v5, -inf }
0x36e6   :  { %v2996_v17 = vadd.f32 %v2993_v61, %v2976_v58  ;;  %v3159_v58 = vpop.permute.xlu1 %3158 }
0x36e7   :  { %v5486_v16 = vpop.eup %5485 }
0x36e8   :  { %v2995_v18 = vmul.f32 0.6931472, %v5486_v16  ;;  %v3003_v27 = vrot.slane %v2996_v17, %v6270_v15 }
0x36ea   :  { %v2997_v8 = vadd.f32 %v2995_v18, %v2979_v47 }
0x36ec   :  { %v3007_v32 = vrot.slane %v2997_v8, %v6270_v15 }
0x36ee   :  { %v3009_v38 = vsel %vm3008_vm14, %v3007_v32, %v3003_v27 }
0x36ef   :  { %v6314_v41 = vsel %vm2829_vm13, %v3009_v38, %v3011_v37 }
0x36f0   :  { %v3135_v42 = vrot.slane %v6314_v41, %v6218_v40 }
0x36f2   :  { %v3136_v43 = vcombine.high %v3135_v42, %v3135_v42  ;;  %v3143_v56 = vrot.slane %v3135_v42, %v6218_v40 }
0x36f4   :  { %v3150_v52 = vrot.slane %v3136_v43, %v6218_v40  ;;  %v3151_v53 = vcombine.high %v3143_v56, %v3143_v56  ;;  %v3363_v43 = vsub.s32 6, %v6188_v24 }
0x36f6   :  { %v3152_v30 = vcombine.high %v3150_v52, %v3150_v52  ;;  %v3170_v54 = vrot.slane %v3151_v53, %v6199_v33  ;;  %v6355_v56 = vrot.slane %v6203_v35, %v3363_v43 }
0x36f8   :  { %v3174_v59 = vrot.slane %v3152_v30, %v6199_v33  ;;  %v3177_v47 = vadd.f32 %v3170_v54, %v3159_v58 }
0x36fa   :  { %v3178_v62 = vadd.f32 %v3174_v59, %v3166_v60  ;;  %v3179_v0 = vadd.f32 %v3177_v47, %v6178_v19 }
0x36fc   :  { %v3181_v1 = vsel %vm325_vm9, %v3179_v0, -inf  ;;  %v3180_v3 = vadd.f32 %v3178_v62, %v6178_v19 }
0x36fd   :  { %3182 = vmax.xlane.f32.xlu1 %v3181_v1 }
0x36fe   :  { %v3184_v13 = vsel %vm325_vm9, %v3180_v3, -inf }
0x36ff   :  { %3185 = vmax.xlane.f32.xlu0 %v3184_v13 }
0x3701   :  { %2847 = vmax.xlane.f32.xlu1 %v2846_v26 }
0x3703   :  { %2850 = vmax.xlane.f32.xlu0 %v2849_v14 }
0x3712   :  { %2891 = vbcast.lane.b32.xlu1 %v6212_v36, 256 }
0x3719   :  { %2898 = vbcast.lane.b32.xlu0 %v6208_v22, 256 }
0x378a   :  { %v3183_v48 = vpop.xlane.xlu1 %3182 }
0x378b   :  { %v3187_v32 = vsub.f32 %v3179_v0, %v3183_v48 }
0x378c   :  { %v3186_v61 = vpop.xlane.xlu0 %3185 }
0x378d   :  { %v3188_v51 = vsub.f32 %v3180_v3, %v3186_v61  ;;  %v3189_v37 = vmul.f32 1.442695, %v3187_v32 }
0x378e   :  { %v6343_v16 = vpop.xlane.xlu1 %2847 }
0x378f   :  { %v3191_v17 = vmul.f32 1.442695, %v3188_v51 }
0x3790   :  { %v6347_v36 = vpop.xlane.xlu0 %2850 }
0x3791   :  { %5487 = vpow2.f32 %v3191_v17 }
0x3792   :  { %v2892_v18 = vpop.permute.xlu1 %2891  ;;  %5489 = vpow2.f32 %v3189_v37 }
0x3793   :  { %v2902_v8 = vadd.f32 %v2892_v18, %v6343_v16 }
0x3794   :  { %v2899_v22 = vpop.permute.xlu0 %2898 }
0x3795   :  { %2907 = vperm.xlu1 %5326, %v2902_v8   ;;  %v2903_v38 = vadd.f32 %v2899_v22, %v6347_v36 }
0x379b   :  { %v5488_v21 = vpop.eup %5487 }
0x379c   :  { %v3196_v27 = vsel %vm325_vm9, %v5488_v21, 0.0  ;;  %v5490_v39 = vpop.eup %5489 }
0x379d   :  { %3197 = vadd.xlane.f32.xlu0 %v3196_v27  ;;  %v3193_v42 = vsel %vm325_vm9, %v5490_v39, 0.0  ;;  %v3218_v39 = vrot.slane %v6314_v41, 6 }
0x37b3   :  { %2910 = vperm.xlu0 %5325, %v2903_v38  }
0x37b9   :  { %3194 = vadd.xlane.f32.xlu1 %v3193_v42 }
0x37ca   :  { %3366 = vbcast.lane.b32.xlu1 %v6355_v56, 256 }
0x37ce   :  { %3373 = vbcast.lane.b32.xlu1 %v6363_v49, 256 }
0x3814   :  { %v2908_v53 = vpop.permute.xlu1 %2907 }
0x3815   :  { %v2915_v54 = vrot.slane %v2908_v53, %v6270_v15 }
0x382a   :  { %v3198_v52 = vpop.xlane.xlu0 %3197 }
0x382b   :  { %5491 = vlog2.f32 %v3198_v52 }
0x3832   :  { %v2911_v30 = vpop.permute.xlu0 %2910 }
0x3833   :  { %v2919_v58 = vrot.slane %v2911_v30, %v6270_v15 }
0x3835   :  { %v2920_v59 = vsel %vm2840_vm12, %v2919_v58, %v2915_v54  ;;  %v5492_v18 = vpop.eup %5491 }
0x3836   :  { %v6372_v47 = vsel %vm2829_vm13, %v2920_v59, %v6222_v63  ;;  %v3202_v8 = vmul.f32 0.6931472, %v5492_v18 }
0x3837   :  { %v3021_v60 = vrot.slane %v6372_v47, %v6218_v40 }
0x3838   :  { %v3204_v27 = vadd.f32 %v3202_v8, %v3186_v61 }
0x3839   :  { %v3029_v62 = vrot.slane %v3021_v60, %v6218_v40  ;;  %v3022_v0 = vcombine.high %v3021_v60, %v3021_v60 }
0x383a   :  { %v3214_v22 = vrot.slane %v3204_v27, %v6270_v15 }
0x383b   :  { %v3040_v1 = vrot.slane %v3029_v62, %v6199_v33  ;;  %v3036_v3 = vrot.slane %v3022_v0, %v6218_v40 }
0x383d   :  { %v6380_v13 = vadd.f32 %v3040_v1, %v6322_v28  ;;  %v3044_v26 = vrot.slane %v3036_v3, %v6199_v33 }
0x383f   :  { %v3049_v14 = vsel %vm325_vm9, %v6380_v13, -inf  ;;  %v6386_v63 = vadd.f32 %v3044_v26, %v6322_v28 }
0x3840   :  { %3050 = vmax.xlane.f32.xlu0 %v3049_v14 }
0x3841   :  { %v3052_v51 = vsel %vm325_vm9, %v6386_v63, -inf }
0x3842   :  { %3053 = vmax.xlane.f32.xlu1 %v3052_v51 }
0x3846   :  { %v3195_v17 = vpop.xlane.xlu1 %3194 }
0x3847   :  { %5493 = vlog2.f32 %v3195_v17 }
0x384a   :  { %v3367_v54 = vpop.permute.xlu1 %3366 }
0x384e   :  { %v3374_v59 = vpop.permute.xlu1 %3373 }
0x3851   :  { %v5494_v21 = vpop.eup %5493 }
0x3852   :  { %v3200_v32 = vmul.f32 0.6931472, %v5494_v21  ;;  %v2596_v21 = vld [vmem:[%s7283_s30 + $0x8] sm:$0xff]  ;;  %s7289_s30 = sld [smem:[#allocation24_spill]] }
0x3853   :  { %3101 = vbcast.lane.b32.xlu1 %v6259_v7, 256 }
0x3854   :  { %v3203_v37 = vadd.f32 %v3200_v32, %v3183_v48 }
0x3856   :  { %v3210_v38 = vrot.slane %v3203_v37, %v6270_v15  ;;  %3094 = vbcast.lane.b32.xlu0 %v6251_v45, 256 }
0x3858   :  { %v3216_v42 = vsel %vm3215_vm15, %v3214_v22, %v3210_v38 }
0x3859   :  { %v6398_v52 = vsel %vm2829_vm13, %v3216_v42, %v3218_v39 }
0x385a   :  { %v3338_v61 = vcombine.high %v6398_v52, %v6398_v52 }
0x385c   :  { %v3345_v7 = vrot.slane %v3338_v61, %v6218_v40 }
0x385e   :  { %v3346_v48 = vcombine.high %v3345_v7, %v3345_v7  ;;  %v3353_v53 = vrot.slane %v3345_v7, %v6218_v40 }
0x3860   :  { %v3360_v30 = vrot.slane %v3346_v48, %v6218_v40  ;;  %v3378_v45 = vrot.slane %v3353_v53, %v6199_v33 }
0x3862   :  { %v3382_v41 = vrot.slane %v3360_v30, %v6199_v33  ;;  %v3385_v58 = vadd.f32 %v3378_v45, %v3367_v54 }
0x3864   :  { %v3386_v60 = vadd.f32 %v3382_v41, %v3374_v59  ;;  %v3387_v62 = vadd.f32 %v3385_v58, %v6178_v19 }
0x3866   :  { %v3388_v0 = vadd.f32 %v3386_v60, %v6178_v19  ;;  %v3389_v1 = vsel %vm325_vm9, %v3387_v62, -inf }
0x3868   :  { %v3392_v3 = vsel %vm325_vm9, %v3388_v0, -inf }
0x3875   :  { %3390 = vmax.xlane.f32.xlu0 %v3389_v1 }
0x3877   :  { %3393 = vmax.xlane.f32.xlu1 %v3392_v3 }
0x38cd   :  { %v6411_v26 = vpop.xlane.xlu0 %3050 }
0x38cf   :  { %v6413_v14 = vpop.xlane.xlu1 %3053 }
0x38d1   :  { %v3095_v51 = vpop.permute.xlu0 %3094 }
0x38d2   :  { %v3105_v17 = vadd.f32 %v3095_v51, %v6411_v26 }
0x38d3   :  { %v3102_v18 = vpop.permute.xlu1 %3101 }
0x38d4   :  { %v3106_v8 = vadd.f32 %v3102_v18, %v6413_v14  ;;  %3110 = vperm.xlu0 %5325, %v3105_v17  }
0x38d6   :  { %3113 = vperm.xlu1 %5326, %v3106_v8  }
0x38d8   :  { %2605 = vperm.xlu0 %5325, %v2596_v21  }
0x3902   :  { %v3391_v27 = vpop.xlane.xlu0 %3390 }
0x3903   :  { %v3395_v32 = vsub.f32 %v3387_v62, %v3391_v27 }
0x3904   :  { %v3394_v37 = vpop.xlane.xlu1 %3393 }
0x3905   :  { %v3397_v22 = vmul.f32 1.442695, %v3395_v32  ;;  %v3396_v38 = vsub.f32 %v3388_v0, %v3394_v37 }
0x3907   :  { %5495 = vpow2.f32 %v3397_v22  ;;  %v3399_v39 = vmul.f32 1.442695, %v3396_v38 }
0x3909   :  { %5497 = vpow2.f32 %v3399_v39 }
0x3911   :  { %v5496_v42 = vpop.eup %5495 }
0x3912   :  { %v3401_v61 = vsel %vm325_vm9, %v5496_v42, 0.0 }
0x3913   :  { %v5498_v7 = vpop.eup %5497  ;;  %3402 = vadd.xlane.f32.xlu1 %v3401_v61 }
0x3914   :  { %v3404_v48 = vsel %vm325_vm9, %v5498_v7, 0.0 }
0x3915   :  { %3405 = vadd.xlane.f32.xlu0 %v3404_v48 }
0x3953   :  { %v3111_v53 = vpop.permute.xlu0 %3110 }
0x3954   :  { %v3118_v60 = vrot.slane %v3111_v53, %v6270_v15 }
0x3955   :  { %v3114_v45 = vpop.permute.xlu1 %3113 }
0x3956   :  { %v3122_v58 = vrot.slane %v3114_v45, %v6270_v15 }
0x3957   :  { %v2606_v30 = vpop.permute.xlu0 %2605 }
0x3958   :  { %v2615_v54 = vmul.f32 %v6184_v20, %v2606_v30  ;;  %v3123_v20 = vsel %vm3008_vm14, %v3122_v58, %v3118_v60 }
0x395a   :  { %v2694_v41 = vadd.f32 %v6191_v29, %v2615_v54  ;;  %v3125_v29 = vrot.slane %v6372_v47, 6 }
0x395c   :  { %v6426_v59 = vadd.f32 %v6196_v31, %v2694_v41  ;;  %v6444_v31 = vsel %vm2829_vm13, %v3123_v20, %v3125_v29 }
0x395e   :  { %v6432_v62 = vrot.slane %v6426_v59, %v2783_v34  ;;  %v6436_v0 = vrot.slane %v6426_v59, %v6199_v33  ;;  %v3228_v34 = vrot.slane %v6444_v31, %v6218_v40 }
0x3960   :  { %3582 = vbcast.lane.b32.xlu1 %v6432_v62, 256  ;;  %3575 = vbcast.lane.b32.xlu0 %v6436_v0, 256  ;;  %v3229_v1 = vcombine.high %v3228_v34, %v3228_v34  ;;  %v3236_v17 = vrot.slane %v3228_v34, %v6218_v40 }
0x3962   :  { %v3243_v3 = vrot.slane %v3229_v1, %v6218_v40  ;;  %v3244_v8 = vcombine.high %v3236_v17, %v3236_v17 }
0x3964   :  { %v3245_v51 = vcombine.high %v3243_v3, %v3243_v3  ;;  %v3249_v47 = vrot.slane %v3244_v8, %v6199_v33 }
0x3966   :  { %v3253_v18 = vrot.slane %v3245_v51, %v6199_v33  ;;  %v6458_v22 = vadd.f32 %v3249_v47, %v6322_v28 }
0x3968   :  { %v6452_v21 = vadd.f32 %v3253_v18, %v6322_v28  ;;  %v3258_v38 = vsel %vm325_vm9, %v6458_v22, -inf }
0x396a   :  { %v3261_v32 = vsel %vm325_vm9, %v6452_v21, -inf }
0x397f   :  { %3262 = vmax.xlane.f32.xlu0 %v3261_v32 }
0x3984   :  { %3259 = vmax.xlane.f32.xlu1 %v3258_v38 }
0x3995   :  { %3310 = vbcast.lane.b32.xlu1 %v6303_v12, 256  ;;  %3303 = vbcast.lane.b32.xlu0 %v6294_v57, 256  ;;  %v3426_v12 = vrot.slane %v6398_v52, 6 }
0x39a0   :  { %v3403_v39 = vpop.xlane.xlu1 %3402 }
0x39a1   :  { %5499 = vlog2.f32 %v3403_v39 }
0x39a2   :  { %v3406_v42 = vpop.xlane.xlu0 %3405 }
0x39a3   :  { %5501 = vlog2.f32 %v3406_v42 }
0x39ab   :  { %v5500_v61 = vpop.eup %5499 }
0x39ac   :  { %v3408_v48 = vmul.f32 0.6931472, %v5500_v61 }
0x39ad   :  { %v5502_v7 = vpop.eup %5501 }
0x39ae   :  { %v3410_v53 = vmul.f32 0.6931472, %v5502_v7  ;;  %v3411_v54 = vadd.f32 %v3408_v48, %v3391_v27 }
0x39b0   :  { %v3412_v30 = vadd.f32 %v3410_v53, %v3394_v37  ;;  %v3418_v41 = vrot.slane %v3411_v54, %v6270_v15 }
0x39b2   :  { %v3422_v45 = vrot.slane %v3412_v30, %v6270_v15 }
0x39b4   :  { %v3424_v58 = vsel %vm3423_vm0, %v3422_v45, %v3418_v41 }
0x39b5   :  { %v6470_v57 = vsel %vm2829_vm13, %v3424_v58, %v3426_v12 }
0x39b6   :  { %v3545_v60 = vcombine.high %v6470_v57, %v6470_v57 }
0x39b8   :  { %v3552_v20 = vrot.slane %v3545_v60, %v6218_v40 }
0x39ba   :  { %v3553_v37 = vcombine.high %v3552_v20, %v3552_v20  ;;  %v3560_v27 = vrot.slane %v3552_v20, %v6218_v40 }
0x39bc   :  { %v3567_v29 = vrot.slane %v3553_v37, %v6218_v40  ;;  %v3568_v34 = vcombine.high %v3560_v27, %v3560_v27  ;;  %v3334_v27 = vrot.slane %v6444_v31, 6 }
0x39be   :  { %v3569_v1 = vcombine.high %v3567_v29, %v3567_v29  ;;  %v3587_v3 = vrot.slane %v3568_v34, %v6199_v33 }
0x39c0   :  { %v3591_v52 = vrot.slane %v3569_v1, %v6199_v33 }
0x39d2   :  { %v3576_v51 = vpop.permute.xlu0 %3575  ;;  %v3583_v17 = vpop.permute.xlu1 %3582 }
0x39d3   :  { %v3594_v18 = vadd.f32 %v3587_v3, %v3576_v51  ;;  %v3595_v8 = vadd.f32 %v3591_v52, %v3583_v17 }
0x39d5   :  { %v3596_v47 = vadd.f32 %v3594_v18, %v6178_v19  ;;  %v3597_v32 = vadd.f32 %v3595_v8, %v6178_v19 }
0x39d7   :  { %v3598_v38 = vsel %vm325_vm9, %v3596_v47, -inf  ;;  %v3601_v39 = vsel %vm325_vm9, %v3597_v32, -inf }
0x39d8   :  { %3599 = vmax.xlane.f32.xlu1 %v3598_v38  ;;  %3602 = vmax.xlane.f32.xlu0 %v3601_v39 }
0x3a0c   :  { %v6483_v42 = vpop.xlane.xlu0 %3262 }
0x3a10   :  { %v3304_v61 = vpop.permute.xlu0 %3303 }
0x3a11   :  { %v6485_v7 = vpop.xlane.xlu1 %3259 }
0x3a12   :  { %v3314_v48 = vadd.f32 %v3304_v61, %v6485_v7 }
0x3a14   :  { %3319 = vperm.xlu0 %5325, %v3314_v48  }
0x3a15   :  { %v3311_v53 = vpop.permute.xlu1 %3310 }
0x3a16   :  { %v3315_v30 = vadd.f32 %v3311_v53, %v6483_v42 }
0x3a18   :  { %3322 = vperm.xlu1 %5326, %v3315_v30  }
0x3a65   :  { %v3603_v54 = vpop.xlane.xlu0 %3602  ;;  %v3600_v45 = vpop.xlane.xlu1 %3599 }
0x3a66   :  { %v3605_v41 = vsub.f32 %v3597_v32, %v3603_v54  ;;  %v3604_v12 = vsub.f32 %v3596_v47, %v3600_v45 }
0x3a68   :  { %v3608_v29 = vmul.f32 1.442695, %v3605_v41  ;;  %v3606_v1 = vmul.f32 1.442695, %v3604_v12 }
0x3a6a   :  { %5503 = vpow2.f32 %v3608_v29 }
0x3a6b   :  { %5505 = vpow2.f32 %v3606_v1 }
0x3a74   :  { %v5504_v61 = vpop.eup %5503 }
0x3a75   :  { %v5506_v53 = vpop.eup %5505  ;;  %v3613_v30 = vsel %vm325_vm9, %v5504_v61, 0.0  ;;  %v3638_v61 = vrot.slane %v6470_v57, 6 }
0x3a76   :  { %v3610_v41 = vsel %vm325_vm9, %v5506_v53, 0.0 }
0x3a93   :  { %v3320_v58 = vpop.permute.xlu0 %3319 }
0x3a94   :  { %v3327_v20 = vrot.slane %v3320_v58, %v6270_v15  ;;  %v6519_v58 = vld [vmem:[%s7285_s28 + $0x8] sm:$0xff] }
0x3a95   :  { %7288 = vst [vmem:[#allocation14_spill] sm:$0xff] %v6519_v58  ;;  %vm2738_vm2 = vcmp.ne.s32.totalorder %v6519_v58, 0 }
0x3a96   :  { %v6526_v12 = vsel %vm2738_vm2, 1, %v5610_v2 }
0x3a97   :  { %v3323_v60 = vpop.permute.xlu1 %3322 }
0x3a98   :  { %v3331_v37 = vrot.slane %v3323_v60, %v6270_v15  ;;  %v6533_v60 = vrot.slane %v6426_v59, %v2948_v9 }
0x3a9a   :  { %v3332_v34 = vsel %vm3215_vm15, %v3331_v37, %v3327_v20  ;;  %v6538_v20 = vrot.slane %v6426_v59, %v2955_v10 }
0x3a9b   :  { %v6495_v3 = vsel %vm2829_vm13, %v3332_v34, %v3334_v27 }
0x3a9c   :  { %v3430_v52 = vcombine.high %v6495_v3, %v6495_v3 }
0x3a9e   :  { %v3437_v51 = vrot.slane %v3430_v52, %v6218_v40 }
0x3aa0   :  { %v3445_v17 = vrot.slane %v3437_v51, %v6218_v40  ;;  %v3438_v18 = vcombine.high %v3437_v51, %v3437_v51 }
0x3aa2   :  { %v3456_v31 = vrot.slane %v3445_v17, %v6199_v33  ;;  %v3452_v8 = vrot.slane %v3438_v18, %v6218_v40 }
0x3aa4   :  { %v6504_v47 = vadd.f32 %v3456_v31, %v6322_v28  ;;  %v3460_v32 = vrot.slane %v3452_v8, %v6199_v33 }
0x3aa6   :  { %v3465_v38 = vsel %vm325_vm9, %v6504_v47, -inf  ;;  %v6510_v39 = vadd.f32 %v3460_v32, %v6322_v28 }
0x3aa7   :  { %3466 = vmax.xlane.f32.xlu0 %v3465_v38 }
0x3aa8   :  { %v3468_v48 = vsel %vm325_vm9, %v6510_v39, -inf }
0x3aa9   :  { %3469 = vmax.xlane.f32.xlu1 %v3468_v48 }
0x3aab   :  { %3614 = vadd.xlane.f32.xlu0 %v3613_v30 }
0x3aad   :  { %3611 = vadd.xlane.f32.xlu1 %v3610_v41 }
0x3abe   :  { %3517 = vbcast.lane.b32.xlu1 %v6363_v49, 256 }
0x3ac1   :  { %3510 = vbcast.lane.b32.xlu0 %v6355_v56, 256 }
0x3ac2   :  { %3623 = vperm.xlu1 %5326, %v6526_v12  }
0x3ac5   :  { %3786 = vbcast.lane.b32.xlu0 %v6533_v60, 256 }
0x3ac6   :  { %3793 = vbcast.lane.b32.xlu1 %v6538_v20, 256 }
0x3b34   :  { %v6542_v49 = vpop.xlane.xlu0 %3466 }
0x3b36   :  { %v6544_v37 = vpop.xlane.xlu1 %3469 }
0x3b38   :  { %v3615_v56 = vpop.xlane.xlu0 %3614 }
0x3b39   :  { %5507 = vlog2.f32 %v3615_v56 }
0x3b3a   :  { %v3612_v27 = vpop.xlane.xlu1 %3611 }
0x3b3b   :  { %5509 = vlog2.f32 %v3612_v27 }
0x3b3c   :  { %v3511_v29 = vpop.permute.xlu0 %3510 }
0x3b3d   :  { %v3521_v9 = vadd.f32 %v3511_v29, %v6542_v49 }
0x3b3e   :  { %v3518_v34 = vpop.permute.xlu1 %3517 }
0x3b3f   :  { %v3522_v1 = vadd.f32 %v3518_v34, %v6544_v37  ;;  %3526 = vperm.xlu0 %5325, %v3521_v9  }
0x3b40   :  { %v3787_v56 = vpop.permute.xlu0 %3786 }
0x3b41   :  { %3529 = vperm.xlu1 %5326, %v3522_v1  }
0x3b42   :  { %v6548_v8 = vpop.permute.xlu1 %3623 }
0x3b43   :  { %v5508_v10 = vpop.eup %5507  ;;  %vm3625_vm3 = vcmp.eq.s32.totalorder %v6548_v8, 1 }
0x3b44   :  { %v3619_v52 = vmul.f32 0.6931472, %v5508_v10 }
0x3b45   :  { %v5510_v51 = vpop.eup %5509 }
0x3b46   :  { %v3621_v17 = vadd.f32 %v3619_v52, %v3603_v54  ;;  %v3617_v18 = vmul.f32 0.6931472, %v5510_v51  ;;  %v3794_v34 = vpop.permute.xlu1 %3793 }
0x3b48   :  { %v3620_v31 = vadd.f32 %v3617_v18, %v3600_v45  ;;  %v3635_v32 = vrot.slane %v3621_v17, %v6270_v15 }
0x3b4a   :  { %v3631_v38 = vrot.slane %v3620_v31, %v6270_v15 }
0x3b4c   :  { %v3636_v48 = vsel %vm2840_vm12, %v3635_v32, %v3631_v38  ;;  %v3541_v38 = vrot.slane %v6495_v3, 6 }
0x3b4d   :  { %v6557_v53 = vsel %vm3625_vm3, %v3636_v48, %v3638_v61 }
0x3b4e   :  { %v3765_v54 = vrot.slane %v6557_v53, %v6218_v40 }
0x3b50   :  { %v3766_v45 = vcombine.high %v3765_v54, %v3765_v54  ;;  %v3773_v30 = vrot.slane %v3765_v54, %v6218_v40 }
0x3b52   :  { %v3798_v41 = vrot.slane %v3773_v30, %v6199_v33  ;;  %v3780_v27 = vrot.slane %v3766_v45, %v6218_v40 }
0x3b54   :  { %v3805_v57 = vadd.f32 %v3798_v41, %v3787_v56  ;;  %v3802_v29 = vrot.slane %v3780_v27, %v6199_v33 }
0x3b56   :  { %v3807_v9 = vadd.f32 %v3805_v57, %v6178_v19  ;;  %v3806_v1 = vadd.f32 %v3802_v29, %v3794_v34 }
0x3b58   :  { %v3809_v10 = vsel %vm325_vm9, %v3807_v9, -inf  ;;  %v3808_v52 = vadd.f32 %v3806_v1, %v6178_v19 }
0x3b5a   :  { %v3812_v51 = vsel %vm325_vm9, %v3808_v52, -inf }
0x3b5e   :  { %3810 = vmax.xlane.f32.xlu0 %v3809_v10 }
0x3b65   :  { %3813 = vmax.xlane.f32.xlu1 %v3812_v51 }
0x3b76   :  { %3724 = vbcast.lane.b32.xlu1 %v6436_v0, 256 }
0x3bbe   :  { %v3527_v17 = vpop.permute.xlu0 %3526 }
0x3bbf   :  { %v3534_v31 = vrot.slane %v3527_v17, %v6270_v15 }
0x3bc0   :  { %v3530_v18 = vpop.permute.xlu1 %3529 }
0x3bc1   :  { %v3538_v32 = vrot.slane %v3530_v18, %v6270_v15 }
0x3bc3   :  { %v3539_v61 = vsel %vm3423_vm0, %v3538_v32, %v3534_v31 }
0x3bc4   :  { %v6576_v48 = vsel %vm2829_vm13, %v3539_v61, %v3541_v38 }
0x3bc5   :  { %v3642_v54 = vcombine.high %v6576_v48, %v6576_v48 }
0x3bc7   :  { %v3649_v45 = vrot.slane %v3642_v54, %v6218_v40 }
0x3bc9   :  { %v3657_v0 = vrot.slane %v3649_v45, %v6218_v40  ;;  %v3650_v30 = vcombine.high %v3649_v45, %v3649_v45 }
0x3bcb   :  { %v3665_v41 = vcombine.high %v3657_v0, %v3657_v0  ;;  %v3664_v56 = vrot.slane %v3650_v30, %v6218_v40 }
0x3bcd   :  { %v3670_v27 = vrot.slane %v3665_v41, %v6199_v33  ;;  %v3666_v3 = vcombine.high %v3664_v56, %v3664_v56 }
0x3bcf   :  { %v6585_v57 = vadd.f32 %v3670_v27, %v6322_v28  ;;  %v3674_v4 = vrot.slane %v3666_v3, %v6199_v33 }
0x3bd1   :  { %v3679_v29 = vsel %vm325_vm9, %v6585_v57, -inf  ;;  %v6591_v34 = vadd.f32 %v3674_v4, %v6322_v28 }
0x3bd2   :  { %3680 = vmax.xlane.f32.xlu0 %v3679_v29 }
0x3bd3   :  { %v3682_v1 = vsel %vm325_vm9, %v6591_v34, -inf }
0x3bd6   :  { %3683 = vmax.xlane.f32.xlu0 %v3682_v1 }
0x3beb   :  { %v3811_v10 = vpop.xlane.xlu0 %3810 }
0x3bec   :  { %v3815_v51 = vsub.f32 %v3807_v9, %v3811_v10  ;;  %3731 = vbcast.lane.b32.xlu0 %v6432_v62, 256  ;;  %v6601_v9 = vrot.slane %v6426_v59, %v3155_v55  ;;  %v6607_v62 = vrot.slane %v6426_v59, %v3162_v6 }
0x3bee   :  { %v3817_v17 = vmul.f32 1.442695, %v3815_v51 }
0x3bf0   :  { %5511 = vpow2.f32 %v3817_v17 }
0x3bf2   :  { %v3814_v18 = vpop.xlane.xlu1 %3813 }
0x3bf3   :  { %v3816_v31 = vsub.f32 %v3808_v52, %v3814_v18 }
0x3bf5   :  { %v3819_v32 = vmul.f32 1.442695, %v3816_v31 }
0x3bf6   :  { %v3725_v52 = vpop.permute.xlu1 %3724 }
0x3bf7   :  { %5513 = vpow2.f32 %v3819_v32 }
0x3bfa   :  { %v5512_v38 = vpop.eup %5511 }
0x3bfb   :  { %v3821_v61 = vsel %vm325_vm9, %v5512_v38, 0.0  ;;  %v3845_v38 = vrot.slane %v6557_v53, 6 }
0x3bfc   :  { %3822 = vadd.xlane.f32.xlu1 %v3821_v61 }
0x3c01   :  { %v5514_v54 = vpop.eup %5513 }
0x3c02   :  { %v3824_v45 = vsel %vm325_vm9, %v5514_v54, 0.0 }
0x3c0b   :  { %3825 = vadd.xlane.f32.xlu0 %v3824_v45 }
0x3c0d   :  { %3992 = vbcast.lane.b32.xlu1 %v6601_v9, 256 }
0x3c21   :  { %3999 = vbcast.lane.b32.xlu0 %v6607_v62, 256 }
0x3c5f   :  { %v6610_v0 = vpop.xlane.xlu0 %3680 }
0x3c60   :  { %v3735_v30 = vadd.f32 %v3725_v52, %v6610_v0 }
0x3c62   :  { %3740 = vperm.xlu1 %5326, %v3735_v30  }
0x3c63   :  { %v6613_v41 = vpop.xlane.xlu0 %3683 }
0x3c67   :  { %v3732_v56 = vpop.permute.xlu0 %3731 }
0x3c68   :  { %v3736_v55 = vadd.f32 %v3732_v56, %v6613_v41 }
0x3c6a   :  { %3743 = vperm.xlu1 %5326, %v3736_v55  }
0x3c89   :  { %v3823_v27 = vpop.xlane.xlu1 %3822 }
0x3c8a   :  { %5515 = vlog2.f32 %v3823_v27 }
0x3c8d   :  { %v3993_v27 = vpop.permute.xlu1 %3992 }
0x3c94   :  { %v5516_v6 = vpop.eup %5515 }
0x3c95   :  { %v3828_v4 = vmul.f32 0.6931472, %v5516_v6 }
0x3c97   :  { %v3831_v1 = vadd.f32 %v3828_v4, %v3811_v10 }
0x3c98   :  { %v3826_v3 = vpop.xlane.xlu0 %3825 }
0x3c99   :  { %5517 = vlog2.f32 %v3826_v3  ;;  %v3838_v31 = vrot.slane %v3831_v1, %v6270_v15 }
0x3c9c   :  { %v4000_v6 = vpop.permute.xlu0 %3999 }
0x3ca3   :  { %v5518_v29 = vpop.eup %5517 }
0x3ca4   :  { %v3830_v51 = vmul.f32 0.6931472, %v5518_v29 }
0x3ca6   :  { %v3832_v17 = vadd.f32 %v3830_v51, %v3814_v18 }
0x3ca8   :  { %v3842_v32 = vrot.slane %v3832_v17, %v6270_v15 }
0x3caa   :  { %v3843_v61 = vsel %vm3008_vm14, %v3842_v32, %v3838_v31 }
0x3cab   :  { %v6622_v54 = vsel %vm3625_vm3, %v3843_v61, %v3845_v38 }
0x3cac   :  { %v3969_v45 = vrot.slane %v6622_v54, %v6218_v40 }
0x3cae   :  { %v3970_v52 = vcombine.high %v3969_v45, %v3969_v45  ;;  %v3977_v10 = vrot.slane %v3969_v45, %v6218_v40  ;;  %v3755_v45 = vrot.slane %v6576_v48, 6 }
0x3cb0   :  { %v3984_v18 = vrot.slane %v3970_v52, %v6218_v40  ;;  %v3985_v30 = vcombine.high %v3977_v10, %v3977_v10 }
0x3cb2   :  { %v3986_v56 = vcombine.high %v3984_v18, %v3984_v18  ;;  %v4004_v55 = vrot.slane %v3985_v30, %v6199_v33 }
0x3cb4   :  { %v4008_v53 = vrot.slane %v3986_v56, %v6199_v33  ;;  %v4011_v3 = vadd.f32 %v4004_v55, %v3993_v27 }
0x3cb6   :  { %v4012_v4 = vadd.f32 %v4008_v53, %v4000_v6  ;;  %v4013_v29 = vadd.f32 %v4011_v3, %v6178_v19 }
0x3cb8   :  { %v4014_v1 = vadd.f32 %v4012_v4, %v6178_v19  ;;  %v4015_v51 = vsel %vm325_vm9, %v4013_v29, -inf }
0x3cb9   :  { %4016 = vmax.xlane.f32.xlu0 %v4015_v51 }
0x3cba   :  { %v4018_v17 = vsel %vm325_vm9, %v4014_v1, -inf }
0x3cbb   :  { %4019 = vmax.xlane.f32.xlu1 %v4018_v17 }
0x3ccc   :  { %3928 = vbcast.lane.b32.xlu1 %v6533_v60, 256 }
0x3ce1   :  { %v3741_v31 = vpop.permute.xlu1 %3740 }
0x3ce2   :  { %v3748_v38 = vrot.slane %v3741_v31, %v6270_v15 }
0x3ce9   :  { %v3744_v32 = vpop.permute.xlu1 %3743 }
0x3cea   :  { %v3752_v61 = vrot.slane %v3744_v32, %v6270_v15 }
0x3cec   :  { %v3753_v52 = vsel %vm2840_vm12, %v3752_v61, %v3748_v38 }
0x3ced   :  { %v3757_v19 = vsel %vm3625_vm3, %v3753_v52, %v3755_v45 }
0x3cee   :  { %v3855_v10 = vrot.slane %v3757_v19, %v6218_v40 }
0x3cf0   :  { %v3863_v18 = vrot.slane %v3855_v10, %v6218_v40  ;;  %v3856_v30 = vcombine.high %v3855_v10, %v3855_v10 }
0x3cf2   :  { %v3874_v60 = vrot.slane %v3863_v18, %v6199_v33  ;;  %v3870_v56 = vrot.slane %v3856_v30, %v6218_v40 }
0x3cf4   :  { %v6646_v55 = vadd.f32 %v3874_v60, %v6322_v28  ;;  %v3878_v27 = vrot.slane %v3870_v56, %v6199_v33  ;;  %v6668_v56 = vrot.slane %v6426_v59, %v3363_v43 }
0x3cf6   :  { %v3883_v48 = vsel %vm325_vm9, %v6646_v55, -inf  ;;  %v6652_v53 = vadd.f32 %v3878_v27, %v6322_v28  ;;  %v6673_v27 = vrot.slane %v6426_v59, %v6358_v44 }
0x3cf7   :  { %3884 = vmax.xlane.f32.xlu0 %v3883_v48 }
0x3cf8   :  { %v3886_v3 = vsel %vm325_vm9, %v6652_v53, -inf }
0x3cfb   :  { %3887 = vmax.xlane.f32.xlu0 %v3886_v3 }
0x3d11   :  { %3935 = vbcast.lane.b32.xlu0 %v6538_v20, 256 }
0x3d46   :  { %v4017_v32 = vpop.xlane.xlu0 %4016 }
0x3d48   :  { %v4020_v6 = vpop.xlane.xlu1 %4019 }
0x3d49   :  { %v4022_v4 = vsub.f32 %v4014_v1, %v4020_v6  ;;  %v4021_v1 = vsub.f32 %v4013_v29, %v4017_v32  ;;  %v4493_v29 = vld [vmem:[%s7289_s30 + $0x8] sm:$0xff] }
0x3d4b   :  { %v4025_v51 = vmul.f32 1.442695, %v4022_v4  ;;  %v4023_v18 = vmul.f32 1.442695, %v4021_v1 }
0x3d4c   :  { %v3929_v38 = vpop.permute.xlu1 %3928 }
0x3d4d   :  { %5519 = vpow2.f32 %v4025_v51 }
0x3d4e   :  { %5521 = vpow2.f32 %v4023_v18 }
0x3d57   :  { %v5520_v17 = vpop.eup %5519 }
0x3d58   :  { %v4030_v31 = vsel %vm325_vm9, %v5520_v17, 0.0  ;;  %v5522_v30 = vpop.eup %5521  ;;  %v3959_v17 = vrot.slane %v3757_v19, 6 }
0x3d59   :  { %4031 = vadd.xlane.f32.xlu0 %v4030_v31  ;;  %v4027_v60 = vsel %vm325_vm9, %v5522_v30, 0.0 }
0x3d84   :  { %v6658_v61 = vpop.xlane.xlu0 %3884 }
0x3d85   :  { %v3939_v45 = vadd.f32 %v3929_v38, %v6658_v61 }
0x3d87   :  { %3944 = vperm.xlu1 %5326, %v3939_v45  }
0x3d88   :  { %v6661_v52 = vpop.xlane.xlu0 %3887 }
0x3d8c   :  { %v3936_v10 = vpop.permute.xlu0 %3935 }
0x3d8d   :  { %v3940_v20 = vadd.f32 %v3936_v10, %v6661_v52 }
0x3d8f   :  { %3947 = vperm.xlu0 %5325, %v3940_v20  }
0x3dab   :  { %4028 = vadd.xlane.f32.xlu1 %v4027_v60 }
0x3dbc   :  { %4199 = vbcast.lane.b32.xlu1 %v6668_v56, 256 }
0x3dc0   :  { %4206 = vbcast.lane.b32.xlu1 %v6673_v27, 256 }
0x3dc4   :  { %4498 = vperm.xlu1 %5326, %v4493_v29  }
0x3de6   :  { %v4032_v48 = vpop.xlane.xlu0 %4031 }
0x3de7   :  { %5523 = vlog2.f32 %v4032_v48 }
0x3e06   :  { %v3945_v3 = vpop.permute.xlu1 %3944 }
0x3e07   :  { %v3952_v51 = vrot.slane %v3945_v3, %v6270_v15 }
0x3e0e   :  { %v3948_v4 = vpop.permute.xlu0 %3947 }
0x3e0f   :  { %v3956_v43 = vrot.slane %v3948_v4, %v6270_v15 }
0x3e11   :  { %v3957_v31 = vsel %vm3008_vm14, %v3956_v43, %v3952_v51  ;;  %v4492_v43 = vld [vmem:[%s7289_s30] sm:$0xff] }
0x3e12   :  { %v6684_v38 = vsel %vm3625_vm3, %v3957_v31, %v3959_v17  ;;  %v5524_v31 = vpop.eup %5523 }
0x3e13   :  { %v4061_v45 = vrot.slane %v6684_v38, %v6218_v40 }
0x3e15   :  { %v4069_v10 = vrot.slane %v4061_v45, %v6218_v40  ;;  %v4062_v20 = vcombine.high %v4061_v45, %v4061_v45  ;;  %v4036_v45 = vmul.f32 0.6931472, %v5524_v31 }
0x3e17   :  { %v4077_v1 = vcombine.high %v4069_v10, %v4069_v10  ;;  %v4076_v18 = vrot.slane %v4062_v20, %v6218_v40  ;;  %v4038_v20 = vadd.f32 %v4036_v45, %v4020_v6 }
0x3e19   :  { %v4082_v30 = vrot.slane %v4077_v1, %v6199_v33  ;;  %v4078_v60 = vcombine.high %v4076_v18, %v4076_v18 }
0x3e1b   :  { %v6692_v19 = vadd.f32 %v4082_v30, %v6322_v28  ;;  %v4086_v29 = vrot.slane %v4078_v60, %v6199_v33  ;;  %v4048_v30 = vrot.slane %v4038_v20, %v6270_v15  ;;  %v4051_v60 = vrot.slane %v6622_v54, 6 }
0x3e1d   :  { %v4091_v3 = vsel %vm325_vm9, %v6692_v19, -inf  ;;  %v6698_v4 = vadd.f32 %v4086_v29, %v6322_v28 }
0x3e1e   :  { %4092 = vmax.xlane.f32.xlu0 %v4091_v3 }
0x3e1f   :  { %v4094_v51 = vsel %vm325_vm9, %v6698_v4, -inf }
0x3e20   :  { %4095 = vmax.xlane.f32.xlu1 %v4094_v51 }
0x3e31   :  { %4143 = vbcast.lane.b32.xlu1 %v6607_v62, 256 }
0x3e34   :  { %4495 = vperm.xlu0 %5325, %v4492_v43  }
0x3e38   :  { %4136 = vbcast.lane.b32.xlu0 %v6601_v9, 256  ;;  %v4029_v17 = vpop.xlane.xlu1 %4028 }
0x3e39   :  { %5525 = vlog2.f32 %v4029_v17 }
0x3e3c   :  { %v4200_v6 = vpop.permute.xlu1 %4199 }
0x3e40   :  { %v4207_v45 = vpop.permute.xlu1 %4206 }
0x3e43   :  { %v5526_v10 = vpop.eup %5525 }
0x3e44   :  { %v4034_v1 = vmul.f32 0.6931472, %v5526_v10  ;;  %v6725_v10 = vld [vmem:[%s7241_s18] sm:$0xff]  ;;  %s5623_s18 = smov 120  }
0x3e46   :  { %v4037_v18 = vadd.f32 %v4034_v1, %v4017_v32 }
0x3e48   :  { %v4044_v62 = vrot.slane %v4037_v18, %v6270_v15 }
0x3e4a   :  { %v4049_v29 = vsel %vm3215_vm15, %v4048_v30, %v4044_v62 }
0x3e4b   :  { %v6713_v48 = vsel %vm3625_vm3, %v4049_v29, %v4051_v60  ;;  %v4620_v60 = vrot.slane %v6264_v46, 2 }
0x3e4c   :  { %v4171_v9 = vcombine.high %v6713_v48, %v6713_v48 }
0x3e4d   :  { %v4621_v29 = vadd.s32 %v4620_v60, %v6264_v46 }
0x3e4e   :  { %v4178_v3 = vrot.slane %v4171_v9, %v6218_v40  ;;  %v4625_v9 = vrot.slane %v6264_v46, 4 }
0x3e50   :  { %v4186_v32 = vrot.slane %v4178_v3, %v6218_v40  ;;  %v4179_v51 = vcombine.high %v4178_v3, %v4178_v3  ;;  %v4626_v3 = vadd.s32 %v4625_v9, %v4621_v29 }
0x3e52   :  { %v4211_v43 = vrot.slane %v4186_v32, %v6199_v33  ;;  %v4193_v17 = vrot.slane %v4179_v51, %v6218_v40 }
0x3e54   :  { %v4218_v54 = vadd.f32 %v4211_v43, %v4200_v6  ;;  %v4215_v31 = vrot.slane %v4193_v17, %v6199_v33  ;;  %v4630_v6 = vrot.slane %v6264_v46, 6  ;;  %v4638_v43 = vrot.slane %v6526_v12, 2 }
0x3e56   :  { %v6728_v20 = vadd.f32 %v6725_v10, %v4218_v54  ;;  %v4219_v1 = vadd.f32 %v4215_v31, %v4207_v45  ;;  %v4631_v32 = vadd.s32 %v4630_v6, %v4626_v3  ;;  %v4643_v54 = vrot.slane %v6526_v12, 4  ;;  %v4499_v31 = vpop.permute.xlu1 %4498 }
0x3e57   :  { %vm4501_vm5 = vcmp.eq.s32.totalorder %v5801_v23, %v4499_v31 }
0x3e58   :  { %v4221_v18 = vadd.f32 %v6725_v10, %v4219_v1  ;;  %v4222_v30 = vsel %vm325_vm9, %v6728_v20, -inf  ;;  %v4633_v51 = vadd.s32 %v4631_v32, %v6526_v12  ;;  %v4648_v1 = vrot.slane %v6526_v12, 6 }
0x3e59   :  { %4223 = vmax.xlane.f32.xlu0 %v4222_v30  ;;  %v6757_v6 = vsel %vm4501_vm5, 1.0, %v7263_v11 }
0x3e5a   :  { %v4225_v62 = vsel %vm325_vm9, %v4221_v18, -inf  ;;  %v4639_v17 = vadd.s32 %v4638_v43, %v4633_v51 }
0x3e5b   :  { %4226 = vmax.xlane.f32.xlu1 %v4225_v62 }
0x3e5c   :  { %v4644_v45 = vadd.s32 %v4643_v54, %v4639_v17 }
0x3e5e   :  { %v6744_v62 = vadd.s32 %v4648_v1, %v4644_v45 }
0x3e60   :  { %vm4657_vm4 = vcmp.eq.s32.totalorder %v6744_v62, 1  ;;  %vm4665_vm13 = vcmp.eq.s32.totalorder %v6744_v62, 2  ;;  %vm4685_vm14 = vcmp.eq.s32.totalorder %v6744_v62, 4  ;;  %vm4721_vm5 = vcmp.eq.s32.totalorder %v6744_v62, 8 }
0x3e61   :  { %v4658_v12 = vsel %vm4657_vm4, 1, %v5610_v2  ;;  %v4666_v43 = vsel %vm4665_vm13, 1, %v5610_v2  ;;  %vm4701_vm4 = vcmp.eq.s32.totalorder %v6744_v62, 6  ;;  %vm3264_vm13 = vcmp.eq.f32.partialorder %v6458_v22, %v6485_v7 }
0x3eab   :  { %v6746_v60 = vpop.xlane.xlu0 %4092 }
0x3ead   :  { %v6742_v30 = vpop.xlane.xlu1 %4095 }
0x3eb1   :  { %v4144_v29 = vpop.permute.xlu1 %4143 }
0x3eb2   :  { %v4148_v46 = vadd.f32 %v4144_v29, %v6742_v30  ;;  %v4686_v29 = vsel %vm4685_vm14, 1, %v5610_v2  ;;  %vm3471_vm14 = vcmp.eq.f32.partialorder %v6504_v47, %v6542_v49 }
0x3eb3   :  { %v4496_v9 = vpop.permute.xlu0 %4495 }
0x3eb4   :  { %vm4500_vm6 = vcmp.eq.s32.totalorder %v5801_v23, %v4496_v9  ;;  %4155 = vperm.xlu1 %5326, %v4148_v46   ;;  %v4702_v46 = vsel %vm4701_vm4, 1, %v5610_v2  ;;  %vm3685_vm4 = vcmp.eq.f32.partialorder %v6585_v57, %v6610_v0 }
0x3eb5   :  { %v6753_v3 = vsel %vm4500_vm6, 1.0, %v7263_v11  ;;  %vm2853_vm6 = vcmp.eq.f32.partialorder %v6334_v5, %v6347_v36  ;;  %v3473_v5 = vsel %vm3471_vm14, %v5801_v23, 8  ;;  %v3687_v47 = vsel %vm3685_vm4, %v5801_v23, 8 }
0x3eb6   :  { %5198 = vmatprep.mubr.msk.f32.mxu1 %vm325_vm9, %v6753_v3  ;;  %v2855_v9 = vsel %vm2853_vm6, %v5801_v23, 8  ;;  %v6810_v0 = vsel %vm325_vm9, %v3687_v47, 2147483647  ;;  %vm4097_vm6 = vcmp.eq.f32.partialorder %v6692_v19, %v6746_v60  ;;  %vm4693_vm14 = vcmp.eq.s32.totalorder %v6744_v62, 5 }
0x3eb7   :  { %v4137_v32 = vpop.permute.xlu0 %4136  ;;  %5199 = vmatmul.mubr.msk.f32.vlgmr.msra.gmra.mrb[28].mxu1 %vm325_vm9, %v6757_v6  ;;  %vm4711_vm4 = vcmp.eq.s32.totalorder %v6744_v62, 7 }
0x3eb8   :  { %v4147_v51 = vadd.f32 %v4137_v32, %v6746_v60  ;;  %4660 = vperm.xlu1 %5326, %v4658_v12   ;;  %v6782_v12 = vsel %vm325_vm9, %v2855_v9, 2147483647  ;;  %v3266_v32 = vsel %vm3264_vm13, %v5801_v23, 8  ;;  %v3691_v9 = vshra.s32 %v6810_v0, 16 }
0x3eb9   :  { %vm4675_vm13 = vcmp.eq.s32.totalorder %v6744_v62, 3 }
0x3eba   :  { %4152 = vperm.xlu0 %5325, %v4147_v51   ;;  %v2873_v51 = vshra.s32 %v6782_v12, 16  ;;  %v6834_v19 = vcvt.s32.f32 %v3691_v9 }
0x3ebc   :  { %4668 = vperm.xlu1 %5326, %v4666_v43   ;;  %v6789_v43 = vsel %vm325_vm9, %v3266_v32, 2147483647  ;;  %v6794_v36 = vcvt.s32.f32 %v2873_v51 }
0x3ebd   :  { %v3270_v22 = vshra.s32 %v6789_v43, 16 }
0x3ee6   :  { %v6797_v7 = vpop.xlane.xlu0 %4223 }
0x3ee8   :  { %v6766_v17 = vpop.xlane.xlu1 %4226 }
0x3ee9   :  { %v4229_v54 = vsub.f32 %v4221_v18, %v6766_v17  ;;  %v4722_v18 = vsel %vm4721_vm5, 1, %v5610_v2  ;;  %vm3889_vm5 = vcmp.eq.f32.partialorder %v6646_v55, %v6658_v61 }
0x3eeb   :  { %v4232_v31 = vmul.f32 1.442695, %v4229_v54  ;;  %v6800_v54 = vsel %vm325_vm9, %v3473_v5, 2147483647  ;;  %v4099_v5 = vsel %vm4097_vm6, %v5801_v23, 8  ;;  %vm3055_vm6 = vcmp.eq.f32.partialorder %v6380_v13, %v6411_v26 }
0x3eec   :  { %v3477_v57 = vshra.s32 %v6800_v54, 16  ;;  %v6839_v47 = vsel %vm325_vm9, %v4099_v5, 2147483647 }
0x3eed   :  { %5527 = vpow2.f32 %v4232_v31  ;;  %v6806_v31 = vcvt.s32.f32 %v3270_v22 }
0x3eee   :  { %v6820_v61 = vcvt.s32.f32 %v3477_v57 }
0x3ef7   :  { %v5528_v45 = vpop.eup %5527 }
0x3ef8   :  { %v4237_v1 = vsel %vm325_vm9, %v5528_v45, 0.0 }
0x3ef9   :  { %4238 = vadd.xlane.f32.xlu1 %v4237_v1  ;;  %v3891_v1 = vsel %vm3889_vm5, %v5801_v23, 8  ;;  %vm2852_vm5 = vcmp.eq.f32.partialorder %v6328_v25, %v6343_v16 }
0x3efa   :  { %v6824_v32 = vsel %vm325_vm9, %v3891_v1, 2147483647 }
0x3efb   :  { %v3895_v60 = vshra.s32 %v6824_v32, 16 }
0x3f0a   :  { %4688 = vperm.xlu1 %5326, %v4686_v29  }
0x3f0e   :  { %4704 = vperm.xlu1 %5326, %v4702_v46  }
0x3f12   :  { %4724 = vperm.xlu1 %5326, %v4722_v18   ;;  %v4167_v18 = vrot.slane %v6684_v38, 6 }
0x3f33   :  { %v4156_v49 = vpop.permute.xlu1 %4155 }
0x3f34   :  { %v4164_v29 = vrot.slane %v4156_v49, %v6270_v15 }
0x3f36   :  { %2876 = vmin.xlane.f32.xlu1 %v6794_v36 }
0x3f39   :  { %v4153_v45 = vpop.permute.xlu0 %4152 }
0x3f3a   :  { %v4160_v46 = vrot.slane %v4153_v45, %v6270_v15  ;;  %3273 = vmin.xlane.f32.xlu1 %v6806_v31  ;;  %v6843_v45 = vcvt.s32.f32 %v3895_v60 }
0x3f3c   :  { %v4165_v55 = vsel %vm3215_vm15, %v4164_v29, %v4160_v46  ;;  %v4103_v29 = vshra.s32 %v6839_v47, 16  ;;  %vm4650_vm15 = vcmp.eq.s32.totalorder %v6744_v62, 0 }
0x3f3d   :  { %v6828_v51 = vsel %vm3625_vm3, %v4165_v55, %v4167_v18  ;;  %v4651_v60 = vsel %vm4650_vm15, 1, %v5610_v2  ;;  %vm3056_vm15 = vcmp.eq.f32.partialorder %v6386_v63, %v6413_v14 }
0x3f3e   :  { %7290 = vst [vmem:[#allocation15_spill] sm:$0xff] %v6828_v51  ;;  %v4262_v38 = vcombine.high %v6828_v51, %v6828_v51  ;;  %3480 = vmin.xlane.f32.xlu1 %v6820_v61  ;;  %v6855_v5 = vcvt.s32.f32 %v4103_v29  ;;  %v3058_v25 = vsel %vm3056_vm15, %v5801_v23, 8 }
0x3f3f   :  { %v6900_v26 = vsel %vm325_vm9, %v3058_v25, 2147483647 }
0x3f40   :  { %v4269_v22 = vrot.slane %v4262_v38, %v6218_v40  ;;  %v3076_v14 = vshra.s32 %v6900_v26, 16 }
0x3f42   :  { %3694 = vmin.xlane.f32.xlu1 %v6834_v19  ;;  %v4277_v49 = vrot.slane %v4269_v22, %v6218_v40  ;;  %v4270_v57 = vcombine.high %v4269_v22, %v4269_v22 }
0x3f44   :  { %v4288_v1 = vrot.slane %v4277_v49, %v6199_v33  ;;  %v4284_v46 = vrot.slane %v4270_v57, %v6218_v40 }
0x3f46   :  { %3898 = vmin.xlane.f32.xlu1 %v6843_v45  ;;  %v6850_v18 = vadd.f32 %v4288_v1, %v6322_v28  ;;  %v4292_v55 = vrot.slane %v4284_v46, %v6199_v33  ;;  %v4228_v33 = vsub.f32 %v6728_v20, %v6797_v7  ;;  %v4676_v46 = vsel %vm4675_vm13, 1, %v5610_v2 }
0x3f47   :  { %v4712_v20 = vsel %vm4711_vm4, 1, %v5610_v2  ;;  %vm3265_vm13 = vcmp.eq.f32.partialorder %v6452_v21, %v6483_v42  ;;  %vm3686_vm4 = vcmp.eq.f32.partialorder %v6591_v34, %v6613_v41 }
0x3f48   :  { %v4297_v9 = vsel %vm325_vm9, %v6850_v18, -inf  ;;  %v6858_v38 = vadd.f32 %v4292_v55, %v6322_v28  ;;  %v4230_v22 = vmul.f32 1.442695, %v4228_v33  ;;  %v4694_v55 = vsel %vm4693_vm14, 1, %v5610_v2 }
0x3f49   :  { %4298 = vmax.xlane.f32.xlu0 %v4297_v9  ;;  %v2854_v9 = vsel %vm2852_vm5, %v5801_v23, 8  ;;  %v3267_v33 = vsel %vm3265_vm13, %v5801_v23, 8  ;;  %vm3472_vm14 = vcmp.eq.f32.partialorder %v6510_v39, %v6544_v37  ;;  %v3688_v37 = vsel %vm3686_vm4, %v5801_v23, 8 }
0x3f4a   :  { %4106 = vmin.xlane.f32.xlu1 %v6855_v5  ;;  %v4300_v40 = vsel %vm325_vm9, %v6858_v38, -inf  ;;  %5529 = vpow2.f32 %v4230_v22  ;;  %v6910_v21 = vsel %vm325_vm9, %v3267_v33, 2147483647  ;;  %v3474_v42 = vsel %vm3472_vm14, %v5801_v23, 8 }
0x3f4b   :  { %v6916_v22 = vcvt.s32.f32 %v3076_v14  ;;  %v6920_v39 = vsel %vm325_vm9, %v3474_v42, 2147483647  ;;  %vm3890_vm5 = vcmp.eq.f32.partialorder %v6652_v53, %v6661_v52  ;;  %v6930_v34 = vsel %vm325_vm9, %v3688_v37, 2147483647 }
0x3f4c   :  { %v3892_v41 = vsel %vm3890_vm5, %v5801_v23, 8 }
0x3f4d   :  { %4301 = vmax.xlane.f32.xlu0 %v4300_v40  ;;  %v6884_v40 = vsel %vm325_vm9, %v2854_v9, 2147483647  ;;  %v6940_v53 = vsel %vm325_vm9, %v3892_v41, 2147483647 }
0x3f4e   :  { %v2858_v62 = vshra.s32 %v6884_v40, 16 }
0x3f50   :  { %v6896_v16 = vcvt.s32.f32 %v2858_v62 }
0x3f54   :  { %v5530_v49 = vpop.eup %5529 }
0x3f55   :  { %v4234_v57 = vsel %vm325_vm9, %v5530_v49, 0.0  ;;  %v3285_v49 = vshra.s32 %v6910_v21, 16 }
0x3f63   :  { %4653 = vperm.xlu0 %5325, %v4651_v60   ;;  %v3057_v60 = vsel %vm3055_vm6, %v5801_v23, 8  ;;  %vm4098_vm6 = vcmp.eq.f32.partialorder %v6698_v4, %v6742_v30 }
0x3f64   :  { %v6891_v2 = vsel %vm325_vm9, %v3057_v60, 2147483647  ;;  %v4100_v52 = vsel %vm4098_vm6, %v5801_v23, 8  ;;  %v3910_v60 = vshra.s32 %v6940_v53, 16 }
0x3f65   :  { %v3061_v13 = vshra.s32 %v6891_v2, 16  ;;  %v6948_v62 = vsel %vm325_vm9, %v4100_v52, 2147483647 }
0x3f66   :  { %v6951_v4 = vcvt.s32.f32 %v3910_v60  ;;  %v4118_v30 = vshra.s32 %v6948_v62, 16 }
0x3f67   :  { %v6906_v63 = vcvt.s32.f32 %v3061_v13 }
0x3f68   :  { %v6963_v14 = vcvt.s32.f32 %v4118_v30 }
0x3f82   :  { %4235 = vadd.xlane.f32.xlu0 %v4234_v57  ;;  %v6926_v57 = vcvt.s32.f32 %v3285_v49 }
0x3f8a   :  { %v6868_v1 = vpop.f32.mrb[28].mxu1 }
0x3f8b   :  { %v6870_v29 = vpop.f32.mrb[29].mxu1 }
0x3f98   :  { %4678 = vperm.xlu0 %5325, %v4676_v46   ;;  %v3492_v46 = vshra.s32 %v6920_v39, 16 }
0x3f9c   :  { %4696 = vperm.xlu0 %5325, %v4694_v55   ;;  %v6936_v55 = vcvt.s32.f32 %v3492_v46 }
0x3fa0   :  { %4714 = vperm.xlu0 %5325, %v4712_v20   ;;  %v3706_v20 = vshra.s32 %v6930_v34, 16 }
0x3fa2   :  { %v6944_v9 = vcvt.s32.f32 %v3706_v20 }
0x3fbf   :  { %2861 = vmin.xlane.f32.xlu0 %v6896_v16 }
0x3fc3   :  { %3064 = vmin.xlane.f32.xlu0 %v6906_v63 }
0x3fc7   :  { %3079 = vmin.xlane.f32.xlu0 %v6916_v22 }
0x3fcb   :  { %3288 = vmin.xlane.f32.xlu0 %v6926_v57 }
0x3fcf   :  { %3495 = vmin.xlane.f32.xlu0 %v6936_v55 }
0x3fd3   :  { %3709 = vmin.xlane.f32.xlu0 %v6944_v9 }
0x3fd6   :  { %v6954_v25 = vpop.xlane.xlu0 %4298 }
0x3fd7   :  { %7291 = vst [vmem:[#allocation16_spill] sm:$0xff] %v6954_v25  ;;  %vm4303_vm15 = vcmp.eq.f32.partialorder %v6850_v18, %v6954_v25  ;;  %3913 = vmin.xlane.f32.xlu0 %v6951_v4 }
0x3fd8   :  { %v4305_v13 = vsel %vm4303_vm15, %v5801_v23, 8 }
0x3fd9   :  { %v6961_v33 = vsel %vm325_vm9, %v4305_v13, 2147483647  ;;  %v4510_v13 = vrot.slane %v6753_v3, 6 }
0x3fda   :  { %7292 = vst [vmem:[#allocation17_spill] sm:$0xff] %v6961_v33  ;;  %v6965_v42 = vpop.xlane.xlu0 %4301  ;;  %v4309_v49 = vshra.s32 %v6961_v33, 16 }
0x3fdb   :  { %7293 = vst [vmem:[#allocation18_spill] sm:$0xff] %v6965_v42  ;;  %vm4304_vm13 = vcmp.eq.f32.partialorder %v6858_v38, %v6965_v42  ;;  %4121 = vmin.xlane.f32.xlu0 %v6963_v14  ;;  %v4661_v38 = vpop.permute.xlu1 %4660 }
0x3fdc   :  { %v4306_v18 = vsel %vm4304_vm13, %v5801_v23, 8  ;;  %v6972_v37 = vcvt.s32.f32 %v4309_v49  ;;  %v4863_v49 = vsel %vm2749_vm7, 1.0, %v7263_v11  ;;  %vm4662_vm4 = vcmp.eq.s32.totalorder %v4661_v38, 1 }
0x3fdd   :  { %v6975_v46 = vsel %vm325_vm9, %v4306_v18, 2147483647  ;;  %v4515_v51 = vsel %vm1593_vm11, %v4863_v49, %v4510_v13  ;;  %v4663_v24 = vsel %vm4662_vm4, %v6753_v3, 0.0  ;;  %v4671_v23 = vrot.slane %v6753_v3, 2 }
0x3fde   :  { %7294 = vst [vmem:[#allocation19_spill] sm:$0xff] %v6972_v37  ;;  %4312 = vmin.xlane.f32.xlu1 %v6972_v37  ;;  %v4324_v41 = vshra.s32 %v6975_v46, 16  ;;  %vm4381_vm4 = vcmask 64518  }
0x3fdf   :  { %v4669_v52 = vpop.permute.xlu1 %4668 }
0x3fe0   :  { %v6979_v20 = vcvt.s32.f32 %v4324_v41  ;;  %vm4670_vm5 = vcmp.eq.s32.totalorder %v4669_v52, 1 }
0x3fe1   :  { %v4673_v11 = vsel %vm4670_vm5, %v4671_v23, 0.0  ;;  %vm4731_vm5 = vcmask 58368  }
0x3fe2   :  { %4327 = vmin.xlane.f32.xlu0 %v6979_v20  ;;  %v4654_v30 = vpop.permute.xlu0 %4653 }
0x3fe3   :  { %v4239_v60 = vpop.xlane.xlu1 %4238  ;;  %vm4655_vm14 = vcmp.eq.s32.totalorder %v4654_v30, 1 }
0x3fe4   :  { %5531 = vlog2.f32 %v4239_v60  ;;  %v4656_v28 = vsel %vm4655_vm14, %v4863_v49, 0.0  ;;  %v4511_v60 = vrot.slane %v6757_v6, 6 }
0x3fe5   :  { %v4664_v50 = vadd.f32 %v4663_v24, %v4656_v28 }
0x3fe6   :  { %v4512_v30 = vsel %vm1593_vm11, %v4510_v13, %v4511_v60 }
0x3fe7   :  { %v4689_v41 = vpop.permute.xlu1 %4688  ;;  %v4604_v38 = vmul.f32 %v6868_v1, %v4512_v30  ;;  %v4674_v42 = vadd.f32 %v4673_v11, %v4664_v50 }
0x3fe8   :  { %vm4690_vm7 = vcmp.eq.s32.totalorder %v4689_v41, 1 }
0x3fe9   :  { %v4608_v37 = vsel %vm325_vm9, %v4604_v38, 0.0  ;;  %v4691_v1 = vsel %vm4690_vm7, %v4510_v13, 0.0  ;;  %v4379_v13 = vrot.slane %v6725_v10, %v6358_v44 }
0x3feb   :  { %v4705_v49 = vpop.permute.xlu1 %4704 }
0x3fec   :  { %vm4706_vm11 = vcmp.eq.s32.totalorder %v4705_v49, 1 }
0x3fee   :  { %v5532_v58 = vpop.eup %5531 }
0x3fef   :  { %v4243_v25 = vmul.f32 0.6931472, %v5532_v58 }
0x3ff1   :  { %v4245_v33 = vadd.f32 %v4243_v25, %v6766_v17 }
0x3ff3   :  { %v4255_v38 = vrot.slane %v4245_v33, %v6270_v15 }
0x3ff8   :  { %4349 = vbcast.lane.b32.xlu0 %v6673_v27, 256  ;;  %v4603_v27 = vmul.f32 %v6870_v29, %v4515_v51  ;;  %v4681_v51 = vrot.slane %v6753_v3, 4 }
0x400f   :  { %v4236_v18 = vpop.xlane.xlu0 %4235 }
0x4010   :  { %5533 = vlog2.f32 %v4236_v18  ;;  %v4605_v18 = vsel %vm325_vm9, %v4603_v27, 0.0  ;;  %v4707_v27 = vrot.slane %v6757_v6, 2 }
0x4012   :  { %v4709_v17 = vsel %vm4706_vm11, %v4707_v27, 0.0 }
0x4017   :  { %4606 = vadd.xlane.f32.xlu0 %v4605_v18  ;;  %v4679_v29 = vpop.permute.xlu0 %4678  ;;  %v4725_v18 = vpop.permute.xlu1 %4724 }
0x4018   :  { %vm4680_vm6 = vcmp.eq.s32.totalorder %v4679_v29, 1  ;;  %vm4726_vm13 = vcmp.eq.s32.totalorder %v4725_v18, 1 }
0x4019   :  { %v4683_v52 = vsel %vm4680_vm6, %v4681_v51, 0.0  ;;  %v4258_v51 = vrot.slane %v6713_v48, 6  ;;  %v4728_v33 = vsel %vm4726_vm13, %v4511_v60, 0.0 }
0x401a   :  { %v5534_v24 = vpop.eup %5533  ;;  %v4684_v28 = vadd.f32 %v4683_v52, %v4674_v42  ;;  %v4717_v42 = vrot.slane %v6757_v6, 4 }
0x401b   :  { %v4241_v30 = vmul.f32 0.6931472, %v5534_v24  ;;  %4609 = vadd.xlane.f32.xlu0 %v4608_v37  ;;  %v4697_v23 = vpop.permute.xlu0 %4696 }
0x401c   :  { %v4692_v58 = vadd.f32 %v4691_v1, %v4684_v28  ;;  %vm4698_vm15 = vcmp.eq.s32.totalorder %v4697_v23, 1  ;;  %v2872_v23 = vand.u32 65535, %v6782_v12  ;;  %v3284_v12 = vand.u32 65535, %v6910_v21 }
0x401d   :  { %v4244_v11 = vadd.f32 %v4241_v30, %v6797_v7  ;;  %v4699_v50 = vsel %vm4698_vm15, %v6757_v6, 0.0  ;;  %v7014_v30 = vpop.xlane.xlu1 %2876  ;;  %v4517_v21 = vmul.f32 %v6757_v6, %v6426_v59 }
0x401e   :  { %v4700_v41 = vadd.f32 %v4699_v50, %v4692_v58  ;;  %vm2878_vm7 = vcmp.eq.f32.partialorder %v6794_v36, %v7014_v30  ;;  %v2874_v27 = vcvt.s32.f32 %v2872_v23  ;;  %v3075_v50 = vand.u32 65535, %v6900_v26 }
0x401f   :  { %v4251_v25 = vrot.slane %v4244_v11, %v6270_v15  ;;  %v4715_v37 = vpop.permute.xlu0 %4714 }
0x4020   :  { %v4710_v49 = vadd.f32 %v4709_v17, %v4700_v41  ;;  %vm4716_vm14 = vcmp.eq.s32.totalorder %v4715_v37, 1  ;;  %v2879_v60 = vsel %vm2878_vm7, %v2874_v27, inf  ;;  %v3286_v17 = vcvt.s32.f32 %v3284_v12 }
0x4021   :  { %v4719_v7 = vsel %vm4716_vm14, %v4717_v42, 0.0  ;;  %v4256_v29 = vsel %vm3423_vm0, %v4255_v38, %v4251_v25  ;;  %v3077_v42 = vcvt.s32.f32 %v3075_v50  ;;  %v4516_v38 = vmul.f32 %v6753_v3, %v6203_v35 }
0x4022   :  { %v4720_v52 = vadd.f32 %v4719_v7, %v4710_v49  ;;  %v4260_v24 = vsel %vm3625_vm3, %v4256_v29, %v4258_v51  ;;  %v3491_v25 = vand.u32 65535, %v6920_v39  ;;  %v2857_v49 = vand.u32 65535, %v6884_v40 }
0x4023   :  { %v7010_v28 = vadd.f32 %v4379_v13, %v4260_v24  ;;  %v4518_v26 = vsel %vm325_vm9, %v4516_v38, 0.0  ;;  %v3705_v39 = vand.u32 65535, %v6930_v34  ;;  %v3909_v40 = vand.u32 65535, %v6940_v53 }
0x4024   :  { %v4729_v1 = vadd.f32 %v4728_v33, %v4720_v52  ;;  %v2859_v7 = vcvt.s32.f32 %v2857_v49  ;;  %v3060_v52 = vand.u32 65535, %v6891_v2  ;;  %v4117_v2 = vand.u32 65535, %v6948_v62 }
0x4025   :  { %v4382_v10 = vsel %vm4381_vm4, %v7010_v28, -inf  ;;  %v3707_v29 = vcvt.s32.f32 %v3705_v39  ;;  %v3269_v53 = vand.u32 65535, %v6789_v43  ;;  %v3476_v62 = vand.u32 65535, %v6800_v54 }
0x4026   :  { %4383 = vmax.xlane.f32.xlu1 %v4382_v10  ;;  %v4730_v48 = vmul.f32 %v4729_v1, %v4379_v13  ;;  %v3493_v13 = vcvt.s32.f32 %v3491_v25  ;;  %v3062_v33 = vcvt.s32.f32 %v3060_v52  ;;  %v3911_v1 = vcvt.s32.f32 %v3909_v40  ;;  %v7295_v25 = vld [vmem:[#allocation17_spill] sm:$0xff] }
0x4027   :  { %v4119_v23 = vcvt.s32.f32 %v4117_v2  ;;  %v3478_v27 = vcvt.s32.f32 %v3476_v62  ;;  %v3894_v12 = vand.u32 65535, %v6824_v32  ;;  %v4102_v38 = vand.u32 65535, %v6839_v47  ;;  %v7297_v47 = vld [vmem:[#allocation18_spill] sm:$0xff] }
0x4028   :  { %v4732_v58 = vsel %vm4731_vm5, %v4730_v48, 0.0  ;;  %v2711_v52 = vrot.slane %v6203_v35, 4  ;;  %v2725_v62 = vrot.slane %v6426_v59, 6 }
0x4029   :  { %4733 = vadd.xlane.f32.xlu0 %v4732_v58  ;;  %v3271_v58 = vcvt.s32.f32 %v3269_v53  ;;  %v4104_v32 = vcvt.s32.f32 %v4102_v38 }
0x402d   :  { %2880 = vmin.xlane.f32.xlu0 %v2879_v60  ;;  %v3690_v60 = vand.u32 65535, %v6810_v0 }
0x4037   :  { %4342 = vbcast.lane.b32.xlu1 %v6668_v56, 256 }
0x404c   :  { %v7020_v18 = vpop.xlane.xlu0 %2861 }
0x404d   :  { %vm2863_vm13 = vcmp.eq.f32.partialorder %v6896_v16, %v7020_v18 }
0x4050   :  { %v7022_v11 = vpop.xlane.xlu0 %3064 }
0x4051   :  { %vm3066_vm5 = vcmp.eq.f32.partialorder %v6906_v63, %v7022_v11 }
0x4054   :  { %v7025_v41 = vpop.xlane.xlu0 %3079 }
0x4055   :  { %vm3081_vm6 = vcmp.eq.f32.partialorder %v6916_v22, %v7025_v41  ;;  %v7040_v22 = vpop.xlane.xlu1 %3273 }
0x4056   :  { %v3082_v36 = vsel %vm3081_vm6, %v3077_v42, inf  ;;  %vm3275_vm6 = vcmp.eq.f32.partialorder %v6806_v31, %v7040_v22  ;;  %v4323_v31 = vand.u32 65535, %v6975_v46 }
0x4057   :  { %3083 = vmin.xlane.f32.xlu0 %v3082_v36 }
0x4058   :  { %v7032_v56 = vpop.xlane.xlu0 %3288 }
0x4059   :  { %vm3290_vm11 = vcmp.eq.f32.partialorder %v6926_v57, %v7032_v56  ;;  %v4521_v57 = vsel %vm325_vm9, %v4517_v21, 0.0  ;;  %v7057_v34 = vpop.xlane.xlu1 %3480  ;;  %v7296_v21 = vld [vmem:[#allocation19_spill] sm:$0xff] }
0x405a   :  { %v3291_v37 = vsel %vm3290_vm11, %v3286_v17, inf }
0x405b   :  { %4519 = vadd.xlane.f32.xlu1 %v4518_v26  ;;  %3292 = vmin.xlane.f32.xlu0 %v3291_v37  ;;  %v4308_v26 = vand.u32 65535, %v7295_v25 }
0x405c   :  { %v7042_v3 = vpop.xlane.xlu0 %3495 }
0x405d   :  { %vm3497_vm15 = vcmp.eq.f32.partialorder %v6936_v55, %v7042_v3  ;;  %v2864_v55 = vsel %vm2863_vm13, %v2859_v7, inf  ;;  %v7069_v63 = vpop.xlane.xlu1 %3694  ;;  %v2708_v7 = vrot.slane %v6203_v35, 2 }
0x405e   :  { %v3498_v51 = vsel %vm3497_vm15, %v3493_v13, inf  ;;  %vm3482_vm15 = vcmp.eq.f32.partialorder %v6820_v61, %v7057_v34  ;;  %vm3696_vm13 = vcmp.eq.f32.partialorder %v6834_v19, %v7069_v63  ;;  %v3692_v61 = vcvt.s32.f32 %v3690_v60 }
0x405f   :  { %4522 = vadd.xlane.f32.xlu1 %v4521_v57  ;;  %3499 = vmin.xlane.f32.xlu0 %v3498_v51  ;;  %v3483_v42 = vsel %vm3482_vm15, %v3478_v27, inf  ;;  %v3896_v19 = vcvt.s32.f32 %v3894_v12 }
0x4060   :  { %v7051_v6 = vpop.xlane.xlu0 %3709  ;;  %v3697_v36 = vsel %vm3696_vm13, %v3692_v61, inf  ;;  %v7299_v61 = vmov 0.0  }
0x4061   :  { %vm3711_vm14 = vcmp.eq.f32.partialorder %v6944_v9, %v7051_v6  ;;  %v3067_v9 = vsel %vm3066_vm5, %v3062_v33, inf  ;;  %v7080_v50 = vpop.xlane.xlu1 %3898  ;;  %v2714_v33 = vrot.slane %v6203_v35, 6 }
0x4062   :  { %v3712_v24 = vsel %vm3711_vm14, %v3707_v29, inf  ;;  %vm3900_vm5 = vcmp.eq.f32.partialorder %v6843_v45, %v7080_v50  ;;  %v4310_v45 = vcvt.s32.f32 %v4308_v26  ;;  %v2710_v29 = vadd.f32 %v2708_v7, %v6203_v35 }
0x4063   :  { %2865 = vmin.xlane.f32.xlu1 %v2864_v55  ;;  %3713 = vmin.xlane.f32.xlu0 %v3712_v24  ;;  %v3901_v17 = vsel %vm3900_vm5, %v3896_v19, inf  ;;  %v3086_v7 = vcvt.f32.s32 %v7025_v41 }
0x4064   :  { %v7061_v16 = vpop.xlane.xlu0 %3913  ;;  %v2713_v40 = vadd.f32 %v2711_v52, %v2710_v29 }
0x4065   :  { %vm3915_vm7 = vcmp.eq.f32.partialorder %v6951_v4, %v7061_v16  ;;  %v3276_v4 = vsel %vm3275_vm6, %v3271_v58, inf  ;;  %v7091_v0 = vpop.xlane.xlu1 %4106 }
0x4066   :  { %v3916_v10 = vsel %vm3915_vm7, %v3911_v1, inf  ;;  %vm4108_vm7 = vcmp.eq.f32.partialorder %v6855_v5, %v7091_v0  ;;  %v2716_v1 = vadd.f32 %v2714_v33, %v2713_v40 }
0x4067   :  { %3068 = vmin.xlane.f32.xlu1 %v3067_v9  ;;  %3917 = vmin.xlane.f32.xlu0 %v3916_v10  ;;  %v4109_v37 = vsel %vm4108_vm7, %v4104_v32, inf  ;;  %v2722_v9 = vrot.slane %v6426_v59, 4 }
0x4068   :  { %v7071_v48 = vpop.xlane.xlu0 %4121  ;;  %v2717_v2 = vadd.f32 %v2716_v1, %v6426_v59 }
0x4069   :  { %vm4123_vm11 = vcmp.eq.f32.partialorder %v6963_v14, %v7071_v48  ;;  %v4325_v14 = vcvt.s32.f32 %v4323_v31 }
0x406a   :  { %v4124_v43 = vsel %vm4123_vm11, %v4119_v23, inf }
0x406b   :  { %4125 = vmin.xlane.f32.xlu0 %v4124_v43  ;;  %3277 = vmin.xlane.f32.xlu1 %v3276_v4  ;;  %v7298_v43 = vld [vmem:[#allocation16_spill] sm:$0xff] }
0x406f   :  { %v7084_v54 = vpop.xlane.xlu0 %4327  ;;  %3484 = vmin.xlane.f32.xlu1 %v3483_v42 }
0x4070   :  { %vm4329_vm14 = vcmp.eq.f32.partialorder %v6979_v20, %v7084_v54  ;;  %v7096_v20 = vpop.xlane.xlu1 %4312 }
0x4071   :  { %v4330_v46 = vsel %vm4329_vm14, %v4325_v14, inf  ;;  %vm4314_vm6 = vcmp.eq.f32.partialorder %v7296_v21, %v7096_v20 }
0x4072   :  { %4331 = vmin.xlane.f32.xlu0 %v4330_v46  ;;  %v4315_v13 = vsel %vm4314_vm6, %v4310_v45, inf  ;;  %v4859_v46 = vsel %vm2737_vm8, 1.0, %v7299_v61  ;;  %v3280_v45 = vcvt.f32.s32 %v7040_v22  ;;  %vm4481_vm8 = vcmask 195584  }
0x4073   :  { %3698 = vmin.xlane.f32.xlu1 %v3697_v36  ;;  %v4350_v49 = vpop.permute.xlu0 %4349 }
0x4074   :  { %v4354_v39 = vadd.f32 %v4350_v49, %v7297_v47  ;;  %v4860_v49 = vsel %vm2738_vm2, 1.0, %v7299_v61  ;;  %v3281_v1 = vshll.u32 %v3280_v45, 16  ;;  %vm4490_vm2 = vcmask 517120  }
0x4077   :  { %3902 = vmin.xlane.f32.xlu1 %v3901_v17  ;;  %v2868_v17 = vcvt.f32.s32 %v7020_v18  ;;  %v3295_v18 = vcvt.f32.s32 %v7032_v56 }
0x4079   :  { %v3296_v56 = vshll.u32 %v3295_v18, 16 }
0x407b   :  { %4110 = vmin.xlane.f32.xlu1 %v4109_v37 }
0x407f   :  { %4316 = vmin.xlane.f32.xlu1 %v4315_v13 }
0x4088   :  { %4361 = vperm.xlu0 %5325, %v4354_v39   ;;  %v2869_v39 = vshll.u32 %v2868_v17, 16 }
0x40a4   :  { %v4607_v23 = vpop.xlane.xlu0 %4606 }
0x40a8   :  { %v4610_v27 = vpop.xlane.xlu0 %4609 }
0x40b3   :  { %v7102_v57 = vpop.xlane.xlu1 %4383 }
0x40b4   :  { %v4385_v5 = vsub.f32 %v7010_v28, %v7102_v57  ;;  %v2719_v28 = vrot.slane %v6426_v59, 2  ;;  %v2883_v59 = vcvt.f32.s32 %v7014_v30  ;;  %v3071_v30 = vcvt.f32.s32 %v7022_v11 }
0x40b6   :  { %v4386_v51 = vmul.f32 1.442695, %v4385_v5  ;;  %v2721_v53 = vadd.f32 %v2719_v28, %v2717_v2  ;;  %v7116_v60 = vpop.xlane.xlu0 %4733  ;;  %v2884_v21 = vshll.u32 %v2883_v59, 16  ;;  %v7302_v2 = vld [vmem:[#allocation10_spill] sm:$0xff]  ;;  %v3072_v41 = vshll.u32 %v3071_v30, 16 }
0x40b7   :  { %v4343_v58 = vpop.permute.xlu1 %4342  ;;  %v4409_v28 = vadd.s32 4294967288, %v7302_v2  ;;  %v4439_v30 = vadd.s32 4294967264, %v7302_v2 }
0x40b8   :  { %5535 = vpow2.f32 %v4386_v51  ;;  %v2724_v10 = vadd.f32 %v2722_v9, %v2721_v53  ;;  %v4353_v4 = vadd.f32 %v4343_v58, %v7298_v43  ;;  %v3487_v9 = vcvt.f32.s32 %v7057_v34 }
0x40b9   :  { %v3087_v58 = vshll.u32 %v3086_v7, 16 }
0x40ba   :  { %v2727_v31 = vadd.f32 %v2725_v62, %v2724_v10  ;;  %v2881_v42 = vpop.xlane.xlu0 %2880  ;;  %v4419_v10 = vadd.s32 4294967280, %v7302_v2 }
0x40bb   :  { %v2882_v25 = vcvt.f32.s32 %v2881_v42  ;;  %v3502_v42 = vcvt.f32.s32 %v7042_v3 }
0x40bc   :  { %v2728_v35 = vmul.f32 0.125, %v2727_v31 }
0x40bd   :  { %v2885_v29 = vadd.s32 %v2884_v21, %v2882_v25  ;;  %v3488_v21 = vshll.u32 %v3487_v9, 16 }
0x40c2   :  { %v5536_v55 = vpop.eup %5535 }
0x40c3   :  { %v4388_v24 = vsel %vm4381_vm4, %v5536_v55, 0.0 }
0x40c4   :  { %4389 = vadd.xlane.f32.xlu1 %v4388_v24 }
0x40d5   :  { %4358 = vperm.xlu1 %5326, %v4353_v4   ;;  %v4407_v4 = vrot.slane %v2885_v29, %v6270_v15 }
0x40d9   :  { %2730 = vrot.lane.b32.xlu1 %v2728_v35, %s5623_s18 }
0x40e4   :  { %v3084_v14 = vpop.xlane.xlu0 %3083 }
0x40e5   :  { %v3085_v53 = vcvt.f32.s32 %v3084_v14  ;;  %v7303_v14 = vld [vmem:[#allocation11_spill] sm:$0xff] }
0x40e6   :  { %v4412_v61 = vsub.s32 %v4409_v28, %v7303_v14 }
0x40e7   :  { %v3088_v34 = vadd.s32 %v3087_v58, %v3085_v53  ;;  %v4449_v58 = vadd.s32 4294967256, %v7302_v2 }
0x40e8   :  { %v4520_v36 = vpop.xlane.xlu1 %4519  ;;  %v3293_v38 = vpop.xlane.xlu0 %3292 }
0x40e9   :  { %v4611_v19 = vadd.f32 %v4607_v23, %v4520_v36  ;;  %v3294_v62 = vcvt.f32.s32 %v3293_v38  ;;  %v4422_v36 = vsub.s32 %v4419_v10, %v7303_v14 }
0x40eb   :  { %v4613_v32 = vmul.f32 %v4859_v46, %v4611_v19  ;;  %v3297_v17 = vadd.s32 %v3296_v56, %v3294_v62 }
0x40ec   :  { %v4523_v26 = vpop.xlane.xlu1 %4522  ;;  %v3500_v52 = vpop.xlane.xlu0 %3499 }
0x40ed   :  { %v4617_v37 = vrot.slane %v4613_v32, 2  ;;  %v4612_v47 = vadd.f32 %v4610_v27, %v4523_v26  ;;  %v4622_v51 = vrot.slane %v4613_v32, 4  ;;  %v4627_v24 = vrot.slane %v4613_v32, 6 }
0x40ee   :  { %v3501_v25 = vcvt.f32.s32 %v3500_v52  ;;  %v4427_v29 = vrot.slane %v3297_v17, %v4422_v36 }
0x40ef   :  { %v4619_v5 = vadd.f32 %v4617_v37, %v4613_v32  ;;  %v4614_v22 = vmul.f32 %v4860_v49, %v4612_v47  ;;  %v4429_v32 = vadd.s32 4294967272, %v7302_v2  ;;  %v3701_v49 = vcvt.f32.s32 %v7069_v63 }
0x40f0   :  { %v2866_v40 = vpop.xlane.xlu1 %2865  ;;  %v3714_v12 = vpop.xlane.xlu0 %3713  ;;  %v3503_v47 = vshll.u32 %v3502_v42, 16  ;;  %v4128_v42 = vcvt.f32.s32 %v7071_v48  ;;  %v4319_v48 = vcvt.f32.s32 %v7096_v20 }
0x40f1   :  { %v4624_v55 = vadd.f32 %v4622_v51, %v4619_v5  ;;  %v2867_v33 = vcvt.f32.s32 %v2866_v40  ;;  %v4635_v27 = vrot.slane %v4614_v22, 2  ;;  %v4640_v59 = vrot.slane %v4614_v22, 4 }
0x40f2   :  { %v4645_v45 = vrot.slane %v4614_v22, 6  ;;  %v3716_v51 = vcvt.f32.s32 %v7051_v6  ;;  %v4432_v52 = vsub.s32 %v4429_v32, %v7303_v14  ;;  %v3504_v40 = vadd.s32 %v3503_v47, %v3501_v25 }
0x40f3   :  { %v4629_v11 = vadd.f32 %v4627_v24, %v4624_v55  ;;  %v2870_v23 = vadd.s32 %v2869_v39, %v2867_v33  ;;  %v4417_v39 = vrot.slane %v3088_v34, %v4412_v61  ;;  %v3715_v33 = vcvt.f32.s32 %v3714_v12 }
0x40f4   :  { %v3069_v43 = vpop.xlane.xlu1 %3068  ;;  %v3918_v55 = vpop.xlane.xlu0 %3917  ;;  %v3702_v9 = vshll.u32 %v3701_v49, 16  ;;  %v3905_v6 = vcvt.f32.s32 %v7080_v50  ;;  %v3717_v10 = vshll.u32 %v3716_v51, 16  ;;  %v4113_v50 = vcvt.f32.s32 %v7091_v0 }
0x40f5   :  { %v4632_v31 = vadd.f32 %v4629_v11, %v4614_v22  ;;  %v4403_v35 = vrot.slane %v2870_v23, %v6270_v15  ;;  %v3070_v46 = vcvt.f32.s32 %v3069_v43  ;;  %v4442_v11 = vsub.s32 %v4439_v30, %v7303_v14 }
0x40f6   :  { %v3919_v56 = vcvt.f32.s32 %v3918_v55  ;;  %v4459_v34 = vadd.s32 4294967248, %v7302_v2 }
0x40f7   :  { %v4637_v19 = vadd.f32 %v4635_v27, %v4632_v31  ;;  %v4408_v38 = vsel %vm2840_vm12, %v4407_v4, %v4403_v35  ;;  %v3073_v26 = vadd.s32 %v3072_v41, %v3070_v46  ;;  %v4437_v4 = vrot.slane %v3504_v40, %v4432_v52 }
0x40f8   :  { %v3278_v37 = vpop.xlane.xlu1 %3277  ;;  %v3718_v31 = vadd.s32 %v3717_v10, %v3715_v33 }
0x40f9   :  { %v3279_v3 = vcvt.f32.s32 %v3278_v37  ;;  %v4642_v13 = vadd.f32 %v4640_v59, %v4637_v19  ;;  %v4413_v5 = vrot.slane %v3073_v26, %v4412_v61  ;;  %v4126_v61 = vpop.xlane.xlu0 %4125  ;;  %v4452_v19 = vsub.s32 %v4449_v58, %v7303_v14 }
0x40fa   :  { %v4447_v32 = vrot.slane %v3718_v31, %v4442_v11  ;;  %v4127_v25 = vcvt.f32.s32 %v4126_v61  ;;  %v4114_v37 = vshll.u32 %v4113_v50, 16 }
0x40fb   :  { %v3282_v7 = vadd.s32 %v3281_v1, %v3279_v3  ;;  %v7143_v18 = vadd.f32 %v4645_v45, %v4642_v13  ;;  %v4418_v24 = vsel %vm2840_vm12, %v4417_v39, %v4413_v5  ;;  %v3920_v1 = vcvt.f32.s32 %v7061_v16 }
0x40fc   :  { %v3485_v22 = vpop.xlane.xlu1 %3484  ;;  %v4479_v63 = vsel %vm325_vm9, %v4408_v38, %v4418_v24  ;;  %v4334_v3 = vcvt.f32.s32 %v7084_v54  ;;  %v4462_v13 = vsub.s32 %v4459_v34, %v7303_v14  ;;  %v4469_v5 = vadd.s32 4294967240, %v7302_v2 }
0x40fd   :  { %v4423_v28 = vrot.slane %v3282_v7, %v4422_v36  ;;  %v3486_v53 = vcvt.f32.s32 %v3485_v22  ;;  %v3921_v16 = vshll.u32 %v3920_v1, 16  ;;  %v3906_v36 = vshll.u32 %v3905_v6, 16 }
0x40fe   :  { %vm4484_vm9 = vcmask 326656   ;;  %v4335_v20 = vshll.u32 %v4334_v3, 16  ;;  %v4320_v24 = vshll.u32 %v4319_v48, 16  ;;  %v4472_v22 = vsub.s32 %v4469_v5, %v7303_v14 }
0x40ff   :  { %v4428_v23 = vsel %vm2840_vm12, %v4427_v29, %v4423_v28  ;;  %v3489_v41 = vadd.s32 %v3488_v21, %v3486_v53  ;;  %v3922_v59 = vadd.s32 %v3921_v16, %v3919_v56  ;;  %v4129_v21 = vshll.u32 %v4128_v42, 16  ;;  %v4332_v45 = vpop.xlane.xlu0 %4331 }
0x4100   :  { %v4480_v62 = vsel %vm427_vm10, %v4479_v63, %v4428_v23  ;;  %v3699_v43 = vpop.xlane.xlu1 %3698  ;;  %v4333_v29 = vcvt.f32.s32 %v4332_v45  ;;  %vm4486_vm10 = vcmask 392192  }
0x4101   :  { %v4433_v27 = vrot.slane %v3489_v41, %v4432_v52  ;;  %v3700_v35 = vcvt.f32.s32 %v3699_v43  ;;  %v4457_v39 = vrot.slane %v3922_v59, %v4452_v19  ;;  %v4130_v7 = vadd.s32 %v4129_v21, %v4127_v25 }
0x4102   :  { %v4336_v2 = vadd.s32 %v4335_v20, %v4333_v29 }
0x4103   :  { %v4438_v12 = vsel %vm2840_vm12, %v4437_v4, %v4433_v27  ;;  %v3703_v46 = vadd.s32 %v3702_v9, %v3700_v35  ;;  %v4467_v28 = vrot.slane %v4130_v7, %v4462_v13 }
0x4104   :  { %v4482_v38 = vsel %vm4481_vm8, %v4480_v62, %v4438_v12  ;;  %v3903_v17 = vpop.xlane.xlu1 %3902 }
0x4105   :  { %v4443_v26 = vrot.slane %v3703_v46, %v4442_v11  ;;  %v3904_v0 = vcvt.f32.s32 %v3903_v17  ;;  %v4477_v11 = vrot.slane %v4336_v2, %v4472_v22 }
0x4107   :  { %v4448_v49 = vsel %vm2840_vm12, %v4447_v32, %v4443_v26  ;;  %v3907_v47 = vadd.s32 %v3906_v36, %v3904_v0 }
0x4108   :  { %v4111_v51 = vpop.xlane.xlu1 %4110  ;;  %v4483_v30 = vsel %vm98_vm1, %v4482_v38, %v4448_v49  ;;  %vm4488_vm1 = vcmask 457728  }
0x4109   :  { %v4453_v52 = vrot.slane %v3907_v47, %v4452_v19  ;;  %v4112_v40 = vcvt.f32.s32 %v4111_v51 }
0x410b   :  { %v4458_v55 = vsel %vm2840_vm12, %v4457_v39, %v4453_v52  ;;  %v4115_v54 = vadd.s32 %v4114_v37, %v4112_v40 }
0x410c   :  { %v4317_v33 = vpop.xlane.xlu1 %4316  ;;  %v4485_v63 = vsel %vm4484_vm9, %v4483_v30, %v4458_v55 }
0x410d   :  { %v4463_v53 = vrot.slane %v4115_v54, %v4462_v13  ;;  %v4318_v9 = vcvt.f32.s32 %v4317_v33 }
0x410f   :  { %v4321_v6 = vadd.s32 %v4320_v24, %v4318_v9  ;;  %v4468_v1 = vsel %vm2840_vm12, %v4467_v28, %v4463_v53 }
0x4110   :  { %v4487_v10 = vsel %vm4486_vm10, %v4485_v63, %v4468_v1 }
0x4111   :  { %v4473_v23 = vrot.slane %v4321_v6, %v4472_v22 }
0x4113   :  { %v4478_v41 = vsel %vm2840_vm12, %v4477_v11, %v4473_v23 }
0x4114   :  { %v4489_v14 = vsel %vm4488_vm1, %v4487_v10, %v4478_v41 }
0x4115   :  { %4491 = vst.msk [vmem:[#allocation5] sm:$0x3] %vm4490_vm2, %v4489_v14 }
0x4116   :  { %5551 = shalt.err (!%p5548_p4)
}
0x4117   :  { %s5552_s27 = scalar_lea.hbm %s7245_s22, 32 }
0x4118   :  { %p5553_p5 = scmp.ne.s32.totalorder %s7245_s22, %s5552_s27  ;;  %p5556_p6 = scmp.lt.u32.totalorder %s5552_s27, %s7245_s22 }
0x411a   :  { %p5558_p7 = pnand %p5556_p6, %p5553_p5 }
0x411c   :  { %5561 = shalt.err (!%p5558_p7)
}
0x411d   :  { %4774 = dma.vmem_to_hbm [thread:$0]  %s4772_s6, 32, %s7245_s22, [#allocation6]   ;;  %v4362_v56 = vpop.permute.xlu0 %4361  ;;  %v7304_v31 = vld [vmem:[#allocation13_spill] sm:$0xff]  ;;  %v7305_v35 = vld [vmem:[#allocation15_spill] sm:$0xff]  ;;  %vm2733_vm12 = vcmask 1024  }
0x411e   :  { %v4370_v43 = vrot.slane %v4362_v56, %v6270_v15  ;;  %v4397_v27 = vrot.slane %v7304_v31, %v6358_v44  ;;  %v4373_v50 = vrot.slane %v7305_v35, 6  ;;  %s5625_s28 = smov [#allocation7]   ;;  %v4735_v44 = vadd.f32 %v7116_v60, %v7143_v18 }
0x411f   :  { %s4781_s3 = sshll.u32 %s5625_s28, 4  ;;  %s4782_s3 = int_to_ptr.vmem [resolvable:$true] %s4781_s3 }
0x4120   :  { %s5562_s19 = scalar_lea.vmem %s4782_s3, 32  ;;  %p5567_p9 = scmp.lt.s32.totalorder %s4782_s3, %s4782_s3 }
0x4121   :  { %p5563_p8 = scmp.ne.s32.totalorder %s4782_s3, %s5562_s19  ;;  %p5568_p10 = scmp.lt.s32.totalorder %s5562_s19, %s5562_s19 }
0x4123   :  { %p5569_p11 = por %p5568_p10, %p5567_p9 }
0x4125   :  { %p5570_p12 = pnand %p5569_p11, %p5563_p8 }
0x4151   :  { %v4390_v58 = vpop.xlane.xlu1 %4389 }
0x4152   :  { %5537 = vlog2.f32 %v4390_v58 }
0x4155   :  { %v4359_v62 = vpop.permute.xlu1 %4358 }
0x4156   :  { %v4366_v4 = vrot.slane %v4359_v62, %v6270_v15 }
0x4158   :  { %v4371_v16 = vsel %vm3423_vm0, %v4370_v43, %v4366_v4 }
0x4159   :  { %v2731_v42 = vpop.permute.xlu1 %2730  ;;  %v4375_v61 = vsel %vm3625_vm3, %v4371_v16, %v4373_v50 }
0x415a   :  { %2734 = vst.msk [vmem:[%s7244_s21] sm:$0x3] %vm2733_vm12, %v2731_v42  ;;  %v4398_v15 = vadd.f32 %v4397_v27, %v4375_v61 }
0x415c   :  { %v5538_v34 = vpop.eup %5537  ;;  %4399 = vst.msk [vmem:[#allocation7 - $0x6] sm:$0xc0] %vm4381_vm4, %v4398_v15 }
0x415d   :  { %v4392_v12 = vmul.f32 0.6931472, %v5538_v34 }
0x415e   :  { %5573 = shalt.err (!%p5570_p12)
}
0x415f   :  { %s5574_s21 = scalar_lea.hbm %s7246_s23, 32 }
0x4160   :  { %p5575_p13 = scmp.ne.s32.totalorder %s7246_s23, %s5574_s21  ;;  %p5578_p0 = scmp.lt.u32.totalorder %s5574_s21, %s7246_s23 }
0x4162   :  { %p5580_p1 = pnand %p5578_p0, %p5575_p13 }
0x4164   :  { %5583 = shalt.err (!%p5580_p1)
}
0x4165   :  { %4784 = dma.vmem_to_hbm [thread:$0]  %s4782_s3, 32, %s7246_s23, [#allocation6]   ;;  %v4393_v8 = vadd.f32 %v4392_v12, %v7102_v57  ;;  %v4737_v60 = vrot.slane %v4735_v44, 2  ;;  %vm4751_vm0 = vcmask 0  }
0x4166   :  { %s5626_s1 = smov [#allocation3]  }
0x4167   :  { %v4739_v18 = vsub.f32 %v4393_v8, %v4737_v60  ;;  %s4759_s26 = sshll.u32 %s5626_s1, 4  ;;  %s4760_s26 = int_to_ptr.vmem [resolvable:$true] %s4759_s26 }
0x4168   :  { %s5584_s23 = scalar_lea.vmem %s4760_s26, 16  ;;  %s5588_s18 = scalar_lea.vmem %s4760_s26, 32 }
0x4169   :  { %v4741_v46 = vrot.slane %v4739_v18, 6  ;;  %p5585_p2 = scmp.ne.s32.totalorder %s4760_s26, %s5584_s23  ;;  %p5589_p3 = scmp.lt.s32.totalorder %s4760_s26, %s4760_s26 }
0x416a   :  { %p5590_p4 = scmp.lt.s32.totalorder %s5588_s18, %s5584_s23 }
0x416b   :  { %v4743_v36 = vsel %vm2733_vm12, %v4741_v46, 0.0 }
0x416c   :  { %v4744_v19 = vrot.slane %v4743_v36, 4  ;;  %p5591_p5 = por %p5590_p4, %p5589_p3 }
0x416e   :  { %v4745_v59 = vadd.f32 %v4744_v19, %v4743_v36  ;;  %p5592_p6 = pnand %p5591_p5, %p5585_p2 }
0x4170   :  { %v4746_v38 = vrot.slane %v4745_v59, 2 }
0x4172   :  { %v4747_v17 = vadd.f32 %v4746_v38, %v4745_v59 }
0x4174   :  { %v4748_v32 = vrot.slane %v4747_v17, 1 }
0x4176   :  { %v4749_v25 = vadd.f32 %v4748_v32, %v4747_v17 }
0x4178   :  { %v4750_v26 = vmul.f32 0.5, %v4749_v25 }
0x417a   :  { %4752 = vst.msk [vmem:[#allocation3] sm:$0x1] %vm4751_vm0, %v4750_v26 }
0x417b   :  { %5595 = shalt.err (!%p5592_p6)
}
0x417c   :  { %s5596_s12 = scalar_lea.hbm %s7243_s20, 16 }
0x417d   :  { %p5597_p7 = scmp.ne.s32.totalorder %s7243_s20, %s5596_s12  ;;  %p5600_p8 = scmp.lt.u32.totalorder %s5596_s12, %s7243_s20 }
0x417f   :  { %p5602_p9 = pnand %p5600_p8, %p5597_p7 }
0x4181   :  { %5605 = shalt.err (!%p5602_p9)
}
0x4182   :  { %4762 = dma.vmem_to_hbm [thread:$0]  %s4760_s26, 16, %s7243_s20, [#allocation4]  }
0x4183   :  { %5606 = dma.done.wait [#allocation4], 16  }
0x4184   :  { %5607 = vsyncadd [#allocation4], 4294967280 }
0x4185   :  { %5608 = dma.done.wait [#allocation6], 64  }
0x4186   :  { %5609 = vsyncadd [#allocation6], 4294967232 }
0x4187   :  { %4796 = vsyncpa [#allocation4], 1 }
0x4188   :  { %4797 = vsyncpa [#allocation6], 1 }

</bundles_post_ra>
